<compile_context>
chip_gen: v7x
topology: tpu7x:2x2x1
jax: 0.10.0
libtpu: 0.0.40
codegen_flags: <defaults>
</compile_context>

<pallas_src>
import functools

import jax
import jax.numpy as jnp
import numpy as np
from jax.experimental import pallas as pl
from jax.experimental.pallas import tpu as pltpu

LANE = 128


def _round_up(n, m):
    return (n + m - 1) // m * m


# ----------------------------- Pallas kernel ------------------------------ #
def _deep_crossing_kernel(
    x_ref,                      # [TB, D]  f32  unpadded concat features
    rw1_ref, rb1_ref,           # [3, Dp, Dp] bf16, [3, 1, Dp] f32
    rw2_ref, rb2_ref,           # [3, Dp, Dp] bf16, [3, 1, Dp] f32
    dw0_ref, db0_ref,           # [Dp, H0] bf16,    [1, H0] f32
    dw1_ref, db1_ref,           # [H0, H1] bf16,    [1, H1] f32
    dw2_ref, db2_ref,           # [H1, H2] bf16,    [1, H2] f32
    fw_ref, fb_ref,             # [1, H2] f32 (final weight row), [1, 1] f32
    out_ref,                    # [TB, 1]  f32  sigmoid output
    xpad_ref,                   # [TB, Dp] f32  VMEM scratch (lane-padded x)
    *, d,                       # true feature dim (43)
):
    bf16 = jnp.bfloat16
    f32 = jnp.float32

    tb, dp = xpad_ref.shape

    # Zero-pad the features to 128 lanes inside the kernel (masked VMEM
    # stores); padded lanes stay exactly 0 through every layer because the
    # weight/bias padding is zero and the activation is ReLU.
    xpad_ref[:, :d] = x_ref[...]
    xpad_ref[:, d:] = jnp.zeros((tb, dp - d), f32)
    x = xpad_ref[...]                                   # (TB, Dp) f32 master

    # 3 residual blocks: x = x + relu(relu(x@W1 + b1)@W2 + b2)
    for i in range(3):
        h = jnp.dot(x.astype(bf16), rw1_ref[i],
                    preferred_element_type=f32) + rb1_ref[i]
        h = jnp.maximum(h, 0.0)
        h = jnp.dot(h.astype(bf16), rw2_ref[i],
                    preferred_element_type=f32) + rb2_ref[i]
        h = jnp.maximum(h, 0.0)
        x = x + h

    # DNN tower: Linear -> ReLU (dropout p=0.0 is identity)
    h = jnp.maximum(
        jnp.dot(x.astype(bf16), dw0_ref[...], preferred_element_type=f32)
        + db0_ref[...], 0.0)
    h = jnp.maximum(
        jnp.dot(h.astype(bf16), dw1_ref[...], preferred_element_type=f32)
        + db1_ref[...], 0.0)
    h = jnp.maximum(
        jnp.dot(h.astype(bf16), dw2_ref[...], preferred_element_type=f32)
        + db2_ref[...], 0.0)

    # Final linear as VPU multiply + lane reduction -> narrow (TB, 1) column;
    # sigmoid only on the real logit column (no 128-wide padded writeback).
    logits = jnp.sum(h * fw_ref[...], axis=-1, keepdims=True) + fb_ref[...]
    out_ref[...] = jax.nn.sigmoid(logits)


# --------------------------- Packing + wrapper ----------------------------- #
def pack_params(params, D, hidden_units):
    """Zero-pad every matmul dim to a multiple of 128 lanes; weights -> bf16."""
    Dp = _round_up(D, LANE)
    dims = [D] + list(hidden_units)
    dims_p = [Dp] + [_round_up(h, LANE) for h in hidden_units]

    pd = Dp - D
    packed = {
        "rw1": jnp.pad(params["rw1"], ((0, 0), (0, pd), (0, pd))).astype(jnp.bfloat16),
        "rb1": jnp.pad(params["rb1"], ((0, 0), (0, 0), (0, pd))).astype(jnp.float32),
        "rw2": jnp.pad(params["rw2"], ((0, 0), (0, pd), (0, pd))).astype(jnp.bfloat16),
        "rb2": jnp.pad(params["rb2"], ((0, 0), (0, 0), (0, pd))).astype(jnp.float32),
    }
    for li in range(len(hidden_units)):
        fin, fout = dims[li], dims[li + 1]
        finp, foutp = dims_p[li], dims_p[li + 1]
        packed[f"dw{li}"] = jnp.pad(
            params[f"dw{li}"], ((0, finp - fin), (0, foutp - fout))).astype(jnp.bfloat16)
        packed[f"db{li}"] = jnp.pad(
            params[f"db{li}"], ((0, 0), (0, foutp - fout))).astype(jnp.float32)

    # Final linear kept as a lane-dense f32 row (used on the VPU, not MXU).
    H2, H2p = dims[-1], dims_p[-1]
    packed["fw_row"] = jnp.pad(params["fw"].T,
                               ((0, 0), (0, H2p - H2))).astype(jnp.float32)
    packed["fb"] = params["fb"].astype(jnp.float32)      # (1, 1)
    return packed, dims_p


def _pick_batch_tile(B):
    # >=4 grid steps when B allows (>=2 per TensorCore on v7x megacore) while
    # growing the tile (up to 1024 rows, 256-multiples at real batch sizes)
    # to amortize per-grid-step overhead and fill the 256-wide MXU on v6e/v7x.
    return max(LANE, min(1024, _round_up(B, 4 * LANE) // 4))


def deep_crossing_pallas(x_cat, params, hidden_units, tb=None):
    """x_cat: [B, D] float32 concatenated [sparse_embeds, dense] -> [B, 1]."""
    assert len(hidden_units) == 3, "kernel is specialized for 3 DNN layers"
    B, D = x_cat.shape
    packed, dims_p = pack_params(params, D, hidden_units)
    Dp, H0, H1, H2 = dims_p

    if tb is None:
        tb = _pick_batch_tile(B)
    Bp = _round_up(B, tb)
    x_p = x_cat.astype(jnp.float32)
    if Bp != B:
        x_p = jnp.pad(x_p, ((0, Bp - B), (0, 0)))     # row pad only (no lane pad)

    row_map = lambda i: (i, 0)            # batch-tiled activations / output
    const2 = lambda i: (0, 0)             # weights resident across grid steps
    const3 = lambda i: (0, 0, 0)

    in_specs = [
        pl.BlockSpec((tb, D), row_map),                    # unpadded features
        pl.BlockSpec((3, Dp, Dp), const3), pl.BlockSpec((3, 1, Dp), const3),
        pl.BlockSpec((3, Dp, Dp), const3), pl.BlockSpec((3, 1, Dp), const3),
        pl.BlockSpec((Dp, H0), const2), pl.BlockSpec((1, H0), const2),
        pl.BlockSpec((H0, H1), const2), pl.BlockSpec((1, H1), const2),
        pl.BlockSpec((H1, H2), const2), pl.BlockSpec((1, H2), const2),
        pl.BlockSpec((1, H2), const2),                     # fw_row
        pl.BlockSpec((1, 1), const2),                      # fb
    ]
    out_specs = pl.BlockSpec((tb, 1), row_map)

    kernel = functools.partial(_deep_crossing_kernel, d=D)

    out = pl.pallas_call(
        kernel,
        out_shape=jax.ShapeDtypeStruct((Bp, 1), jnp.float32),
        grid_spec=pltpu.PrefetchScalarGridSpec(
            num_scalar_prefetch=0,
            grid=(Bp // tb,),
            in_specs=in_specs,
            out_specs=out_specs,
            scratch_shapes=[pltpu.VMEM((tb, Dp), jnp.float32)],
        ),
        compiler_params=pltpu.CompilerParams(
            dimension_semantics=("parallel",)),
    )(
        x_p,
        packed["rw1"], packed["rb1"], packed["rw2"], packed["rb2"],
        packed["dw0"], packed["db0"], packed["dw1"], packed["db1"],
        packed["dw2"], packed["db2"], packed["fw_row"], packed["fb"],
    )
    return out[:B]


# ------------------------------- Model glue -------------------------------- #
def init_params(key, num_dense, num_sparse, vocab_sizes, embedding_dim,
                hidden_units):
    """Deterministic synthetic parameter init (PyTorch-like uniform), f32."""
    D = num_sparse * embedding_dim + num_dense
    keys = jax.random.split(key, 64)
    ki = iter(keys)

    def lin(k, fan_in, fan_out):
        # nn.Linear default: U(-1/sqrt(fan_in), 1/sqrt(fan_in)); stored transposed.
        bound = 1.0 / np.sqrt(fan_in)
        k1, k2 = jax.random.split(k)
        w_t = jax.random.uniform(k1, (fan_in, fan_out), jnp.float32, -bound, bound)
        b = jax.random.uniform(k2, (1, fan_out), jnp.float32, -bound, bound)
        return w_t, b

    # Embedding tables (nn.Embedding default ~ N(0,1))
    embeds = [jax.random.normal(next(ki), (v, embedding_dim), jnp.float32)
              for v in vocab_sizes]

    # Residual blocks (stacked along leading axis of size 3)
    rw1, rb1, rw2, rb2 = [], [], [], []
    for _ in range(3):
        w, b = lin(next(ki), D, D); rw1.append(w); rb1.append(b[None])
        w, b = lin(next(ki), D, D); rw2.append(w); rb2.append(b[None])
    params = {
        "embeds": embeds,
        "rw1": jnp.stack(rw1), "rb1": jnp.concatenate(rb1, axis=0),
        "rw2": jnp.stack(rw2), "rb2": jnp.concatenate(rb2, axis=0),
    }

    dims = [D] + list(hidden_units)
    for i in range(len(hidden_units)):
        w, b = lin(next(ki), dims[i], dims[i + 1])
        params[f"dw{i}"] = w
        params[f"db{i}"] = b
    w, b = lin(next(ki), hidden_units[-1], 1)
    params["fw"] = w
    params["fb"] = b
    return params, D


def build_inputs(x, params, num_dense):
    """Embedding lookup + concat (glue, plain JAX).
    TODO(synk): fuse this gather into the kernel via scalar-prefetched ids."""
    dense = x[:, :num_dense].astype(jnp.float32)
    sparse_ids = x[:, num_dense:].astype(jnp.int32)
    embeds = [jnp.take(tbl, sparse_ids[:, i], axis=0)
              for i, tbl in enumerate(params["embeds"])]
    sparse_emb = jnp.concatenate(embeds, axis=-1)
    return jnp.concatenate([sparse_emb, dense], axis=-1)


def reference_forward(x_cat, params):
    """Pure-JAX f32 reference matching the PyTorch forward."""
    x = x_cat
    for i in range(3):
        h = jnp.maximum(x @ params["rw1"][i] + params["rb1"][i], 0.0)
        h = jnp.maximum(h @ params["rw2"][i] + params["rb2"][i], 0.0)
        x = x + h
    for i in range(3):
        x = jnp.maximum(x @ params[f"dw{i}"] + params[f"db{i}"], 0.0)
    return jax.nn.sigmoid(x @ params["fw"] + params["fb"])


# ---------------------------------- Main ----------------------------------- #
if __name__ == "__main__":
    B = 1024                     # auto tile -> tb=256, 4 grid steps
    num_dense = 3
    num_sparse = 5
    embedding_dim = 8
    hidden_units = [128, 64, 32]
    vocab_sizes = [10, 7, 12, 5, 9]     # sparse_feature_map values

    key = jax.random.PRNGKey(0)
    k_par, k_dense, k_sparse = jax.random.split(key, 3)

    params, D = init_params(k_par, num_dense, num_sparse, vocab_sizes,
                            embedding_dim, hidden_units)

    # Input like the PyTorch module: [B, num_dense + num_sparse] float,
    # sparse columns hold integer category ids stored as floats.
    dense_part = jax.random.uniform(k_dense, (B, num_dense), jnp.float32)
    sparse_part = jnp.stack(
        [jax.random.randint(jax.random.fold_in(k_sparse, i), (B,), 0, v)
         for i, v in enumerate(vocab_sizes)], axis=1).astype(jnp.float32)
    x = jnp.concatenate([dense_part, sparse_part], axis=-1)

    x_cat = build_inputs(x, params, num_dense)                  # [B, 43]
    out = deep_crossing_pallas(x_cat, params, hidden_units)     # [B, 1]
    out = jax.block_until_ready(out)

    ref = reference_forward(x_cat, params)                      # f32 reference
    np.testing.assert_allclose(np.asarray(out), np.asarray(ref),
                               rtol=2e-2, atol=2e-2)
    print("KERNEL_OK")
</pallas_src>

<mosaic_0001>
module attributes {stable_mosaic.version = 11 : i64} {
  func.func @_deep_crossing_kernel(%arg0: i32, %arg1: memref<256x43xf32, #tpu.memory_space<vmem>>, %arg2: memref<3x128x128xbf16, #tpu.memory_space<vmem>>, %arg3: memref<3x1x128xf32, #tpu.memory_space<vmem>>, %arg4: memref<3x128x128xbf16, #tpu.memory_space<vmem>>, %arg5: memref<3x1x128xf32, #tpu.memory_space<vmem>>, %arg6: memref<128x128xbf16, #tpu.memory_space<vmem>>, %arg7: memref<1x128xf32, #tpu.memory_space<vmem>>, %arg8: memref<128x128xbf16, #tpu.memory_space<vmem>>, %arg9: memref<1x128xf32, #tpu.memory_space<vmem>>, %arg10: memref<128x128xbf16, #tpu.memory_space<vmem>>, %arg11: memref<1x128xf32, #tpu.memory_space<vmem>>, %arg12: memref<1x128xf32, #tpu.memory_space<vmem>>, %arg13: memref<1x1xf32, #tpu.memory_space<vmem>>, %arg14: memref<256x1xf32, #tpu.memory_space<vmem>>, %arg15: memref<256x128xf32, #tpu.memory_space<vmem>>) attributes {dimension_semantics = [#tpu.dimension_semantics<parallel>], iteration_bounds = array<i64: 4>, scalar_prefetch = 0 : i64, scratch_operands = 1 : i64, tpu.core_type = #tpu.core_type<tc>, window_params = [{transform_indices = @transform_0, window_bounds = array<i64: 256, 43>}, {pipeline_mode = #tpu.pipeline_mode<synchronous>, transform_indices = @transform_1, window_bounds = array<i64: 3, 128, 128>}, {pipeline_mode = #tpu.pipeline_mode<synchronous>, transform_indices = @transform_2, window_bounds = array<i64: 3, 1, 128>}, {pipeline_mode = #tpu.pipeline_mode<synchronous>, transform_indices = @transform_3, window_bounds = array<i64: 3, 128, 128>}, {pipeline_mode = #tpu.pipeline_mode<synchronous>, transform_indices = @transform_4, window_bounds = array<i64: 3, 1, 128>}, {pipeline_mode = #tpu.pipeline_mode<synchronous>, transform_indices = @transform_5, window_bounds = array<i64: 128, 128>}, {pipeline_mode = #tpu.pipeline_mode<synchronous>, transform_indices = @transform_6, window_bounds = array<i64: 1, 128>}, {pipeline_mode = #tpu.pipeline_mode<synchronous>, transform_indices = @transform_7, window_bounds = array<i64: 128, 128>}, {pipeline_mode = #tpu.pipeline_mode<synchronous>, transform_indices = @transform_8, window_bounds = array<i64: 1, 128>}, {pipeline_mode = #tpu.pipeline_mode<synchronous>, transform_indices = @transform_9, window_bounds = array<i64: 128, 128>}, {pipeline_mode = #tpu.pipeline_mode<synchronous>, transform_indices = @transform_10, window_bounds = array<i64: 1, 128>}, {pipeline_mode = #tpu.pipeline_mode<synchronous>, transform_indices = @transform_11, window_bounds = array<i64: 1, 128>}, {pipeline_mode = #tpu.pipeline_mode<synchronous>, transform_indices = @transform_12, window_bounds = array<i64: 1, 1>}, {transform_indices = @transform_13, window_bounds = array<i64: 256, 1>}]} {
    %c0 = arith.constant 0 : index
    %c0_0 = arith.constant 0 : index
    %0 = vector.load %arg1[%c0, %c0_0] : memref<256x43xf32, #tpu.memory_space<vmem>>, vector<256x43xf32>
    %c0_1 = arith.constant 0 : index
    %c0_2 = arith.constant 0 : index
    %1 = vector.load %arg15[%c0_1, %c0_2] : memref<256x128xf32, #tpu.memory_space<vmem>>, vector<256x43xf32>
    tpu.vector_store %arg15[%c0_1, %c0_2], %0 {strides = array<i32>} : memref<256x128xf32, #tpu.memory_space<vmem>>, vector<256x43xf32>,
    %cst = arith.constant 0.000000e+00 : f32
    %2 = vector.broadcast %cst : f32 to vector<256x85xf32>
    %c0_3 = arith.constant 0 : index
    %c43 = arith.constant 43 : index
    %3 = vector.load %arg15[%c0_3, %c43] : memref<256x128xf32, #tpu.memory_space<vmem>>, vector<256x85xf32>
    tpu.vector_store %arg15[%c0_3, %c43], %2 {strides = array<i32>} : memref<256x128xf32, #tpu.memory_space<vmem>>, vector<256x85xf32>,
    %c0_4 = arith.constant 0 : index
    %c0_5 = arith.constant 0 : index
    %4 = vector.load %arg15[%c0_4, %c0_5] : memref<256x128xf32, #tpu.memory_space<vmem>>, vector<256x128xf32>
    %5 = arith.truncf %4 : vector<256x128xf32> to vector<256x128xbf16>
    %c0_6 = arith.constant 0 : index
    %c0_7 = arith.constant 0 : index
    %c0_8 = arith.constant 0 : index
    %6 = vector.load %arg2[%c0_6, %c0_7, %c0_8] : memref<3x128x128xbf16, #tpu.memory_space<vmem>>, vector<1x128x128xbf16>
    %7 = vector.shape_cast %6 : vector<1x128x128xbf16> to vector<128x128xbf16>
    %cst_9 = arith.constant dense<0.000000e+00> : vector<256x128xf32>
    %8 = tpu.matmul %5, %7, %cst_9 {dimension_numbers = #tpu.dot_dimension_numbers<[1], [0], [0], [1], [0, 0, 1, 1], [], []>} : vector<256x128xbf16>, vector<128x128xbf16>, vector<256x128xf32> -> vector<256x128xf32>
    %c0_10 = arith.constant 0 : index
    %c0_11 = arith.constant 0 : index
    %c0_12 = arith.constant 0 : index
    %9 = vector.load %arg3[%c0_10, %c0_11, %c0_12] : memref<3x1x128xf32, #tpu.memory_space<vmem>>, vector<1x1x128xf32>
    %10 = vector.shape_cast %9 : vector<1x1x128xf32> to vector<1x128xf32>
    %11 = vector.broadcast %10 : vector<1x128xf32> to vector<256x128xf32>
    %12 = arith.addf %8, %11 : vector<256x128xf32>
    %cst_13 = arith.constant 0.000000e+00 : f32
    %13 = vector.broadcast %cst_13 : f32 to vector<256x128xf32>
    %14 = arith.maximumf %12, %13 : vector<256x128xf32>
    %15 = arith.truncf %14 : vector<256x128xf32> to vector<256x128xbf16>
    %c0_14 = arith.constant 0 : index
    %c0_15 = arith.constant 0 : index
    %c0_16 = arith.constant 0 : index
    %16 = vector.load %arg4[%c0_14, %c0_15, %c0_16] : memref<3x128x128xbf16, #tpu.memory_space<vmem>>, vector<1x128x128xbf16>
    %17 = vector.shape_cast %16 : vector<1x128x128xbf16> to vector<128x128xbf16>
    %cst_17 = arith.constant dense<0.000000e+00> : vector<256x128xf32>
    %18 = tpu.matmul %15, %17, %cst_17 {dimension_numbers = #tpu.dot_dimension_numbers<[1], [0], [0], [1], [0, 0, 1, 1], [], []>} : vector<256x128xbf16>, vector<128x128xbf16>, vector<256x128xf32> -> vector<256x128xf32>
    %c0_18 = arith.constant 0 : index
    %c0_19 = arith.constant 0 : index
    %c0_20 = arith.constant 0 : index
    %19 = vector.load %arg5[%c0_18, %c0_19, %c0_20] : memref<3x1x128xf32, #tpu.memory_space<vmem>>, vector<1x1x128xf32>
    %20 = vector.shape_cast %19 : vector<1x1x128xf32> to vector<1x128xf32>
    %21 = vector.broadcast %20 : vector<1x128xf32> to vector<256x128xf32>
    %22 = arith.addf %18, %21 : vector<256x128xf32>
    %cst_21 = arith.constant 0.000000e+00 : f32
    %23 = vector.broadcast %cst_21 : f32 to vector<256x128xf32>
    %24 = arith.maximumf %22, %23 : vector<256x128xf32>
    %25 = arith.addf %4, %24 : vector<256x128xf32>
    %26 = arith.truncf %25 : vector<256x128xf32> to vector<256x128xbf16>
    %c1 = arith.constant 1 : index
    %c0_22 = arith.constant 0 : index
    %c0_23 = arith.constant 0 : index
    %27 = vector.load %arg2[%c1, %c0_22, %c0_23] : memref<3x128x128xbf16, #tpu.memory_space<vmem>>, vector<1x128x128xbf16>
    %28 = vector.shape_cast %27 : vector<1x128x128xbf16> to vector<128x128xbf16>
    %cst_24 = arith.constant dense<0.000000e+00> : vector<256x128xf32>
    %29 = tpu.matmul %26, %28, %cst_24 {dimension_numbers = #tpu.dot_dimension_numbers<[1], [0], [0], [1], [0, 0, 1, 1], [], []>} : vector<256x128xbf16>, vector<128x128xbf16>, vector<256x128xf32> -> vector<256x128xf32>
    %c1_25 = arith.constant 1 : index
    %c0_26 = arith.constant 0 : index
    %c0_27 = arith.constant 0 : index
    %30 = vector.load %arg3[%c1_25, %c0_26, %c0_27] : memref<3x1x128xf32, #tpu.memory_space<vmem>>, vector<1x1x128xf32>
    %31 = vector.shape_cast %30 : vector<1x1x128xf32> to vector<1x128xf32>
    %32 = vector.broadcast %31 : vector<1x128xf32> to vector<256x128xf32>
    %33 = arith.addf %29, %32 : vector<256x128xf32>
    %cst_28 = arith.constant 0.000000e+00 : f32
    %34 = vector.broadcast %cst_28 : f32 to vector<256x128xf32>
    %35 = arith.maximumf %33, %34 : vector<256x128xf32>
    %36 = arith.truncf %35 : vector<256x128xf32> to vector<256x128xbf16>
    %c1_29 = arith.constant 1 : index
    %c0_30 = arith.constant 0 : index
    %c0_31 = arith.constant 0 : index
    %37 = vector.load %arg4[%c1_29, %c0_30, %c0_31] : memref<3x128x128xbf16, #tpu.memory_space<vmem>>, vector<1x128x128xbf16>
    %38 = vector.shape_cast %37 : vector<1x128x128xbf16> to vector<128x128xbf16>
    %cst_32 = arith.constant dense<0.000000e+00> : vector<256x128xf32>
    %39 = tpu.matmul %36, %38, %cst_32 {dimension_numbers = #tpu.dot_dimension_numbers<[1], [0], [0], [1], [0, 0, 1, 1], [], []>} : vector<256x128xbf16>, vector<128x128xbf16>, vector<256x128xf32> -> vector<256x128xf32>
    %c1_33 = arith.constant 1 : index
    %c0_34 = arith.constant 0 : index
    %c0_35 = arith.constant 0 : index
    %40 = vector.load %arg5[%c1_33, %c0_34, %c0_35] : memref<3x1x128xf32, #tpu.memory_space<vmem>>, vector<1x1x128xf32>
    %41 = vector.shape_cast %40 : vector<1x1x128xf32> to vector<1x128xf32>
    %42 = vector.broadcast %41 : vector<1x128xf32> to vector<256x128xf32>
    %43 = arith.addf %39, %42 : vector<256x128xf32>
    %cst_36 = arith.constant 0.000000e+00 : f32
    %44 = vector.broadcast %cst_36 : f32 to vector<256x128xf32>
    %45 = arith.maximumf %43, %44 : vector<256x128xf32>
    %46 = arith.addf %25, %45 : vector<256x128xf32>
    %47 = arith.truncf %46 : vector<256x128xf32> to vector<256x128xbf16>
    %c2 = arith.constant 2 : index
    %c0_37 = arith.constant 0 : index
    %c0_38 = arith.constant 0 : index
    %48 = vector.load %arg2[%c2, %c0_37, %c0_38] : memref<3x128x128xbf16, #tpu.memory_space<vmem>>, vector<1x128x128xbf16>
    %49 = vector.shape_cast %48 : vector<1x128x128xbf16> to vector<128x128xbf16>
    %cst_39 = arith.constant dense<0.000000e+00> : vector<256x128xf32>
    %50 = tpu.matmul %47, %49, %cst_39 {dimension_numbers = #tpu.dot_dimension_numbers<[1], [0], [0], [1], [0, 0, 1, 1], [], []>} : vector<256x128xbf16>, vector<128x128xbf16>, vector<256x128xf32> -> vector<256x128xf32>
    %c2_40 = arith.constant 2 : index
    %c0_41 = arith.constant 0 : index
    %c0_42 = arith.constant 0 : index
    %51 = vector.load %arg3[%c2_40, %c0_41, %c0_42] : memref<3x1x128xf32, #tpu.memory_space<vmem>>, vector<1x1x128xf32>
    %52 = vector.shape_cast %51 : vector<1x1x128xf32> to vector<1x128xf32>
    %53 = vector.broadcast %52 : vector<1x128xf32> to vector<256x128xf32>
    %54 = arith.addf %50, %53 : vector<256x128xf32>
    %cst_43 = arith.constant 0.000000e+00 : f32
    %55 = vector.broadcast %cst_43 : f32 to vector<256x128xf32>
    %56 = arith.maximumf %54, %55 : vector<256x128xf32>
    %57 = arith.truncf %56 : vector<256x128xf32> to vector<256x128xbf16>
    %c2_44 = arith.constant 2 : index
    %c0_45 = arith.constant 0 : index
    %c0_46 = arith.constant 0 : index
    %58 = vector.load %arg4[%c2_44, %c0_45, %c0_46] : memref<3x128x128xbf16, #tpu.memory_space<vmem>>, vector<1x128x128xbf16>
    %59 = vector.shape_cast %58 : vector<1x128x128xbf16> to vector<128x128xbf16>
    %cst_47 = arith.constant dense<0.000000e+00> : vector<256x128xf32>
    %60 = tpu.matmul %57, %59, %cst_47 {dimension_numbers = #tpu.dot_dimension_numbers<[1], [0], [0], [1], [0, 0, 1, 1], [], []>} : vector<256x128xbf16>, vector<128x128xbf16>, vector<256x128xf32> -> vector<256x128xf32>
    %c2_48 = arith.constant 2 : index
    %c0_49 = arith.constant 0 : index
    %c0_50 = arith.constant 0 : index
    %61 = vector.load %arg5[%c2_48, %c0_49, %c0_50] : memref<3x1x128xf32, #tpu.memory_space<vmem>>, vector<1x1x128xf32>
    %62 = vector.shape_cast %61 : vector<1x1x128xf32> to vector<1x128xf32>
    %63 = vector.broadcast %62 : vector<1x128xf32> to vector<256x128xf32>
    %64 = arith.addf %60, %63 : vector<256x128xf32>
    %cst_51 = arith.constant 0.000000e+00 : f32
    %65 = vector.broadcast %cst_51 : f32 to vector<256x128xf32>
    %66 = arith.maximumf %64, %65 : vector<256x128xf32>
    %67 = arith.addf %46, %66 : vector<256x128xf32>
    %68 = arith.truncf %67 : vector<256x128xf32> to vector<256x128xbf16>
    %c0_52 = arith.constant 0 : index
    %c0_53 = arith.constant 0 : index
    %69 = vector.load %arg6[%c0_52, %c0_53] : memref<128x128xbf16, #tpu.memory_space<vmem>>, vector<128x128xbf16>
    %cst_54 = arith.constant dense<0.000000e+00> : vector<256x128xf32>
    %70 = tpu.matmul %68, %69, %cst_54 {dimension_numbers = #tpu.dot_dimension_numbers<[1], [0], [0], [1], [0, 0, 1, 1], [], []>} : vector<256x128xbf16>, vector<128x128xbf16>, vector<256x128xf32> -> vector<256x128xf32>
    %c0_55 = arith.constant 0 : index
    %c0_56 = arith.constant 0 : index
    %71 = vector.load %arg7[%c0_55, %c0_56] : memref<1x128xf32, #tpu.memory_space<vmem>>, vector<1x128xf32>
    %72 = vector.broadcast %71 : vector<1x128xf32> to vector<256x128xf32>
    %73 = arith.addf %70, %72 : vector<256x128xf32>
    %cst_57 = arith.constant 0.000000e+00 : f32
    %74 = vector.broadcast %cst_57 : f32 to vector<256x128xf32>
    %75 = arith.maximumf %73, %74 : vector<256x128xf32>
    %76 = arith.truncf %75 : vector<256x128xf32> to vector<256x128xbf16>
    %c0_58 = arith.constant 0 : index
    %c0_59 = arith.constant 0 : index
    %77 = vector.load %arg8[%c0_58, %c0_59] : memref<128x128xbf16, #tpu.memory_space<vmem>>, vector<128x128xbf16>
    %cst_60 = arith.constant dense<0.000000e+00> : vector<256x128xf32>
    %78 = tpu.matmul %76, %77, %cst_60 {dimension_numbers = #tpu.dot_dimension_numbers<[1], [0], [0], [1], [0, 0, 1, 1], [], []>} : vector<256x128xbf16>, vector<128x128xbf16>, vector<256x128xf32> -> vector<256x128xf32>
    %c0_61 = arith.constant 0 : index
    %c0_62 = arith.constant 0 : index
    %79 = vector.load %arg9[%c0_61, %c0_62] : memref<1x128xf32, #tpu.memory_space<vmem>>, vector<1x128xf32>
    %80 = vector.broadcast %79 : vector<1x128xf32> to vector<256x128xf32>
    %81 = arith.addf %78, %80 : vector<256x128xf32>
    %cst_63 = arith.constant 0.000000e+00 : f32
    %82 = vector.broadcast %cst_63 : f32 to vector<256x128xf32>
    %83 = arith.maximumf %81, %82 : vector<256x128xf32>
    %84 = arith.truncf %83 : vector<256x128xf32> to vector<256x128xbf16>
    %c0_64 = arith.constant 0 : index
    %c0_65 = arith.constant 0 : index
    %85 = vector.load %arg10[%c0_64, %c0_65] : memref<128x128xbf16, #tpu.memory_space<vmem>>, vector<128x128xbf16>
    %cst_66 = arith.constant dense<0.000000e+00> : vector<256x128xf32>
    %86 = tpu.matmul %84, %85, %cst_66 {dimension_numbers = #tpu.dot_dimension_numbers<[1], [0], [0], [1], [0, 0, 1, 1], [], []>} : vector<256x128xbf16>, vector<128x128xbf16>, vector<256x128xf32> -> vector<256x128xf32>
    %c0_67 = arith.constant 0 : index
    %c0_68 = arith.constant 0 : index
    %87 = vector.load %arg11[%c0_67, %c0_68] : memref<1x128xf32, #tpu.memory_space<vmem>>, vector<1x128xf32>
    %88 = vector.broadcast %87 : vector<1x128xf32> to vector<256x128xf32>
    %89 = arith.addf %86, %88 : vector<256x128xf32>
    %cst_69 = arith.constant 0.000000e+00 : f32
    %90 = vector.broadcast %cst_69 : f32 to vector<256x128xf32>
    %91 = arith.maximumf %89, %90 : vector<256x128xf32>
    %c0_70 = arith.constant 0 : index
    %c0_71 = arith.constant 0 : index
    %92 = vector.load %arg12[%c0_70, %c0_71] : memref<1x128xf32, #tpu.memory_space<vmem>>, vector<1x128xf32>
    %93 = vector.broadcast %92 : vector<1x128xf32> to vector<256x128xf32>
    %94 = arith.mulf %91, %93 : vector<256x128xf32>
    %cst_72 = arith.constant dense<0.000000e+00> : vector<256xf32>
    %95 = vector.multi_reduction <add>, %94, %cst_72 [1] : vector<256x128xf32> to vector<256xf32>
    %96 = vector.shape_cast %95 : vector<256xf32> to vector<256x1xf32>
    %c0_73 = arith.constant 0 : index
    %c0_74 = arith.constant 0 : index
    %97 = vector.load %arg13[%c0_73, %c0_74] : memref<1x1xf32, #tpu.memory_space<vmem>>, vector<1x1xf32>
    %98 = vector.broadcast %97 : vector<1x1xf32> to vector<256x1xf32>
    %99 = arith.addf %96, %98 : vector<256x1xf32>
    %100 = arith.negf %99 : vector<256x1xf32>
    %101 = math.exp %100 : vector<256x1xf32>
    %cst_75 = arith.constant 1.000000e+00 : f32
    %102 = vector.broadcast %cst_75 : f32 to vector<256x1xf32>
    %103 = arith.addf %102, %101 : vector<256x1xf32>
    %104 = arith.divf %102, %103 : vector<256x1xf32>
    %c0_76 = arith.constant 0 : index
    %c0_77 = arith.constant 0 : index
    %105 = vector.load %arg14[%c0_76, %c0_77] : memref<256x1xf32, #tpu.memory_space<vmem>>, vector<256x1xf32>
    tpu.vector_store %arg14[%c0_76, %c0_77], %104 {strides = array<i32>} : memref<256x1xf32, #tpu.memory_space<vmem>>, vector<256x1xf32>,
    return
  }
  func.func @transform_0(%arg0: i32) -> (i32, i32) {
    %c0_i32 = arith.constant 0 : i32
    %c0_i32_0 = arith.constant 0 : i32
    return %arg0, %c0_i32 : i32, i32
  }
  func.func @transform_1(%arg0: i32) -> (i32, i32, i32) {
    %c0_i32 = arith.constant 0 : i32
    %c0_i32_0 = arith.constant 0 : i32
    %c0_i32_1 = arith.constant 0 : i32
    %c0_i32_2 = arith.constant 0 : i32
    return %c0_i32, %c0_i32_0, %c0_i32_1 : i32, i32, i32
  }
  func.func @transform_2(%arg0: i32) -> (i32, i32, i32) {
    %c0_i32 = arith.constant 0 : i32
    %c0_i32_0 = arith.constant 0 : i32
    %c0_i32_1 = arith.constant 0 : i32
    %c0_i32_2 = arith.constant 0 : i32
    return %c0_i32, %c0_i32_0, %c0_i32_1 : i32, i32, i32
  }
  func.func @transform_3(%arg0: i32) -> (i32, i32, i32) {
    %c0_i32 = arith.constant 0 : i32
    %c0_i32_0 = arith.constant 0 : i32
    %c0_i32_1 = arith.constant 0 : i32
    %c0_i32_2 = arith.constant 0 : i32
    return %c0_i32, %c0_i32_0, %c0_i32_1 : i32, i32, i32
  }
  func.func @transform_4(%arg0: i32) -> (i32, i32, i32) {
    %c0_i32 = arith.constant 0 : i32
    %c0_i32_0 = arith.constant 0 : i32
    %c0_i32_1 = arith.constant 0 : i32
    %c0_i32_2 = arith.constant 0 : i32
    return %c0_i32, %c0_i32_0, %c0_i32_1 : i32, i32, i32
  }
  func.func @transform_5(%arg0: i32) -> (i32, i32) {
    %c0_i32 = arith.constant 0 : i32
    %c0_i32_0 = arith.constant 0 : i32
    %c0_i32_1 = arith.constant 0 : i32
    return %c0_i32, %c0_i32_0 : i32, i32
  }
  func.func @transform_6(%arg0: i32) -> (i32, i32) {
    %c0_i32 = arith.constant 0 : i32
    %c0_i32_0 = arith.constant 0 : i32
    %c0_i32_1 = arith.constant 0 : i32
    return %c0_i32, %c0_i32_0 : i32, i32
  }
  func.func @transform_7(%arg0: i32) -> (i32, i32) {
    %c0_i32 = arith.constant 0 : i32
    %c0_i32_0 = arith.constant 0 : i32
    %c0_i32_1 = arith.constant 0 : i32
    return %c0_i32, %c0_i32_0 : i32, i32
  }
  func.func @transform_8(%arg0: i32) -> (i32, i32) {
    %c0_i32 = arith.constant 0 : i32
    %c0_i32_0 = arith.constant 0 : i32
    %c0_i32_1 = arith.constant 0 : i32
    return %c0_i32, %c0_i32_0 : i32, i32
  }
  func.func @transform_9(%arg0: i32) -> (i32, i32) {
    %c0_i32 = arith.constant 0 : i32
    %c0_i32_0 = arith.constant 0 : i32
    %c0_i32_1 = arith.constant 0 : i32
    return %c0_i32, %c0_i32_0 : i32, i32
  }
  func.func @transform_10(%arg0: i32) -> (i32, i32) {
    %c0_i32 = arith.constant 0 : i32
    %c0_i32_0 = arith.constant 0 : i32
    %c0_i32_1 = arith.constant 0 : i32
    return %c0_i32, %c0_i32_0 : i32, i32
  }
  func.func @transform_11(%arg0: i32) -> (i32, i32) {
    %c0_i32 = arith.constant 0 : i32
    %c0_i32_0 = arith.constant 0 : i32
    %c0_i32_1 = arith.constant 0 : i32
    return %c0_i32, %c0_i32_0 : i32, i32
  }
  func.func @transform_12(%arg0: i32) -> (i32, i32) {
    %c0_i32 = arith.constant 0 : i32
    %c0_i32_0 = arith.constant 0 : i32
    %c0_i32_1 = arith.constant 0 : i32
    return %c0_i32, %c0_i32_0 : i32, i32
  }
  func.func @transform_13(%arg0: i32) -> (i32, i32) {
    %c0_i32 = arith.constant 0 : i32
    %c0_i32_0 = arith.constant 0 : i32
    return %arg0, %c0_i32 : i32, i32
  }
}

</mosaic_0001>

<bundles_post_ra>
// kernel: tpu_custom_call.1
= control target key start
LH: loop header
LB: loop body
LE: loop exit
PB: predicated region body
PF: predicated region fallthrough
CT: control target
= control target key end

     0   :  { %s4773_s27 = smov 0   ;;  %s6021_s0 = inlined_call_operand.vmem [shape: f32[1024,43], index: 0, kind: input, shape index: {}]   ;;  %s6022_s1 = inlined_call_operand.vmem [shape: bf16[3,128,128], index: 1, kind: input, shape index: {}]   ;;  %s6023_s2 = inlined_call_operand.vmem [shape: f32[3,1,128], index: 2, kind: input, shape index: {}]   ;;  %s6024_s3 = inlined_call_operand.vmem [shape: bf16[3,128,128], index: 3, kind: input, shape index: {}]   ;;  %s6025_s4 = inlined_call_operand.vmem [shape: f32[3,1,128], index: 4, kind: input, shape index: {}]   ;;  %s6026_s5 = inlined_call_operand.vmem [shape: bf16[128,128], index: 5, kind: input, shape index: {}]   ;;  %s6027_s6 = inlined_call_operand.vmem [shape: f32[1,128], index: 6, kind: input, shape index: {}]   ;;  %s6028_s7 = inlined_call_operand.vmem [shape: bf16[128,128], index: 7, kind: input, shape index: {}]   ;;  %s6029_s8 = inlined_call_operand.vmem [shape: f32[1,128], index: 8, kind: input, shape index: {}]   ;;  %s6030_s9 = inlined_call_operand.vmem [shape: bf16[128,128], index: 9, kind: input, shape index: {}]   ;;  %s6031_s10 = inlined_call_operand.vmem [shape: f32[1,128], index: 10, kind: input, shape index: {}]   ;;  %s6032_s11 = inlined_call_operand.vmem [shape: f32[1,128], index: 11, kind: input, shape index: {}]   ;;  %s6033_s12 = inlined_call_operand.<no memory space> [shape: f32[1,1], index: 12, kind: input, shape index: {}]   ;;  %s6034_s13 = inlined_call_operand.vmem [shape: f32[1024,1], index: 13, kind: output, shape index: {}]  }
   0x1   :  { %v18_v0 = vstv %s6033_s12 }
   0x2   :  { %19 = vst [vmem:[#allocation3] sm:$0x1] %v18_v0 }
   0x3 LB: > { %s3624_s28 = sadd.s32 4294967295, %s4697_s27   ;;  %p3628_p0 = scmp.ge.s32.totalorder %s4697_s27, 1  ;;  %s4697_s27 = sphi %s4773_s27, %s25_s27  }
   0x4   : > { %p390_p1 = scmp.lt.s32.totalorder %s4697_s27, 5 }
   0x6   : > { %p391_p2 = pnand %p3628_p0, %p390_p1 }
   0x7   : > { %v4491_v1 = vld [vmem:[%s6022_s1] sm:$0xff] (!%p391_p2)   ;;  %s3629_s12 = sshll.u32 (!%p391_p2), %s3624_s28, 5  ;;  %v4492_v2 = vld [vmem:[%s6022_s1 + $0x8] sm:$0xff] (!%p391_p2)   ;;  %v4493_v3 = vld [vmem:[%s6022_s1 + $0x10] sm:$0xff] (!%p391_p2)   ;;  %vm479_vm0 = vcmask (!%p391_p2), 351232   ;;  %vm512_vm1 = vcmask (!%p391_p2), 1047896  }
   0x8   : > { %394 = sbr.rel (%p391_p2) target bundleno = 2282 (0x8ea), region = 72  ;;  %p435_p3 = scmp.lt.s32.totalorder (!%p391_p2), %s3629_s12, 127  ;;  %4034 = vmatprep.subr.bf16.mxu0 (!%p391_p2), %v4491_v1  ;;  %4466 = vmatprep.subr.bf16.mxu1 (!%p391_p2), %v4491_v1  ;;  %v4796_v4 = vld [vmem:[%s6022_s1 + $0x18] sm:$0xff] (!%p391_p2)   ;;  %v4817_v11 = vld [vmem:[%s6022_s1 + $0x20] sm:$0xff] (!%p391_p2)   ;;  %v4699_v12 = vmov (!%p391_p2), 0.0   ;;  %v4496_v25 = vld [vmem:[%s6022_s1 + $0x28] sm:$0xff] (!%p391_p2)  }
   0x9   : > { %4035 = vmatpush3.bf16.msra.mxu0 (!%p391_p2), %v4491_v1  ;;  %4474 = vmatpush3.bf16.msra.mxu1 (!%p391_p2), %v4491_v1  ;;  %v4497_v38 = vld [vmem:[%s6022_s1 + $0x30] sm:$0xff] (!%p391_p2)   ;;  %v4498_v42 = vld [vmem:[%s6022_s1 + $0x38] sm:$0xff] (!%p391_p2)   ;;  %v4499_v56 = vld [vmem:[%s6024_s3] sm:$0xff] (!%p391_p2)   ;;  %vm3535_vm2 = vcmask (!%p391_p2), 7168  }
   0xa   : > { %4036 = vmatprep.subr.bf16.mxu0 (!%p391_p2), %v4492_v2  ;;  %4467 = vmatprep.subr.bf16.mxu1 (!%p391_p2), %v4492_v2  ;;  %v4500_v63 = vld [vmem:[%s6024_s3 + $0x8] sm:$0xff] (!%p391_p2)  }
   0xd   : > { %4037 = vmatpush3.bf16.msra.mxu0 (!%p391_p2), %v4492_v2  ;;  %4475 = vmatpush3.bf16.msra.mxu1 (!%p391_p2), %v4492_v2 }
   0xe   : > { %4038 = vmatprep.subr.bf16.mxu0 (!%p391_p2), %v4493_v3  ;;  %4468 = vmatprep.subr.bf16.mxu1 (!%p391_p2), %v4493_v3 }
   0xf   : > { %s6036_s12 = smov (!%p435_p3, %s3629_s12), 127 }
  0x10   : > { %s3630_s18 = sshll.u32 %s6036_s12, 3 }
  0x11   : > { %s4803_s23 = scalar_lea.vmem %s6021_s0, %s3630_s18  ;;  %4039 = vmatpush3.bf16.msra.mxu0 %v4493_v3  ;;  %4476 = vmatpush3.bf16.msra.mxu1 %v4493_v3  ;;  %s5932_s16 = scalar_lea.vmem %s6034_s13, %s3630_s18 }
  0x12   : > { %v447_v5 = vld [vmem:[%s4803_s23] sm:$0xff]  ;;  %v448_v6 = vld [vmem:[%s4803_s23 + $0x8] sm:$0xff]  ;;  %v449_v7 = vld [vmem:[%s4803_s23 + $0x10] sm:$0xff]  ;;  %4040 = vmatprep.subr.bf16.mxu0 %v4796_v4  ;;  %4469 = vmatprep.subr.bf16.mxu1 %v4796_v4 }
  0x13   : > { %480 = vst.msk [vmem:[#allocation2] sm:$0xff] %vm479_vm0, %v447_v5  ;;  %481 = vst.msk [vmem:[#allocation2 + $0x8] sm:$0xff] %vm479_vm0, %v448_v6  ;;  %v450_v8 = vld [vmem:[%s4803_s23 + $0x18] sm:$0xff]  ;;  %v451_v9 = vld [vmem:[%s4803_s23 + $0x20] sm:$0xff] }
  0x14   : > { %482 = vst.msk [vmem:[#allocation2 + $0x10] sm:$0xff] %vm479_vm0, %v449_v7  ;;  %v452_v10 = vld [vmem:[%s4803_s23 + $0x28] sm:$0xff]  ;;  %483 = vst.msk [vmem:[#allocation2 + $0x18] sm:$0xff] %vm479_vm0, %v450_v8  ;;  %v453_v13 = vld [vmem:[%s4803_s23 + $0x30] sm:$0xff] }
  0x15   : > { %513 = vst.msk [vmem:[#allocation2] sm:$0xff] %vm512_vm1, %v4699_v12  ;;  %514 = vst.msk [vmem:[#allocation2 + $0x8] sm:$0xff] %vm512_vm1, %v4699_v12  ;;  %v454_v14 = vld [vmem:[%s4803_s23 + $0x38] sm:$0xff]  ;;  %v455_v15 = vld [vmem:[%s4803_s23 + $0x40] sm:$0xff]  ;;  %4041 = vmatpush3.bf16.msra.mxu0 %v4796_v4  ;;  %4477 = vmatpush3.bf16.msra.mxu1 %v4796_v4 }
  0x16   : > { %515 = vst.msk [vmem:[#allocation2 + $0x10] sm:$0xff] %vm512_vm1, %v4699_v12  ;;  %516 = vst.msk [vmem:[#allocation2 + $0x18] sm:$0xff] %vm512_vm1, %v4699_v12  ;;  %v456_v16 = vld [vmem:[%s4803_s23 + $0x48] sm:$0xff]  ;;  %v457_v17 = vld [vmem:[%s4803_s23 + $0x50] sm:$0xff]  ;;  %4042 = vmatprep.subr.bf16.mxu0 %v4817_v11  ;;  %4470 = vmatprep.subr.bf16.mxu1 %v4817_v11 }
  0x17   : > { %484 = vst.msk [vmem:[#allocation2 + $0x20] sm:$0xff] %vm479_vm0, %v451_v9  ;;  %485 = vst.msk [vmem:[#allocation2 + $0x28] sm:$0xff] %vm479_vm0, %v452_v10  ;;  %v458_v18 = vld [vmem:[%s4803_s23 + $0x58] sm:$0xff]  ;;  %v459_v19 = vld [vmem:[%s4803_s23 + $0x60] sm:$0xff] }
  0x18   : > { %517 = vst.msk [vmem:[#allocation2 + $0x20] sm:$0xff] %vm512_vm1, %v4699_v12  ;;  %518 = vst.msk [vmem:[#allocation2 + $0x28] sm:$0xff] %vm512_vm1, %v4699_v12  ;;  %v460_v20 = vld [vmem:[%s4803_s23 + $0x68] sm:$0xff]  ;;  %v461_v21 = vld [vmem:[%s4803_s23 + $0x70] sm:$0xff] }
  0x19   : > { %486 = vst.msk [vmem:[#allocation2 + $0x30] sm:$0xff] %vm479_vm0, %v453_v13  ;;  %487 = vst.msk [vmem:[#allocation2 + $0x38] sm:$0xff] %vm479_vm0, %v454_v14  ;;  %v462_v22 = vld [vmem:[%s4803_s23 + $0x78] sm:$0xff]  ;;  %v463_v23 = vld [vmem:[%s4803_s23 + $0x80] sm:$0xff]  ;;  %4043 = vmatpush3.bf16.msra.mxu0 %v4817_v11  ;;  %4478 = vmatpush3.bf16.msra.mxu1 %v4817_v11 }
  0x1a   : > { %488 = vst.msk [vmem:[#allocation2 + $0x40] sm:$0xff] %vm479_vm0, %v455_v15  ;;  %489 = vst.msk [vmem:[#allocation2 + $0x48] sm:$0xff] %vm479_vm0, %v456_v16  ;;  %v464_v24 = vld [vmem:[%s4803_s23 + $0x88] sm:$0xff]  ;;  %v465_v26 = vld [vmem:[%s4803_s23 + $0x90] sm:$0xff]  ;;  %4044 = vmatprep.subr.bf16.mxu0 %v4496_v25  ;;  %4471 = vmatprep.subr.bf16.mxu1 %v4496_v25 }
  0x1b   : > { %519 = vst.msk [vmem:[#allocation2 + $0x30] sm:$0xff] %vm512_vm1, %v4699_v12  ;;  %520 = vst.msk [vmem:[#allocation2 + $0x38] sm:$0xff] %vm512_vm1, %v4699_v12  ;;  %v466_v27 = vld [vmem:[%s4803_s23 + $0x98] sm:$0xff]  ;;  %v467_v28 = vld [vmem:[%s4803_s23 + $0xa0] sm:$0xff] }
  0x1c   : > { %521 = vst.msk [vmem:[#allocation2 + $0x40] sm:$0xff] %vm512_vm1, %v4699_v12  ;;  %522 = vst.msk [vmem:[#allocation2 + $0x48] sm:$0xff] %vm512_vm1, %v4699_v12  ;;  %v468_v29 = vld [vmem:[%s4803_s23 + $0xa8] sm:$0xff]  ;;  %v469_v30 = vld [vmem:[%s4803_s23 + $0xb0] sm:$0xff] }
  0x1d   : > { %490 = vst.msk [vmem:[#allocation2 + $0x50] sm:$0xff] %vm479_vm0, %v457_v17  ;;  %491 = vst.msk [vmem:[#allocation2 + $0x58] sm:$0xff] %vm479_vm0, %v458_v18  ;;  %v470_v31 = vld [vmem:[%s4803_s23 + $0xb8] sm:$0xff]  ;;  %v471_v32 = vld [vmem:[%s4803_s23 + $0xc0] sm:$0xff]  ;;  %4045 = vmatpush3.bf16.msra.mxu0 %v4496_v25  ;;  %4479 = vmatpush3.bf16.msra.mxu1 %v4496_v25 }
  0x1e   : > { %523 = vst.msk [vmem:[#allocation2 + $0x50] sm:$0xff] %vm512_vm1, %v4699_v12  ;;  %524 = vst.msk [vmem:[#allocation2 + $0x58] sm:$0xff] %vm512_vm1, %v4699_v12  ;;  %v472_v33 = vld [vmem:[%s4803_s23 + $0xc8] sm:$0xff]  ;;  %v473_v34 = vld [vmem:[%s4803_s23 + $0xd0] sm:$0xff]  ;;  %4046 = vmatprep.subr.bf16.mxu0 %v4497_v38  ;;  %4472 = vmatprep.subr.bf16.mxu1 %v4497_v38 }
  0x1f   : > { %492 = vst.msk [vmem:[#allocation2 + $0x60] sm:$0xff] %vm479_vm0, %v459_v19  ;;  %493 = vst.msk [vmem:[#allocation2 + $0x68] sm:$0xff] %vm479_vm0, %v460_v20  ;;  %v4912_v35 = vld [vmem:[#allocation2] sm:$0xff]  ;;  %v4914_v36 = vld [vmem:[#allocation2 + $0x8] sm:$0xff] }
  0x20   : > { %494 = vst.msk [vmem:[#allocation2 + $0x70] sm:$0xff] %vm479_vm0, %v461_v21  ;;  %495 = vst.msk [vmem:[#allocation2 + $0x78] sm:$0xff] %vm479_vm0, %v462_v22  ;;  %v577_v37 = vpack.c.bf16 %v4914_v36, %v4912_v35  ;;  %v4947_v43 = vld [vmem:[#allocation2 + $0x10] sm:$0xff]  ;;  %v4949_v44 = vld [vmem:[#allocation2 + $0x18] sm:$0xff] }
  0x21   : > { %525 = vst.msk [vmem:[#allocation2 + $0x60] sm:$0xff] %vm512_vm1, %v4699_v12  ;;  %526 = vst.msk [vmem:[#allocation2 + $0x68] sm:$0xff] %vm512_vm1, %v4699_v12  ;;  %v474_v47 = vld [vmem:[%s4803_s23 + $0xd8] sm:$0xff]  ;;  %v4956_v48 = vld [vmem:[#allocation2 + $0x20] sm:$0xff]  ;;  %4047 = vmatpush3.bf16.msra.mxu0 %v4497_v38  ;;  %4480 = vmatpush3.bf16.msra.mxu1 %v4497_v38  ;;  %v578_v57 = vpack.c.bf16 %v4949_v44, %v4947_v43 }
  0x22   : > { %527 = vst.msk [vmem:[#allocation2 + $0x70] sm:$0xff] %vm512_vm1, %v4699_v12  ;;  %528 = vst.msk [vmem:[#allocation2 + $0x78] sm:$0xff] %vm512_vm1, %v4699_v12  ;;  %4050 = vmatprep.mubr.bf16.mxu0 %v577_v37  ;;  %v4958_v49 = vld [vmem:[#allocation2 + $0x28] sm:$0xff]  ;;  %v475_v52 = vld [vmem:[%s4803_s23 + $0xe0] sm:$0xff]  ;;  %4048 = vmatprep.subr.bf16.mxu0 %v4498_v42 }
  0x23   : > { %496 = vst.msk [vmem:[#allocation2 + $0x80] sm:$0xff] %vm479_vm0, %v463_v23  ;;  %497 = vst.msk [vmem:[#allocation2 + $0x88] sm:$0xff] %vm479_vm0, %v464_v24  ;;  %v476_v53 = vld [vmem:[%s4803_s23 + $0xe8] sm:$0xff]  ;;  %v477_v54 = vld [vmem:[%s4803_s23 + $0xf0] sm:$0xff]  ;;  %4473 = vmatprep.subr.bf16.mxu1 %v4498_v42  ;;  %v579_v59 = vpack.c.bf16 %v4958_v49, %v4956_v48 }
  0x24   : > { %529 = vst.msk [vmem:[#allocation2 + $0x80] sm:$0xff] %vm512_vm1, %v4699_v12  ;;  %530 = vst.msk [vmem:[#allocation2 + $0x88] sm:$0xff] %vm512_vm1, %v4699_v12  ;;  %v478_v55 = vld [vmem:[%s4803_s23 + $0xf8] sm:$0xff]  ;;  %v4994_v61 = vld [vmem:[#allocation2 + $0x30] sm:$0xff] }
  0x25   : > { %498 = vst.msk [vmem:[#allocation2 + $0x90] sm:$0xff] %vm479_vm0, %v465_v26  ;;  %499 = vst.msk [vmem:[#allocation2 + $0x98] sm:$0xff] %vm479_vm0, %v466_v27  ;;  %4049 = vmatpush3.bf16.msra.mxu0 %v4498_v42  ;;  %4481 = vmatpush3.bf16.msra.mxu1 %v4498_v42  ;;  %v4996_v62 = vld [vmem:[#allocation2 + $0x38] sm:$0xff]  ;;  %v5001_v0 = vld [vmem:[#allocation2 + $0x40] sm:$0xff] }
  0x26   : > { %500 = vst.msk [vmem:[#allocation2 + $0xa0] sm:$0xff] %vm479_vm0, %v467_v28  ;;  %501 = vst.msk [vmem:[#allocation2 + $0xa8] sm:$0xff] %vm479_vm0, %v468_v29  ;;  %4082 = vmatprep.subr.bf16.mxu1 %v4499_v56  ;;  %v5003_v1 = vld [vmem:[#allocation2 + $0x48] sm:$0xff]  ;;  %v4501_v6 = vld [vmem:[%s6024_s3 + $0x10] sm:$0xff]   ;;  %v580_v7 = vpack.c.bf16 %v4996_v62, %v4994_v61 }
  0x27   : > { %531 = vst.msk [vmem:[#allocation2 + $0x90] sm:$0xff] %vm512_vm1, %v4699_v12  ;;  %532 = vst.msk [vmem:[#allocation2 + $0x98] sm:$0xff] %vm512_vm1, %v4699_v12  ;;  %v581_v9 = vpack.c.bf16 %v5003_v1, %v5001_v0  ;;  %v4502_v11 = vld [vmem:[%s6024_s3 + $0x18] sm:$0xff]   ;;  %v4503_v20 = vld [vmem:[%s6024_s3 + $0x20] sm:$0xff]  }
  0x28   : > { %533 = vst.msk [vmem:[#allocation2 + $0xa0] sm:$0xff] %vm512_vm1, %v4699_v12  ;;  %534 = vst.msk [vmem:[#allocation2 + $0xa8] sm:$0xff] %vm512_vm1, %v4699_v12  ;;  %4051 = vmatmul.mubr.bf16.vlgmr.msra.gmra.mrb[0].mxu0 %v578_v57  ;;  %v5029_v13 = vld [vmem:[#allocation2 + $0x58] sm:$0xff]  ;;  %v5035_v16 = vld [vmem:[#allocation2 + $0x60] sm:$0xff] }
  0x29   : > { %502 = vst.msk [vmem:[#allocation2 + $0xb0] sm:$0xff] %vm479_vm0, %v469_v30  ;;  %503 = vst.msk [vmem:[#allocation2 + $0xb8] sm:$0xff] %vm479_vm0, %v470_v31  ;;  %4054 = vmatprep.mubr.bf16.mxu0 %v579_v59  ;;  %v5037_v17 = vld [vmem:[#allocation2 + $0x68] sm:$0xff]  ;;  %v5057_v26 = vld [vmem:[#allocation2 + $0x70] sm:$0xff] }
  0x2a   : > { %535 = vst.msk [vmem:[#allocation2 + $0xb0] sm:$0xff] %vm512_vm1, %v4699_v12  ;;  %536 = vst.msk [vmem:[#allocation2 + $0xb8] sm:$0xff] %vm512_vm1, %v4699_v12  ;;  %v583_v23 = vpack.c.bf16 %v5037_v17, %v5035_v16  ;;  %v4504_v25 = vld [vmem:[%s6024_s3 + $0x28] sm:$0xff]   ;;  %v5059_v27 = vld [vmem:[#allocation2 + $0x78] sm:$0xff] }
  0x2b   : > { %504 = vst.msk [vmem:[#allocation2 + $0xc0] sm:$0xff] %vm479_vm0, %v471_v32  ;;  %505 = vst.msk [vmem:[#allocation2 + $0xc8] sm:$0xff] %vm479_vm0, %v472_v33  ;;  %v4938_v39 = vld [vmem:[#allocation2 + $0x80] sm:$0xff]  ;;  %v4940_v40 = vld [vmem:[#allocation2 + $0x88] sm:$0xff]  ;;  %v584_v30 = vpack.c.bf16 %v5059_v27, %v5057_v26 }
  0x2c   : > { %506 = vst.msk [vmem:[#allocation2 + $0xd0] sm:$0xff] %vm479_vm0, %v473_v34  ;;  %v585_v41 = vpack.c.bf16 %v4940_v40, %v4938_v39  ;;  %507 = vst.msk [vmem:[#allocation2 + $0xd8] sm:$0xff] %vm479_vm0, %v474_v47  ;;  %v4505_v32 = vld [vmem:[%s6024_s3 + $0x30] sm:$0xff]   ;;  %v4506_v33 = vld [vmem:[%s6024_s3 + $0x38] sm:$0xff]  }
  0x2d   : > { %537 = vst.msk [vmem:[#allocation2 + $0xc0] sm:$0xff] %vm512_vm1, %v4699_v12  ;;  %538 = vst.msk [vmem:[#allocation2 + $0xc8] sm:$0xff] %vm512_vm1, %v4699_v12  ;;  %v4507_v34 = vld [vmem:[%s6022_s1 + $0x40] sm:$0xff]   ;;  %v4508_v37 = vld [vmem:[%s6022_s1 + $0x48] sm:$0xff]  }
  0x2e   : > { %539 = vst.msk [vmem:[#allocation2 + $0xd0] sm:$0xff] %vm512_vm1, %v4699_v12  ;;  %4066 = vmatprep.mubr.bf16.mxu1 %v585_v41  ;;  %v4951_v45 = vld [vmem:[#allocation2 + $0x90] sm:$0xff]  ;;  %v4953_v46 = vld [vmem:[#allocation2 + $0x98] sm:$0xff]  ;;  %540 = vst.msk [vmem:[#allocation2 + $0xd8] sm:$0xff] %vm512_vm1, %v4699_v12  ;;  %4130 = vmatprep.subr.bf16.mxu0 %v4507_v34 }
  0x2f   : > { %v4960_v50 = vld [vmem:[#allocation2 + $0xa0] sm:$0xff]  ;;  %v4962_v51 = vld [vmem:[#allocation2 + $0xa8] sm:$0xff]  ;;  %508 = vst.msk [vmem:[#allocation2 + $0xe0] sm:$0xff] %vm479_vm0, %v475_v52  ;;  %509 = vst.msk [vmem:[#allocation2 + $0xe8] sm:$0xff] %vm479_vm0, %v476_v53  ;;  %v586_v58 = vpack.c.bf16 %v4953_v46, %v4951_v45  ;;  %4131 = vmatpush3.bf16.msra.mxu0 %v4507_v34 }
  0x30   : > { %541 = vst.msk [vmem:[#allocation2 + $0xe0] sm:$0xff] %vm512_vm1, %v4699_v12  ;;  %542 = vst.msk [vmem:[#allocation2 + $0xe8] sm:$0xff] %vm512_vm1, %v4699_v12  ;;  %v587_v60 = vpack.c.bf16 %v4962_v51, %v4960_v50  ;;  %4055 = vmatmul.mubr.bf16.gmra.mrb[4].mxu0 %v580_v7  ;;  %4132 = vmatprep.subr.bf16.mxu0 %v4508_v37  ;;  %v4509_v38 = vld [vmem:[%s6022_s1 + $0x50] sm:$0xff]   ;;  %v4510_v41 = vld [vmem:[%s6022_s1 + $0x58] sm:$0xff]  }
  0x31   : > { %510 = vst.msk [vmem:[#allocation2 + $0xf0] sm:$0xff] %vm479_vm0, %v477_v54  ;;  %511 = vst.msk [vmem:[#allocation2 + $0xf8] sm:$0xff] %vm479_vm0, %v478_v55  ;;  %4067 = vmatmul.mubr.bf16.vlgmr.msra.gmra.mrb[0].mxu1 %v586_v58  ;;  %v5005_v2 = vld [vmem:[#allocation2 + $0xb0] sm:$0xff]  ;;  %v5007_v3 = vld [vmem:[#allocation2 + $0xb8] sm:$0xff]  ;;  %4058 = vmatprep.mubr.bf16.mxu0 %v581_v9 }
  0x32   : > { %543 = vst.msk [vmem:[#allocation2 + $0xf0] sm:$0xff] %vm512_vm1, %v4699_v12  ;;  %544 = vst.msk [vmem:[#allocation2 + $0xf8] sm:$0xff] %vm512_vm1, %v4699_v12  ;;  %4070 = vmatprep.mubr.bf16.mxu1 %v587_v60  ;;  %4083 = vmatpush3.bf16.msra.mxu1 %v4499_v56  ;;  %v588_v8 = vpack.c.bf16 %v5007_v3, %v5005_v2  ;;  %v5027_v12 = vld [vmem:[#allocation2 + $0x50] sm:$0xff]  ;;  %v4511_v42 = vld [vmem:[%s6022_s1 + $0x60] sm:$0xff]  }
  0x33   : > { %4084 = vmatprep.subr.bf16.mxu1 %v4500_v63  ;;  %v582_v21 = vpack.c.bf16 %v5029_v13, %v5027_v12  ;;  %4133 = vmatpush3.bf16.msra.mxu0 %v4508_v37  ;;  %v5093_v47 = vld [vmem:[%s6023_s2] ss:$0 sm:$0xff] }
  0x34   : > { %v5009_v4 = vld [vmem:[#allocation2 + $0xc0] sm:$0xff]  ;;  %v5011_v5 = vld [vmem:[#allocation2 + $0xc8] sm:$0xff]  ;;  %4134 = vmatprep.subr.bf16.mxu0 %v4509_v38 }
  0x35   : > { %v589_v10 = vpack.c.bf16 %v5011_v5, %v5009_v4  ;;  %v5031_v14 = vld [vmem:[#allocation2 + $0xd0] sm:$0xff]  ;;  %v5033_v15 = vld [vmem:[#allocation2 + $0xd8] sm:$0xff] }
  0x36   : > { %4085 = vmatpush3.bf16.msra.mxu1 %v4500_v63  ;;  %v590_v22 = vpack.c.bf16 %v5033_v15, %v5031_v14 }
  0x37   : > { %4086 = vmatprep.subr.bf16.mxu1 %v4501_v6  ;;  %v5039_v18 = vld [vmem:[#allocation2 + $0xe0] sm:$0xff]  ;;  %v5041_v19 = vld [vmem:[#allocation2 + $0xe8] sm:$0xff]  ;;  %4135 = vmatpush3.bf16.msra.mxu0 %v4509_v38 }
  0x38   : > { %v591_v24 = vpack.c.bf16 %v5041_v19, %v5039_v18  ;;  %4059 = vmatmul.mubr.bf16.gmra.mrb[8].mxu0 %v582_v21  ;;  %4136 = vmatprep.subr.bf16.mxu0 %v4510_v41 }
  0x39   : > { %4071 = vmatmul.mubr.bf16.gmra.mrb[4].mxu1 %v588_v8  ;;  %v5061_v28 = vld [vmem:[#allocation2 + $0xf0] sm:$0xff]  ;;  %v5063_v29 = vld [vmem:[#allocation2 + $0xf8] sm:$0xff]  ;;  %4062 = vmatprep.mubr.bf16.mxu0 %v583_v23 }
  0x3a   : > { %4074 = vmatprep.mubr.bf16.mxu1 %v589_v10  ;;  %4087 = vmatpush3.bf16.msra.mxu1 %v4501_v6  ;;  %v592_v31 = vpack.c.bf16 %v5063_v29, %v5061_v28 }
  0x3b   : > { %4088 = vmatprep.subr.bf16.mxu1 %v4502_v11  ;;  %4137 = vmatpush3.bf16.msra.mxu0 %v4510_v41 }
  0x3c   : > { %4138 = vmatprep.subr.bf16.mxu0 %v4511_v42 }
  0x3e   : > { %4089 = vmatpush3.bf16.msra.mxu1 %v4502_v11 }
  0x3f   : > { %4090 = vmatprep.subr.bf16.mxu1 %v4503_v20  ;;  %4139 = vmatpush3.bf16.msra.mxu0 %v4511_v42 }
  0x40   : > { %4063 = vmatmul.mubr.bf16.gmra.mrb[12].mxu0 %v584_v30 }
  0x41   : > { %4075 = vmatmul.mubr.bf16.gmra.mrb[8].mxu1 %v590_v22 }
  0x42   : > { %4078 = vmatprep.mubr.bf16.mxu1 %v591_v24  ;;  %4091 = vmatpush3.bf16.msra.mxu1 %v4503_v20 }
  0x43   : > { %4092 = vmatprep.subr.bf16.mxu1 %v4504_v25 }
  0x46   : > { %4093 = vmatpush3.bf16.msra.mxu1 %v4504_v25 }
  0x47   : > { %4094 = vmatprep.subr.bf16.mxu1 %v4505_v32 }
  0x49   : > { %4079 = vmatmul.mubr.bf16.gmra.mrb[12].mxu1 %v592_v31 }
  0x4a   : > { %4095 = vmatpush3.bf16.msra.mxu1 %v4505_v32 }
  0x4b   : > { %4096 = vmatprep.subr.bf16.mxu1 %v4506_v33 }
  0x4e   : > { %4097 = vmatpush3.bf16.msra.mxu1 %v4506_v33 }
  0xfb   : > { %v4052_v52 = vpop.f32.mrb[0].mxu0 }
  0xfc   : > { %v707_v54 = vadd.f32 %v4052_v52, %v5093_v47  ;;  %v698_v55 = vpop.f32.mrb[1].mxu0 }
  0xfd   : > { %v699_v58 = vadd.f32 %v5093_v47, %v698_v55  ;;  %v4053_v59 = vpop.f32.mrb[2].mxu0 }
  0xfe   : > { %v710_v6 = vadd.f32 %v4053_v59, %v5093_v47  ;;  %v701_v7 = vpop.f32.mrb[3].mxu0  ;;  %v827_v22 = vmax.f32 %v707_v54, 0.0 }
  0xff   : > { %v702_v11 = vadd.f32 %v5093_v47, %v701_v7  ;;  %v825_v25 = vmax.f32 %v699_v58, 0.0 }
 0x100   : > { %v828_v23 = vmax.f32 %v710_v6, 0.0 }
 0x101   : > { %v826_v30 = vmax.f32 %v702_v11, 0.0 }
 0x102   : > { %v858_v32 = vpack.c.bf16 %v828_v23, %v827_v22 }
 0x103   : > { %v857_v34 = vpack.c.bf16 %v826_v30, %v825_v25  ;;  %v4056_v37 = vpop.f32.mrb[4].mxu0 }
 0x104   : > { %v4068_v53 = vpop.f32.mrb[0].mxu1  ;;  %v723_v42 = vadd.f32 %v4056_v37, %v5093_v47  ;;  %v714_v52 = vpop.f32.mrb[5].mxu0 }
 0x105   : > { %v771_v56 = vadd.f32 %v4068_v53, %v5093_v47  ;;  %v762_v57 = vpop.f32.mrb[1].mxu1  ;;  %v715_v54 = vadd.f32 %v5093_v47, %v714_v52  ;;  %4098 = vmatprep.mubr.bf16.mxu1 %v857_v34 }
 0x106   : > { %v763_v60 = vadd.f32 %v5093_v47, %v762_v57  ;;  %v4069_v63 = vpop.f32.mrb[2].mxu1  ;;  %4099 = vmatmul.mubr.bf16.vlgmr.msra.gmra.mrb[16].mxu1 %v858_v32  ;;  %v831_v11 = vmax.f32 %v723_v42, 0.0 }
 0x107   : > { %v843_v8 = vmax.f32 %v771_v56, 0.0  ;;  %v774_v9 = vadd.f32 %v4069_v63, %v5093_v47  ;;  %v765_v10 = vpop.f32.mrb[3].mxu1  ;;  %v4057_v56 = vpop.f32.mrb[6].mxu0  ;;  %v829_v22 = vmax.f32 %v715_v54, 0.0 }
 0x108   : > { %v841_v20 = vmax.f32 %v763_v60, 0.0  ;;  %v766_v21 = vadd.f32 %v5093_v47, %v765_v10  ;;  %v726_v59 = vadd.f32 %v4057_v56, %v5093_v47  ;;  %v717_v60 = vpop.f32.mrb[7].mxu0 }
 0x109   : > { %v844_v24 = vmax.f32 %v774_v9, 0.0 }
 0x10a   : > { %v842_v31 = vmax.f32 %v766_v21, 0.0 }
 0x10b   : > { %v5103_v33 = vpack.c.bf16 %v844_v24, %v843_v8  ;;  %v718_v8 = vadd.f32 %v5093_v47, %v717_v60  ;;  %v4060_v32 = vpop.f32.mrb[8].mxu0 }
 0x10c   : > { %v5105_v38 = vpack.c.bf16 %v842_v31, %v841_v20  ;;  %v4072_v41 = vpop.f32.mrb[4].mxu1  ;;  %v832_v20 = vmax.f32 %v726_v59, 0.0  ;;  %v730_v52 = vpop.f32.mrb[9].mxu0 }
 0x10d   : > { %v787_v53 = vadd.f32 %v4072_v41, %v5093_v47  ;;  %v778_v55 = vpop.f32.mrb[5].mxu1  ;;  %v830_v23 = vmax.f32 %v718_v8, 0.0  ;;  %v739_v41 = vadd.f32 %v4060_v32, %v5093_v47  ;;  %v731_v42 = vadd.f32 %v5093_v47, %v730_v52  ;;  %v4061_v56 = vpop.f32.mrb[10].mxu0 }
 0x10e   : > { %v779_v57 = vadd.f32 %v5093_v47, %v778_v55  ;;  %v4073_v58 = vpop.f32.mrb[6].mxu1  ;;  %v860_v25 = vpack.c.bf16 %v832_v20, %v831_v11  ;;  %v733_v59 = vpop.f32.mrb[11].mxu0 }
 0x10f   : > { %v847_v63 = vmax.f32 %v787_v53, 0.0  ;;  %v790_v6 = vadd.f32 %v4073_v58, %v5093_v47  ;;  %v781_v7 = vpop.f32.mrb[7].mxu1  ;;  %v859_v31 = vpack.c.bf16 %v830_v23, %v829_v22  ;;  %v742_v58 = vadd.f32 %v4061_v56, %v5093_v47 }
 0x110   : > { %v845_v9 = vmax.f32 %v779_v57, 0.0  ;;  %v782_v10 = vadd.f32 %v5093_v47, %v781_v7  ;;  %v734_v7 = vadd.f32 %v5093_v47, %v733_v59 }
 0x111   : > { %v848_v21 = vmax.f32 %v790_v6, 0.0  ;;  %4102 = vmatprep.mubr.bf16.mxu1 %v859_v31  ;;  %v836_v11 = vmax.f32 %v742_v58, 0.0 }
 0x112   : > { %v846_v24 = vmax.f32 %v782_v10, 0.0  ;;  %4103 = vmatmul.mubr.bf16.gmra.mrb[20].mxu1 %v860_v25  ;;  %v835_v10 = vmax.f32 %v739_v41, 0.0  ;;  %v834_v22 = vmax.f32 %v734_v7, 0.0 }
 0x113   : > { %v5115_v30 = vpack.c.bf16 %v848_v21, %v847_v63  ;;  %v833_v21 = vmax.f32 %v731_v42, 0.0 }
 0x114   : > { %v5117_v34 = vpack.c.bf16 %v846_v24, %v845_v9  ;;  %v4076_v37 = vpop.f32.mrb[8].mxu1  ;;  %v862_v24 = vpack.c.bf16 %v836_v11, %v835_v10 }
 0x115   : > { %v803_v53 = vadd.f32 %v4076_v37, %v5093_v47  ;;  %v794_v55 = vpop.f32.mrb[9].mxu1  ;;  %v861_v32 = vpack.c.bf16 %v834_v22, %v833_v21  ;;  %v4064_v37 = vpop.f32.mrb[12].mxu0 }
 0x116   : > { %v795_v54 = vadd.f32 %v5093_v47, %v794_v55  ;;  %v4077_v57 = vpop.f32.mrb[10].mxu1  ;;  %v746_v55 = vpop.f32.mrb[13].mxu0 }
 0x117   : > { %v851_v60 = vmax.f32 %v803_v53, 0.0  ;;  %v806_v63 = vadd.f32 %v4077_v57, %v5093_v47  ;;  %v797_v6 = vpop.f32.mrb[11].mxu1  ;;  %v755_v53 = vadd.f32 %v4064_v37, %v5093_v47  ;;  %v747_v57 = vadd.f32 %v5093_v47, %v746_v55  ;;  %v4065_v41 = vpop.f32.mrb[14].mxu0  ;;  %4106 = vmatprep.mubr.bf16.mxu1 %v861_v32 }
 0x118   : > { %v849_v8 = vmax.f32 %v795_v54, 0.0  ;;  %v798_v9 = vadd.f32 %v5093_v47, %v797_v6  ;;  %v758_v59 = vadd.f32 %v4065_v41, %v5093_v47 }
 0x119   : > { %v852_v20 = vmax.f32 %v806_v63, 0.0  ;;  %v839_v11 = vmax.f32 %v755_v53, 0.0  ;;  %v837_v22 = vmax.f32 %v747_v57, 0.0  ;;  %v4520_v53 = vld [vmem:[%s6024_s3 + $0x68] sm:$0xff]   ;;  %v5172_v57 = vld [vmem:[%s6025_s4] ss:$0 sm:$0xff] }
 0x11a   : > { %v850_v23 = vmax.f32 %v798_v9, 0.0  ;;  %4107 = vmatmul.mubr.bf16.gmra.mrb[24].mxu1 %v862_v24  ;;  %v4517_v24 = vld [vmem:[%s6024_s3 + $0x50] sm:$0xff]  }
 0x11b   : > { %v870_v31 = vpack.c.bf16 %v852_v20, %v851_v60  ;;  %v749_v60 = vpop.f32.mrb[15].mxu0  ;;  %v840_v20 = vmax.f32 %v758_v59, 0.0 }
 0x11c   : > { %v869_v25 = vpack.c.bf16 %v850_v23, %v849_v8  ;;  %v4080_v52 = vpop.f32.mrb[12].mxu1  ;;  %v750_v8 = vadd.f32 %v5093_v47, %v749_v60 }
 0x11d   : > { %v819_v56 = vadd.f32 %v4080_v52, %v5093_v47  ;;  %v810_v54 = vpop.f32.mrb[13].mxu1  ;;  %v864_v37 = vpack.c.bf16 %v840_v20, %v839_v11 }
 0x11e   : > { %v811_v42 = vadd.f32 %v5093_v47, %v810_v54  ;;  %v4081_v58 = vpop.f32.mrb[14].mxu1  ;;  %v838_v23 = vmax.f32 %v750_v8, 0.0 }
 0x11f   : > { %v855_v63 = vmax.f32 %v819_v56, 0.0  ;;  %v822_v6 = vadd.f32 %v4081_v58, %v5093_v47  ;;  %v813_v7 = vpop.f32.mrb[15].mxu1  ;;  %v4521_v56 = vld [vmem:[%s6024_s3 + $0x70] sm:$0xff]  }
 0x120   : > { %v853_v9 = vmax.f32 %v811_v42, 0.0  ;;  %v814_v10 = vadd.f32 %v5093_v47, %v813_v7  ;;  %v863_v55 = vpack.c.bf16 %v838_v23, %v837_v22  ;;  %v4512_v47 = vld [vmem:[%s6022_s1 + $0x68] sm:$0xff]  }
 0x121   : > { %v856_v21 = vmax.f32 %v822_v6, 0.0  ;;  %4140 = vmatprep.subr.bf16.mxu0 %v4512_v47 }
 0x122   : > { %v854_v32 = vmax.f32 %v814_v10, 0.0  ;;  %4110 = vmatprep.mubr.bf16.mxu1 %v863_v55  ;;  %4141 = vmatpush3.bf16.msra.mxu0 %v4512_v47 }
 0x123   : > { %v872_v52 = vpack.c.bf16 %v856_v21, %v855_v63  ;;  %4111 = vmatmul.mubr.bf16.gmra.mrb[28].mxu1 %v864_v37 }
 0x124   : > { %v871_v54 = vpack.c.bf16 %v854_v32, %v853_v9  ;;  %4114 = vmatprep.mubr.bf16.mxu1 %v5105_v38  ;;  %v4513_v38 = vld [vmem:[%s6022_s1 + $0x70] sm:$0xff]  }
 0x125   : > { %4142 = vmatprep.subr.bf16.mxu0 %v4513_v38 }
 0x126   : > { %4143 = vmatpush3.bf16.msra.mxu0 %v4513_v38 }
 0x12b   : > { %4115 = vmatmul.mubr.bf16.gmra.mrb[32].mxu1 %v5103_v33  ;;  %v4514_v33 = vld [vmem:[%s6022_s1 + $0x78] sm:$0xff]  }
 0x12c   : > { %4118 = vmatprep.mubr.bf16.mxu1 %v5117_v34  ;;  %4144 = vmatprep.subr.bf16.mxu0 %v4514_v33  ;;  %v4516_v34 = vld [vmem:[%s6024_s3 + $0x48] sm:$0xff]  }
 0x12d   : > { %4145 = vmatpush3.bf16.msra.mxu0 %v4514_v33 }
 0x133   : > { %4119 = vmatmul.mubr.bf16.gmra.mrb[36].mxu1 %v5115_v30  ;;  %v4515_v30 = vld [vmem:[%s6024_s3 + $0x40] sm:$0xff]  }
 0x134   : > { %4122 = vmatprep.mubr.bf16.mxu1 %v869_v25  ;;  %4178 = vmatprep.subr.bf16.mxu1 %v4515_v30  ;;  %v4519_v25 = vld [vmem:[%s6024_s3 + $0x60] sm:$0xff]  }
 0x135   : > { %4179 = vmatpush3.bf16.msra.mxu1 %v4515_v30 }
 0x136   : > { %4180 = vmatprep.subr.bf16.mxu1 %v4516_v34 }
 0x139   : > { %4181 = vmatpush3.bf16.msra.mxu1 %v4516_v34 }
 0x13a   : > { %4182 = vmatprep.subr.bf16.mxu1 %v4517_v24 }
 0x13b   : > { %4123 = vmatmul.mubr.bf16.gmra.mrb[40].mxu1 %v870_v31  ;;  %v4518_v31 = vld [vmem:[%s6024_s3 + $0x58] sm:$0xff]  }
 0x13c   : > { %4126 = vmatprep.mubr.bf16.mxu1 %v871_v54 }
 0x13d   : > { %4183 = vmatpush3.bf16.msra.mxu1 %v4517_v24 }
 0x13e   : > { %4184 = vmatprep.subr.bf16.mxu1 %v4518_v31 }
 0x141   : > { %4185 = vmatpush3.bf16.msra.mxu1 %v4518_v31 }
 0x142   : > { %4186 = vmatprep.subr.bf16.mxu1 %v4519_v25 }
 0x143   : > { %4127 = vmatmul.mubr.bf16.gmra.mrb[44].mxu1 %v872_v52 }
 0x145   : > { %4187 = vmatpush3.bf16.msra.mxu1 %v4519_v25 }
 0x146   : > { %4188 = vmatprep.subr.bf16.mxu1 %v4520_v53 }
 0x149   : > { %4189 = vmatpush3.bf16.msra.mxu1 %v4520_v53 }
 0x14a   : > { %4190 = vmatprep.subr.bf16.mxu1 %v4521_v56 }
 0x14d   : > { %4191 = vmatpush3.bf16.msra.mxu1 %v4521_v56 }
 0x1d9   : > { %v4100_v41 = vpop.f32.mrb[16].mxu1 }
 0x1da   : > { %v987_v42 = vadd.f32 %v4100_v41, %v5172_v57  ;;  %v978_v58 = vpop.f32.mrb[17].mxu1 }
 0x1db   : > { %v979_v59 = vadd.f32 %v5172_v57, %v978_v58  ;;  %v4101_v60 = vpop.f32.mrb[18].mxu1 }
 0x1dc   : > { %v990_v63 = vadd.f32 %v4101_v60, %v5172_v57  ;;  %v981_v6 = vpop.f32.mrb[19].mxu1  ;;  %v1107_v9 = vmax.f32 %v987_v42, 0.0 }
 0x1dd   : > { %v1105_v7 = vmax.f32 %v979_v59, 0.0  ;;  %v982_v8 = vadd.f32 %v5172_v57, %v981_v6 }
 0x1de   : > { %v1108_v10 = vmax.f32 %v990_v63, 0.0  ;;  %v5188_v32 = vadd.f32 %v1107_v9, %v4947_v43 }
 0x1df   : > { %v1106_v11 = vmax.f32 %v982_v8, 0.0  ;;  %v5182_v21 = vadd.f32 %v1105_v7, %v4912_v35 }
 0x1e0   : > { %v5179_v20 = vadd.f32 %v1108_v10, %v4949_v44 }
 0x1e1   : > { %v5185_v22 = vadd.f32 %v1106_v11, %v4914_v36 }
 0x1e2   : > { %v1170_v35 = vpack.c.bf16 %v5179_v20, %v5188_v32 }
 0x1e3   : > { %v1169_v44 = vpack.c.bf16 %v5185_v22, %v5182_v21 }
 0x1e5   : > { %v4104_v23 = vpop.f32.mrb[20].mxu1  ;;  %4146 = vmatprep.mubr.bf16.mxu0 %v1169_v44 }
 0x1e6   : > { %v1003_v37 = vadd.f32 %v4104_v23, %v5172_v57  ;;  %v994_v52 = vpop.f32.mrb[21].mxu1  ;;  %4147 = vmatmul.mubr.bf16.vlgmr.msra.gmra.mrb[16].mxu0 %v1170_v35 }
 0x1e7   : > { %v995_v55 = vadd.f32 %v5172_v57, %v994_v52  ;;  %v4105_v54 = vpop.f32.mrb[22].mxu1 }
 0x1e8   : > { %v1006_v47 = vadd.f32 %v4105_v54, %v5172_v57  ;;  %v997_v36 = vpop.f32.mrb[23].mxu1  ;;  %v1111_v43 = vmax.f32 %v1003_v37, 0.0 }
 0x1e9   : > { %v1109_v38 = vmax.f32 %v995_v55, 0.0  ;;  %v998_v33 = vadd.f32 %v5172_v57, %v997_v36 }
 0x1ea   : > { %v1112_v30 = vmax.f32 %v1006_v47, 0.0  ;;  %v5208_v56 = vadd.f32 %v1111_v43, %v4994_v61 }
 0x1eb   : > { %v1110_v34 = vmax.f32 %v998_v33, 0.0  ;;  %v5202_v31 = vadd.f32 %v1109_v38, %v4956_v48 }
 0x1ec   : > { %v5199_v24 = vadd.f32 %v1112_v30, %v4996_v62 }
 0x1ed   : > { %v5205_v25 = vadd.f32 %v1110_v34, %v4958_v49  ;;  %v4108_v53 = vpop.f32.mrb[24].mxu1 }
 0x1ee   : > { %v1019_v41 = vadd.f32 %v4108_v53, %v5172_v57  ;;  %v1010_v42 = vpop.f32.mrb[25].mxu1  ;;  %v1172_v49 = vpack.c.bf16 %v5199_v24, %v5208_v56 }
 0x1ef   : > { %v1011_v58 = vadd.f32 %v5172_v57, %v1010_v42  ;;  %v4109_v59 = vpop.f32.mrb[26].mxu1  ;;  %v1171_v62 = vpack.c.bf16 %v5205_v25, %v5202_v31 }
 0x1f0   : > { %v1022_v60 = vadd.f32 %v4109_v59, %v5172_v57  ;;  %v1013_v48 = vpop.f32.mrb[27].mxu1  ;;  %v1115_v61 = vmax.f32 %v1019_v41, 0.0 }
 0x1f1   : > { %v1113_v63 = vmax.f32 %v1011_v58, 0.0  ;;  %v1014_v6 = vadd.f32 %v5172_v57, %v1013_v48  ;;  %4150 = vmatprep.mubr.bf16.mxu0 %v1171_v62 }
 0x1f2   : > { %v1116_v7 = vmax.f32 %v1022_v60, 0.0  ;;  %4151 = vmatmul.mubr.bf16.gmra.mrb[20].mxu0 %v1172_v49  ;;  %v5228_v37 = vadd.f32 %v1115_v61, %v5027_v12 }
 0x1f3   : > { %v1114_v8 = vmax.f32 %v1014_v6, 0.0  ;;  %v5222_v10 = vadd.f32 %v1113_v63, %v5001_v0 }
 0x1f4   : > { %v5219_v9 = vadd.f32 %v1116_v7, %v5029_v13 }
 0x1f5   : > { %v5225_v11 = vadd.f32 %v1114_v8, %v5003_v1 }
 0x1f6   : > { %v4112_v23 = vpop.f32.mrb[28].mxu1  ;;  %v1174_v1 = vpack.c.bf16 %v5219_v9, %v5228_v37 }
 0x1f7   : > { %v1035_v52 = vadd.f32 %v4112_v23, %v5172_v57  ;;  %v1026_v55 = vpop.f32.mrb[29].mxu1  ;;  %v1173_v13 = vpack.c.bf16 %v5225_v11, %v5222_v10 }
 0x1f8   : > { %v1027_v54 = vadd.f32 %v5172_v57, %v1026_v55  ;;  %v4113_v44 = vpop.f32.mrb[30].mxu1 }
 0x1f9   : > { %v1038_v35 = vadd.f32 %v4113_v44, %v5172_v57  ;;  %v1029_v0 = vpop.f32.mrb[31].mxu1  ;;  %4154 = vmatprep.mubr.bf16.mxu0 %v1173_v13  ;;  %v1119_v12 = vmax.f32 %v1035_v52, 0.0 }
 0x1fa   : > { %v1117_v47 = vmax.f32 %v1027_v54, 0.0  ;;  %v1030_v36 = vadd.f32 %v5172_v57, %v1029_v0  ;;  %4155 = vmatmul.mubr.bf16.gmra.mrb[24].mxu0 %v1174_v1 }
 0x1fb   : > { %v1120_v38 = vmax.f32 %v1038_v35, 0.0  ;;  %v5248_v41 = vadd.f32 %v1119_v12, %v5057_v26 }
 0x1fc   : > { %v1118_v33 = vmax.f32 %v1030_v36, 0.0  ;;  %v5242_v30 = vadd.f32 %v1117_v47, %v5035_v16 }
 0x1fd   : > { %v5239_v43 = vadd.f32 %v1120_v38, %v5059_v27 }
 0x1fe   : > { %v5245_v34 = vadd.f32 %v1118_v33, %v5037_v17  ;;  %v4116_v53 = vpop.f32.mrb[32].mxu1 }
 0x1ff   : > { %v1051_v42 = vadd.f32 %v4116_v53, %v5172_v57  ;;  %v1042_v58 = vpop.f32.mrb[33].mxu1  ;;  %v1176_v17 = vpack.c.bf16 %v5239_v43, %v5248_v41 }
 0x200   : > { %v1043_v59 = vadd.f32 %v5172_v57, %v1042_v58  ;;  %v4117_v62 = vpop.f32.mrb[34].mxu1  ;;  %v1175_v27 = vpack.c.bf16 %v5245_v34, %v5242_v30 }
 0x201   : > { %v1054_v60 = vadd.f32 %v4117_v62, %v5172_v57  ;;  %v1045_v16 = vpop.f32.mrb[35].mxu1  ;;  %v1123_v26 = vmax.f32 %v1051_v42, 0.0 }
 0x202   : > { %v1121_v48 = vmax.f32 %v1043_v59, 0.0  ;;  %v1046_v49 = vadd.f32 %v5172_v57, %v1045_v16  ;;  %4158 = vmatprep.mubr.bf16.mxu0 %v1175_v27 }
 0x203   : > { %v1124_v63 = vmax.f32 %v1054_v60, 0.0  ;;  %4159 = vmatmul.mubr.bf16.gmra.mrb[28].mxu0 %v1176_v17  ;;  %v5268_v52 = vadd.f32 %v1123_v26, %v4951_v45 }
 0x204   : > { %v1122_v6 = vmax.f32 %v1046_v49, 0.0  ;;  %v5262_v7 = vadd.f32 %v1121_v48, %v4938_v39 }
 0x205   : > { %v5259_v61 = vadd.f32 %v1124_v63, %v4953_v46 }
 0x206   : > { %v5265_v8 = vadd.f32 %v1122_v6, %v4940_v40  ;;  %v4120_v23 = vpop.f32.mrb[36].mxu1 }
 0x207   : > { %v1067_v55 = vadd.f32 %v4120_v23, %v5172_v57  ;;  %v1058_v54 = vpop.f32.mrb[37].mxu1  ;;  %v1178_v40 = vpack.c.bf16 %v5259_v61, %v5268_v52 }
 0x208   : > { %v1059_v44 = vadd.f32 %v5172_v57, %v1058_v54  ;;  %v4121_v13 = vpop.f32.mrb[38].mxu1  ;;  %v1177_v46 = vpack.c.bf16 %v5265_v8, %v5262_v7 }
 0x209   : > { %v1070_v35 = vadd.f32 %v4121_v13, %v5172_v57  ;;  %v1061_v39 = vpop.f32.mrb[39].mxu1  ;;  %v1127_v45 = vmax.f32 %v1067_v55, 0.0 }
 0x20a   : > { %v1125_v0 = vmax.f32 %v1059_v44, 0.0  ;;  %v1062_v1 = vadd.f32 %v5172_v57, %v1061_v39  ;;  %4162 = vmatprep.mubr.bf16.mxu0 %v1177_v46 }
 0x20b   : > { %v1128_v47 = vmax.f32 %v1070_v35, 0.0  ;;  %4163 = vmatmul.mubr.bf16.gmra.mrb[32].mxu0 %v1178_v40  ;;  %v5288_v42 = vadd.f32 %v1127_v45, %v5005_v2 }
 0x20c   : > { %v1126_v36 = vmax.f32 %v1062_v1, 0.0  ;;  %v5282_v38 = vadd.f32 %v1125_v0, %v4960_v50 }
 0x20d   : > { %v5279_v12 = vadd.f32 %v1128_v47, %v5007_v3 }
 0x20e   : > { %v5285_v33 = vadd.f32 %v1126_v36, %v4962_v51  ;;  %v4124_v53 = vpop.f32.mrb[40].mxu1 }
 0x20f   : > { %v1083_v58 = vadd.f32 %v4124_v53, %v5172_v57  ;;  %v1074_v59 = vpop.f32.mrb[41].mxu1  ;;  %v1180_v51 = vpack.c.bf16 %v5279_v12, %v5288_v42 }
 0x210   : > { %v1075_v62 = vadd.f32 %v5172_v57, %v1074_v59  ;;  %v4125_v27 = vpop.f32.mrb[42].mxu1  ;;  %v1179_v3 = vpack.c.bf16 %v5285_v33, %v5282_v38  ;;  %v4526_v59 = vld [vmem:[%s6022_s1 + $0x98] sm:$0xff]  }
 0x211   : > { %v1086_v60 = vadd.f32 %v4125_v27, %v5172_v57  ;;  %v1077_v50 = vpop.f32.mrb[43].mxu1  ;;  %v1131_v2 = vmax.f32 %v1083_v58, 0.0  ;;  %v4528_v27 = vld [vmem:[%s6022_s1 + $0xa8] sm:$0xff]  }
 0x212   : > { %v1129_v16 = vmax.f32 %v1075_v62, 0.0  ;;  %v1078_v17 = vadd.f32 %v5172_v57, %v1077_v50  ;;  %4166 = vmatprep.mubr.bf16.mxu0 %v1179_v3  ;;  %v4527_v62 = vld [vmem:[%s6022_s1 + $0xa0] sm:$0xff]   ;;  %v4529_v3 = vld [vmem:[%s6022_s1 + $0xb0] sm:$0xff]  }
 0x213   : > { %v1132_v48 = vmax.f32 %v1086_v60, 0.0  ;;  %4167 = vmatmul.mubr.bf16.gmra.mrb[36].mxu0 %v1180_v51  ;;  %v5308_v55 = vadd.f32 %v1131_v2, %v5031_v14  ;;  %v5361_v60 = vld [vmem:[%s6023_s2 + $0x1] ss:$0 sm:$0xff] }
 0x214   : > { %v1130_v49 = vmax.f32 %v1078_v17, 0.0  ;;  %v5302_v63 = vadd.f32 %v1129_v16, %v5009_v4 }
 0x215   : > { %v5299_v26 = vadd.f32 %v1132_v48, %v5033_v15 }
 0x216   : > { %v5305_v6 = vadd.f32 %v1130_v49, %v5011_v5  ;;  %v4128_v23 = vpop.f32.mrb[44].mxu1 }
 0x217   : > { %v1099_v54 = vadd.f32 %v4128_v23, %v5172_v57  ;;  %v1090_v44 = vpop.f32.mrb[45].mxu1  ;;  %v1182_v5 = vpack.c.bf16 %v5299_v26, %v5308_v55 }
 0x218   : > { %v1091_v13 = vadd.f32 %v5172_v57, %v1090_v44  ;;  %v4129_v46 = vpop.f32.mrb[46].mxu1  ;;  %v1181_v15 = vpack.c.bf16 %v5305_v6, %v5302_v63 }
 0x219   : > { %v1102_v35 = vadd.f32 %v4129_v46, %v5172_v57  ;;  %v1093_v4 = vpop.f32.mrb[47].mxu1  ;;  %v1135_v14 = vmax.f32 %v1099_v54, 0.0 }
 0x21a   : > { %v1133_v39 = vmax.f32 %v1091_v13, 0.0  ;;  %v1094_v40 = vadd.f32 %v5172_v57, %v1093_v4  ;;  %4170 = vmatprep.mubr.bf16.mxu0 %v1181_v15 }
 0x21b   : > { %v1136_v0 = vmax.f32 %v1102_v35, 0.0  ;;  %4171 = vmatmul.mubr.bf16.gmra.mrb[40].mxu0 %v1182_v5  ;;  %v5328_v53 = vadd.f32 %v1135_v14, %v5061_v28  ;;  %v4525_v28 = vld [vmem:[%s6022_s1 + $0x90] sm:$0xff]  }
 0x21c   : > { %v1134_v1 = vmax.f32 %v1094_v40, 0.0  ;;  %v5322_v47 = vadd.f32 %v1133_v39, %v5039_v18  ;;  %v4523_v18 = vld [vmem:[%s6022_s1 + $0x80] sm:$0xff]  }
 0x21d   : > { %v5319_v45 = vadd.f32 %v1136_v0, %v5063_v29  ;;  %v4522_v29 = vld [vmem:[%s6024_s3 + $0x78] sm:$0xff]   ;;  %4226 = vmatprep.subr.bf16.mxu0 %v4523_v18 }
 0x21e   : > { %v5325_v36 = vadd.f32 %v1134_v1, %v5041_v19  ;;  %4192 = vmatprep.subr.bf16.mxu1 %v4522_v29  ;;  %v4524_v19 = vld [vmem:[%s6022_s1 + $0x88] sm:$0xff]   ;;  %4227 = vmatpush3.bf16.msra.mxu0 %v4523_v18 }
 0x21f   : > { %v1184_v58 = vpack.c.bf16 %v5319_v45, %v5328_v53  ;;  %4193 = vmatpush3.bf16.msra.mxu1 %v4522_v29  ;;  %4228 = vmatprep.subr.bf16.mxu0 %v4524_v19 }
 0x220   : > { %v1183_v57 = vpack.c.bf16 %v5325_v36, %v5322_v47 }
 0x222   : > { %4174 = vmatprep.mubr.bf16.mxu0 %v1183_v57  ;;  %4229 = vmatpush3.bf16.msra.mxu0 %v4524_v19 }
 0x223   : > { %4175 = vmatmul.mubr.bf16.gmra.mrb[44].mxu0 %v1184_v58  ;;  %4230 = vmatprep.subr.bf16.mxu0 %v4525_v28 }
 0x226   : > { %4231 = vmatpush3.bf16.msra.mxu0 %v4525_v28 }
 0x227   : > { %4232 = vmatprep.subr.bf16.mxu0 %v4526_v59 }
 0x22a   : > { %4233 = vmatpush3.bf16.msra.mxu0 %v4526_v59 }
 0x22b   : > { %4234 = vmatprep.subr.bf16.mxu0 %v4527_v62 }
 0x22e   : > { %4235 = vmatpush3.bf16.msra.mxu0 %v4527_v62 }
 0x22f   : > { %4236 = vmatprep.subr.bf16.mxu0 %v4528_v27 }
 0x232   : > { %4237 = vmatpush3.bf16.msra.mxu0 %v4528_v27 }
 0x233   : > { %4238 = vmatprep.subr.bf16.mxu0 %v4529_v3 }
 0x236   : > { %4239 = vmatpush3.bf16.msra.mxu0 %v4529_v3 }
 0x2b9   : > { %v4148_v50 = vpop.f32.mrb[16].mxu0 }
 0x2ba   : > { %v1301_v51 = vadd.f32 %v4148_v50, %v5361_v60  ;;  %v1292_v16 = vpop.f32.mrb[17].mxu0 }
 0x2bb   : > { %v1293_v17 = vadd.f32 %v5361_v60, %v1292_v16  ;;  %v4149_v2 = vpop.f32.mrb[18].mxu0 }
 0x2bc   : > { %v1304_v48 = vadd.f32 %v4149_v2, %v5361_v60  ;;  %v1295_v49 = vpop.f32.mrb[19].mxu0  ;;  %v1421_v54 = vmax.f32 %v1301_v51, 0.0 }
 0x2bd   : > { %v1296_v23 = vadd.f32 %v5361_v60, %v1295_v49  ;;  %v1419_v13 = vmax.f32 %v1293_v17, 0.0 }
 0x2be   : > { %v1422_v44 = vmax.f32 %v1304_v48, 0.0 }
 0x2bf   : > { %v1420_v46 = vmax.f32 %v1296_v23, 0.0 }
 0x2c0   : > { %v1452_v15 = vpack.c.bf16 %v1422_v44, %v1421_v54 }
 0x2c1   : > { %v1451_v35 = vpack.c.bf16 %v1420_v46, %v1419_v13 }
 0x2c3   : > { %4194 = vmatprep.mubr.bf16.mxu1 %v1451_v35 }
 0x2c4   : > { %4195 = vmatmul.mubr.bf16.vlgmr.msra.gmra.mrb[48].mxu1 %v1452_v15 }
 0x2c5   : > { %v4152_v4 = vpop.f32.mrb[20].mxu0 }
 0x2c6   : > { %v1317_v5 = vadd.f32 %v4152_v4, %v5361_v60  ;;  %v1308_v39 = vpop.f32.mrb[21].mxu0 }
 0x2c7   : > { %v1309_v40 = vadd.f32 %v5361_v60, %v1308_v39  ;;  %v4153_v14 = vpop.f32.mrb[22].mxu0 }
 0x2c8   : > { %v1320_v0 = vadd.f32 %v4153_v14, %v5361_v60  ;;  %v1311_v1 = vpop.f32.mrb[23].mxu0  ;;  %v1425_v58 = vmax.f32 %v1317_v5, 0.0 }
 0x2c9   : > { %v1312_v57 = vadd.f32 %v5361_v60, %v1311_v1  ;;  %v1423_v18 = vmax.f32 %v1309_v40, 0.0 }
 0x2ca   : > { %v1426_v29 = vmax.f32 %v1320_v0, 0.0 }
 0x2cb   : > { %v1424_v19 = vmax.f32 %v1312_v57, 0.0 }
 0x2cc   : > { %v1454_v28 = vpack.c.bf16 %v1426_v29, %v1425_v58 }
 0x2cd   : > { %v1453_v59 = vpack.c.bf16 %v1424_v19, %v1423_v18  ;;  %v4156_v62 = vpop.f32.mrb[24].mxu0 }
 0x2ce   : > { %v1333_v27 = vadd.f32 %v4156_v62, %v5361_v60  ;;  %v1324_v3 = vpop.f32.mrb[25].mxu0 }
 0x2cf   : > { %v1325_v50 = vadd.f32 %v5361_v60, %v1324_v3  ;;  %v4157_v51 = vpop.f32.mrb[26].mxu0  ;;  %4198 = vmatprep.mubr.bf16.mxu1 %v1453_v59 }
 0x2d0   : > { %v1336_v16 = vadd.f32 %v4157_v51, %v5361_v60  ;;  %v1327_v17 = vpop.f32.mrb[27].mxu0  ;;  %4199 = vmatmul.mubr.bf16.gmra.mrb[52].mxu1 %v1454_v28  ;;  %v1429_v48 = vmax.f32 %v1333_v27, 0.0 }
 0x2d1   : > { %v1328_v2 = vadd.f32 %v5361_v60, %v1327_v17  ;;  %v1427_v23 = vmax.f32 %v1325_v50, 0.0 }
 0x2d2   : > { %v1430_v49 = vmax.f32 %v1336_v16, 0.0 }
 0x2d3   : > { %v1428_v54 = vmax.f32 %v1328_v2, 0.0 }
 0x2d4   : > { %v1456_v44 = vpack.c.bf16 %v1430_v49, %v1429_v48 }
 0x2d5   : > { %v1455_v13 = vpack.c.bf16 %v1428_v54, %v1427_v23 }
 0x2d6   : > { %v4160_v46 = vpop.f32.mrb[28].mxu0 }
 0x2d7   : > { %v1349_v15 = vadd.f32 %v4160_v46, %v5361_v60  ;;  %v1340_v35 = vpop.f32.mrb[29].mxu0  ;;  %4202 = vmatprep.mubr.bf16.mxu1 %v1455_v13 }
 0x2d8   : > { %v1341_v4 = vadd.f32 %v5361_v60, %v1340_v35  ;;  %v4161_v5 = vpop.f32.mrb[30].mxu0  ;;  %4203 = vmatmul.mubr.bf16.gmra.mrb[56].mxu1 %v1456_v44 }
 0x2d9   : > { %v1352_v39 = vadd.f32 %v4161_v5, %v5361_v60  ;;  %v1343_v40 = vpop.f32.mrb[31].mxu0  ;;  %v1433_v0 = vmax.f32 %v1349_v15, 0.0 }
 0x2da   : > { %v1344_v14 = vadd.f32 %v5361_v60, %v1343_v40  ;;  %v1431_v57 = vmax.f32 %v1341_v4, 0.0 }
 0x2db   : > { %v1434_v1 = vmax.f32 %v1352_v39, 0.0 }
 0x2dc   : > { %v1432_v58 = vmax.f32 %v1344_v14, 0.0 }
 0x2dd   : > { %v1458_v29 = vpack.c.bf16 %v1434_v1, %v1433_v0 }
 0x2de   : > { %v1457_v18 = vpack.c.bf16 %v1432_v58, %v1431_v57  ;;  %v4164_v19 = vpop.f32.mrb[32].mxu0 }
 0x2df   : > { %v1365_v28 = vadd.f32 %v4164_v19, %v5361_v60  ;;  %v1356_v59 = vpop.f32.mrb[33].mxu0 }
 0x2e0   : > { %v1357_v62 = vadd.f32 %v5361_v60, %v1356_v59  ;;  %v4165_v27 = vpop.f32.mrb[34].mxu0  ;;  %4206 = vmatprep.mubr.bf16.mxu1 %v1457_v18 }
 0x2e1   : > { %v1368_v3 = vadd.f32 %v4165_v27, %v5361_v60  ;;  %v1359_v50 = vpop.f32.mrb[35].mxu0  ;;  %4207 = vmatmul.mubr.bf16.gmra.mrb[60].mxu1 %v1458_v29  ;;  %v1437_v16 = vmax.f32 %v1365_v28, 0.0 }
 0x2e2   : > { %v1360_v51 = vadd.f32 %v5361_v60, %v1359_v50  ;;  %v1435_v2 = vmax.f32 %v1357_v62, 0.0 }
 0x2e3   : > { %v1438_v17 = vmax.f32 %v1368_v3, 0.0 }
 0x2e4   : > { %v1436_v48 = vmax.f32 %v1360_v51, 0.0 }
 0x2e5   : > { %v1460_v49 = vpack.c.bf16 %v1438_v17, %v1437_v16 }
 0x2e6   : > { %v1459_v23 = vpack.c.bf16 %v1436_v48, %v1435_v2  ;;  %v4168_v54 = vpop.f32.mrb[36].mxu0 }
 0x2e7   : > { %v1381_v44 = vadd.f32 %v4168_v54, %v5361_v60  ;;  %v1372_v13 = vpop.f32.mrb[37].mxu0 }
 0x2e8   : > { %v1373_v46 = vadd.f32 %v5361_v60, %v1372_v13  ;;  %v4169_v15 = vpop.f32.mrb[38].mxu0  ;;  %4210 = vmatprep.mubr.bf16.mxu1 %v1459_v23 }
 0x2e9   : > { %v1384_v35 = vadd.f32 %v4169_v15, %v5361_v60  ;;  %v1375_v4 = vpop.f32.mrb[39].mxu0  ;;  %4211 = vmatmul.mubr.bf16.gmra.mrb[64].mxu1 %v1460_v49  ;;  %v1441_v39 = vmax.f32 %v1381_v44, 0.0 }
 0x2ea   : > { %v1376_v5 = vadd.f32 %v5361_v60, %v1375_v4  ;;  %v1439_v14 = vmax.f32 %v1373_v46, 0.0 }
 0x2eb   : > { %v1442_v40 = vmax.f32 %v1384_v35, 0.0 }
 0x2ec   : > { %v1440_v0 = vmax.f32 %v1376_v5, 0.0 }
 0x2ed   : > { %v1462_v1 = vpack.c.bf16 %v1442_v40, %v1441_v39 }
 0x2ee   : > { %v1461_v57 = vpack.c.bf16 %v1440_v0, %v1439_v14  ;;  %v4172_v58 = vpop.f32.mrb[40].mxu0  ;;  %v4530_v0 = vld [vmem:[%s6022_s1 + $0xb8] sm:$0xff]  }
 0x2ef   : > { %v1397_v29 = vadd.f32 %v4172_v58, %v5361_v60  ;;  %v1388_v18 = vpop.f32.mrb[41].mxu0  ;;  %4240 = vmatprep.subr.bf16.mxu0 %v4530_v0  ;;  %v4534_v58 = vld [vmem:[%s6024_s3 + $0x98] sm:$0xff]  }
 0x2f0   : > { %v1389_v19 = vadd.f32 %v5361_v60, %v1388_v18  ;;  %v4173_v28 = vpop.f32.mrb[42].mxu0  ;;  %4214 = vmatprep.mubr.bf16.mxu1 %v1461_v57  ;;  %4241 = vmatpush3.bf16.msra.mxu0 %v4530_v0  ;;  %v4533_v57 = vld [vmem:[%s6024_s3 + $0x90] sm:$0xff]   ;;  %v4536_v18 = vld [vmem:[%s6024_s3 + $0xa8] sm:$0xff]  }
 0x2f1   : > { %v1400_v59 = vadd.f32 %v4173_v28, %v5361_v60  ;;  %v1391_v62 = vpop.f32.mrb[43].mxu0  ;;  %4215 = vmatmul.mubr.bf16.gmra.mrb[68].mxu1 %v1462_v1  ;;  %v1445_v3 = vmax.f32 %v1397_v29, 0.0  ;;  %v4531_v1 = vld [vmem:[%s6024_s3 + $0x80] sm:$0xff]  }
 0x2f2   : > { %v1392_v27 = vadd.f32 %v5361_v60, %v1391_v62  ;;  %v1443_v51 = vmax.f32 %v1389_v19, 0.0  ;;  %4274 = vmatprep.subr.bf16.mxu1 %v4531_v1  ;;  %v4535_v29 = vld [vmem:[%s6024_s3 + $0xa0] sm:$0xff]   ;;  %v4537_v19 = vld [vmem:[%s6024_s3 + $0xb0] sm:$0xff]  }
 0x2f3   : > { %v1446_v50 = vmax.f32 %v1400_v59, 0.0  ;;  %4275 = vmatpush3.bf16.msra.mxu1 %v4531_v1  ;;  %v5422_v28 = vld [vmem:[%s6025_s4 + $0x1] ss:$0 sm:$0xff] }
 0x2f4   : > { %v1444_v16 = vmax.f32 %v1392_v27, 0.0 }
 0x2f5   : > { %v1464_v17 = vpack.c.bf16 %v1446_v50, %v1445_v3 }
 0x2f6   : > { %v1463_v2 = vpack.c.bf16 %v1444_v16, %v1443_v51  ;;  %v4176_v48 = vpop.f32.mrb[44].mxu0 }
 0x2f7   : > { %v1413_v49 = vadd.f32 %v4176_v48, %v5361_v60  ;;  %v1404_v23 = vpop.f32.mrb[45].mxu0 }
 0x2f8   : > { %v1405_v54 = vadd.f32 %v5361_v60, %v1404_v23  ;;  %v4177_v44 = vpop.f32.mrb[46].mxu0  ;;  %4218 = vmatprep.mubr.bf16.mxu1 %v1463_v2 }
 0x2f9   : > { %v1416_v13 = vadd.f32 %v4177_v44, %v5361_v60  ;;  %v1407_v46 = vpop.f32.mrb[47].mxu0  ;;  %4219 = vmatmul.mubr.bf16.gmra.mrb[72].mxu1 %v1464_v17  ;;  %v1449_v35 = vmax.f32 %v1413_v49, 0.0 }
 0x2fa   : > { %v1408_v15 = vadd.f32 %v5361_v60, %v1407_v46  ;;  %v1447_v5 = vmax.f32 %v1405_v54, 0.0  ;;  %v4532_v60 = vld [vmem:[%s6024_s3 + $0x88] sm:$0xff]  }
 0x2fb   : > { %v1450_v4 = vmax.f32 %v1416_v13, 0.0  ;;  %4276 = vmatprep.subr.bf16.mxu1 %v4532_v60 }
 0x2fc   : > { %v1448_v39 = vmax.f32 %v1408_v15, 0.0  ;;  %4277 = vmatpush3.bf16.msra.mxu1 %v4532_v60 }
 0x2fd   : > { %v1466_v40 = vpack.c.bf16 %v1450_v4, %v1449_v35  ;;  %4278 = vmatprep.subr.bf16.mxu1 %v4533_v57 }
 0x2fe   : > { %v1465_v14 = vpack.c.bf16 %v1448_v39, %v1447_v5 }
 0x300   : > { %4222 = vmatprep.mubr.bf16.mxu1 %v1465_v14  ;;  %4279 = vmatpush3.bf16.msra.mxu1 %v4533_v57 }
 0x301   : > { %4223 = vmatmul.mubr.bf16.gmra.mrb[76].mxu1 %v1466_v40  ;;  %4280 = vmatprep.subr.bf16.mxu1 %v4534_v58 }
 0x304   : > { %4281 = vmatpush3.bf16.msra.mxu1 %v4534_v58 }
 0x305   : > { %4282 = vmatprep.subr.bf16.mxu1 %v4535_v29 }
 0x308   : > { %4283 = vmatpush3.bf16.msra.mxu1 %v4535_v29 }
 0x309   : > { %4284 = vmatprep.subr.bf16.mxu1 %v4536_v18 }
 0x30c   : > { %4285 = vmatpush3.bf16.msra.mxu1 %v4536_v18 }
 0x30d   : > { %4286 = vmatprep.subr.bf16.mxu1 %v4537_v19 }
 0x310   : > { %4287 = vmatpush3.bf16.msra.mxu1 %v4537_v19 }
 0x397   : > { %v4196_v59 = vpop.f32.mrb[48].mxu1 }
 0x398   : > { %v1583_v62 = vadd.f32 %v4196_v59, %v5422_v28  ;;  %v1574_v27 = vpop.f32.mrb[49].mxu1 }
 0x399   : > { %v1575_v3 = vadd.f32 %v5422_v28, %v1574_v27  ;;  %v4197_v50 = vpop.f32.mrb[50].mxu1 }
 0x39a   : > { %v1586_v51 = vadd.f32 %v4197_v50, %v5422_v28  ;;  %v1577_v16 = vpop.f32.mrb[51].mxu1  ;;  %v1703_v48 = vmax.f32 %v1583_v62, 0.0 }
 0x39b   : > { %v1701_v17 = vmax.f32 %v1575_v3, 0.0  ;;  %v1578_v2 = vadd.f32 %v5422_v28, %v1577_v16 }
 0x39c   : > { %v1704_v49 = vmax.f32 %v1586_v51, 0.0  ;;  %v5438_v15 = vadd.f32 %v1703_v48, %v5188_v32 }
 0x39d   : > { %v1702_v23 = vmax.f32 %v1578_v2, 0.0  ;;  %v5432_v44 = vadd.f32 %v1701_v17, %v5182_v21 }
 0x39e   : > { %v5429_v54 = vadd.f32 %v1704_v49, %v5179_v20 }
 0x39f   : > { %v5435_v13 = vadd.f32 %v1702_v23, %v5185_v22 }
 0x3a0   : > { %v1766_v21 = vpack.c.bf16 %v5429_v54, %v5438_v15 }
 0x3a1   : > { %v1765_v20 = vpack.c.bf16 %v5435_v13, %v5432_v44 }
 0x3a3   : > { %v4200_v46 = vpop.f32.mrb[52].mxu1  ;;  %4242 = vmatprep.mubr.bf16.mxu0 %v1765_v20 }
 0x3a4   : > { %v1599_v35 = vadd.f32 %v4200_v46, %v5422_v28  ;;  %v1590_v4 = vpop.f32.mrb[53].mxu1  ;;  %4243 = vmatmul.mubr.bf16.vlgmr.msra.gmra.mrb[48].mxu0 %v1766_v21 }
 0x3a5   : > { %v1591_v5 = vadd.f32 %v5422_v28, %v1590_v4  ;;  %v4201_v39 = vpop.f32.mrb[54].mxu1 }
 0x3a6   : > { %v1602_v40 = vadd.f32 %v4201_v39, %v5422_v28  ;;  %v1593_v22 = vpop.f32.mrb[55].mxu1  ;;  %v1707_v32 = vmax.f32 %v1599_v35, 0.0 }
 0x3a7   : > { %v1705_v14 = vmax.f32 %v1591_v5, 0.0  ;;  %v1594_v0 = vadd.f32 %v5422_v28, %v1593_v22 }
 0x3a8   : > { %v1708_v1 = vmax.f32 %v1602_v40, 0.0  ;;  %v5458_v19 = vadd.f32 %v1707_v32, %v5208_v56 }
 0x3a9   : > { %v1706_v60 = vmax.f32 %v1594_v0, 0.0  ;;  %v5452_v58 = vadd.f32 %v1705_v14, %v5202_v31 }
 0x3aa   : > { %v5449_v57 = vadd.f32 %v1708_v1, %v5199_v24 }
 0x3ab   : > { %v5455_v29 = vadd.f32 %v1706_v60, %v5205_v25  ;;  %v4204_v18 = vpop.f32.mrb[56].mxu1 }
 0x3ac   : > { %v1615_v59 = vadd.f32 %v4204_v18, %v5422_v28  ;;  %v1606_v62 = vpop.f32.mrb[57].mxu1  ;;  %v1768_v25 = vpack.c.bf16 %v5449_v57, %v5458_v19 }
 0x3ad   : > { %v1607_v27 = vadd.f32 %v5422_v28, %v1606_v62  ;;  %v4205_v3 = vpop.f32.mrb[58].mxu1  ;;  %v1767_v24 = vpack.c.bf16 %v5455_v29, %v5452_v58 }
 0x3ae   : > { %v1618_v50 = vadd.f32 %v4205_v3, %v5422_v28  ;;  %v1609_v31 = vpop.f32.mrb[59].mxu1  ;;  %v1711_v56 = vmax.f32 %v1615_v59, 0.0 }
 0x3af   : > { %v1709_v51 = vmax.f32 %v1607_v27, 0.0  ;;  %v1610_v16 = vadd.f32 %v5422_v28, %v1609_v31  ;;  %4246 = vmatprep.mubr.bf16.mxu0 %v1767_v24 }
 0x3b0   : > { %v1712_v17 = vmax.f32 %v1618_v50, 0.0  ;;  %4247 = vmatmul.mubr.bf16.gmra.mrb[52].mxu0 %v1768_v25  ;;  %v5478_v35 = vadd.f32 %v1711_v56, %v5228_v37 }
 0x3b1   : > { %v1710_v2 = vmax.f32 %v1610_v16, 0.0  ;;  %v5472_v49 = vadd.f32 %v1709_v51, %v5222_v10 }
 0x3b2   : > { %v5469_v48 = vadd.f32 %v1712_v17, %v5219_v9 }
 0x3b3   : > { %v5475_v23 = vadd.f32 %v1710_v2, %v5225_v11 }
 0x3b4   : > { %v4208_v46 = vpop.f32.mrb[60].mxu1  ;;  %v1770_v11 = vpack.c.bf16 %v5469_v48, %v5478_v35 }
 0x3b5   : > { %v1631_v4 = vadd.f32 %v4208_v46, %v5422_v28  ;;  %v1622_v5 = vpop.f32.mrb[61].mxu1  ;;  %v1769_v9 = vpack.c.bf16 %v5475_v23, %v5472_v49 }
 0x3b6   : > { %v1623_v39 = vadd.f32 %v5422_v28, %v1622_v5  ;;  %v4209_v20 = vpop.f32.mrb[62].mxu1 }
 0x3b7   : > { %v1634_v21 = vadd.f32 %v4209_v20, %v5422_v28  ;;  %v1625_v10 = vpop.f32.mrb[63].mxu1  ;;  %4250 = vmatprep.mubr.bf16.mxu0 %v1769_v9  ;;  %v1715_v37 = vmax.f32 %v1631_v4, 0.0 }
 0x3b8   : > { %v1713_v40 = vmax.f32 %v1623_v39, 0.0  ;;  %v1626_v22 = vadd.f32 %v5422_v28, %v1625_v10  ;;  %4251 = vmatmul.mubr.bf16.gmra.mrb[56].mxu0 %v1770_v11 }
 0x3b9   : > { %v1716_v14 = vmax.f32 %v1634_v21, 0.0  ;;  %v5498_v59 = vadd.f32 %v1715_v37, %v5248_v41 }
 0x3ba   : > { %v1714_v0 = vmax.f32 %v1626_v22, 0.0  ;;  %v5492_v1 = vadd.f32 %v1713_v40, %v5242_v30 }
 0x3bb   : > { %v5489_v32 = vadd.f32 %v1716_v14, %v5239_v43 }
 0x3bc   : > { %v5495_v60 = vadd.f32 %v1714_v0, %v5245_v34  ;;  %v4212_v18 = vpop.f32.mrb[64].mxu1 }
 0x3bd   : > { %v1647_v62 = vadd.f32 %v4212_v18, %v5422_v28  ;;  %v1638_v27 = vpop.f32.mrb[65].mxu1  ;;  %v1772_v34 = vpack.c.bf16 %v5489_v32, %v5498_v59 }
 0x3be   : > { %v1639_v3 = vadd.f32 %v5422_v28, %v1638_v27  ;;  %v4213_v24 = vpop.f32.mrb[66].mxu1  ;;  %v1771_v43 = vpack.c.bf16 %v5495_v60, %v5492_v1 }
 0x3bf   : > { %v1650_v50 = vadd.f32 %v4213_v24, %v5422_v28  ;;  %v1641_v30 = vpop.f32.mrb[67].mxu1  ;;  %v1719_v41 = vmax.f32 %v1647_v62, 0.0 }
 0x3c0   : > { %v1717_v31 = vmax.f32 %v1639_v3, 0.0  ;;  %v1642_v25 = vadd.f32 %v5422_v28, %v1641_v30  ;;  %4254 = vmatprep.mubr.bf16.mxu0 %v1771_v43 }
 0x3c1   : > { %v1720_v51 = vmax.f32 %v1650_v50, 0.0  ;;  %4255 = vmatmul.mubr.bf16.gmra.mrb[60].mxu0 %v1772_v34  ;;  %v5518_v4 = vadd.f32 %v1719_v41, %v5268_v52 }
 0x3c2   : > { %v1718_v16 = vmax.f32 %v1642_v25, 0.0  ;;  %v5512_v17 = vadd.f32 %v1717_v31, %v5262_v7 }
 0x3c3   : > { %v5509_v56 = vadd.f32 %v1720_v51, %v5259_v61 }
 0x3c4   : > { %v5515_v2 = vadd.f32 %v1718_v16, %v5265_v8  ;;  %v4216_v46 = vpop.f32.mrb[68].mxu1 }
 0x3c5   : > { %v1663_v5 = vadd.f32 %v4216_v46, %v5422_v28  ;;  %v1654_v39 = vpop.f32.mrb[69].mxu1  ;;  %v1774_v8 = vpack.c.bf16 %v5509_v56, %v5518_v4 }
 0x3c6   : > { %v1655_v20 = vadd.f32 %v5422_v28, %v1654_v39  ;;  %v4217_v9 = vpop.f32.mrb[70].mxu1  ;;  %v1773_v61 = vpack.c.bf16 %v5515_v2, %v5512_v17 }
 0x3c7   : > { %v1666_v21 = vadd.f32 %v4217_v9, %v5422_v28  ;;  %v1657_v7 = vpop.f32.mrb[71].mxu1  ;;  %v1723_v52 = vmax.f32 %v1663_v5, 0.0 }
 0x3c8   : > { %v1721_v10 = vmax.f32 %v1655_v20, 0.0  ;;  %v1658_v11 = vadd.f32 %v5422_v28, %v1657_v7  ;;  %4258 = vmatprep.mubr.bf16.mxu0 %v1773_v61 }
 0x3c9   : > { %v1724_v40 = vmax.f32 %v1666_v21, 0.0  ;;  %4259 = vmatmul.mubr.bf16.gmra.mrb[64].mxu0 %v1774_v8  ;;  %v5538_v62 = vadd.f32 %v1723_v52, %v5288_v42 }
 0x3ca   : > { %v1722_v22 = vmax.f32 %v1658_v11, 0.0  ;;  %v5532_v14 = vadd.f32 %v1721_v10, %v5282_v38 }
 0x3cb   : > { %v5529_v37 = vadd.f32 %v1724_v40, %v5279_v12 }
 0x3cc   : > { %v5535_v0 = vadd.f32 %v1722_v22, %v5285_v33  ;;  %v4220_v18 = vpop.f32.mrb[72].mxu1 }
 0x3cd   : > { %v1679_v27 = vadd.f32 %v4220_v18, %v5422_v28  ;;  %v1670_v3 = vpop.f32.mrb[73].mxu1  ;;  %v1776_v33 = vpack.c.bf16 %v5529_v37, %v5538_v62 }
 0x3ce   : > { %v1671_v24 = vadd.f32 %v5422_v28, %v1670_v3  ;;  %v4221_v43 = vpop.f32.mrb[74].mxu1  ;;  %v1775_v12 = vpack.c.bf16 %v5535_v0, %v5532_v14  ;;  %v4542_v3 = vld [vmem:[%s6026_s5 + $0x18] sm:$0xff]  }
 0x3cf   : > { %v1682_v50 = vadd.f32 %v4221_v43, %v5422_v28  ;;  %v1673_v38 = vpop.f32.mrb[75].mxu1  ;;  %v1727_v42 = vmax.f32 %v1679_v27, 0.0  ;;  %v4544_v43 = vld [vmem:[%s6026_s5 + $0x28] sm:$0xff]  }
 0x3d0   : > { %v1725_v30 = vmax.f32 %v1671_v24, 0.0  ;;  %v1674_v34 = vadd.f32 %v5422_v28, %v1673_v38  ;;  %4262 = vmatprep.mubr.bf16.mxu0 %v1775_v12  ;;  %v4543_v24 = vld [vmem:[%s6026_s5 + $0x20] sm:$0xff]   ;;  %v4545_v12 = vld [vmem:[%s6026_s5 + $0x30] sm:$0xff]  }
 0x3d1   : > { %v1728_v31 = vmax.f32 %v1682_v50, 0.0  ;;  %4263 = vmatmul.mubr.bf16.gmra.mrb[68].mxu0 %v1776_v33  ;;  %v5558_v5 = vadd.f32 %v1727_v42, %v5308_v55  ;;  %v5611_v50 = vld [vmem:[%s6023_s2 + $0x2] ss:$0 sm:$0xff] }
 0x3d2   : > { %v1726_v25 = vmax.f32 %v1674_v34, 0.0  ;;  %v5552_v51 = vadd.f32 %v1725_v30, %v5302_v63 }
 0x3d3   : > { %v5549_v41 = vadd.f32 %v1728_v31, %v5299_v26 }
 0x3d4   : > { %v5555_v16 = vadd.f32 %v1726_v25, %v5305_v6  ;;  %v4224_v46 = vpop.f32.mrb[76].mxu1 }
 0x3d5   : > { %v1695_v39 = vadd.f32 %v4224_v46, %v5422_v28  ;;  %v1686_v20 = vpop.f32.mrb[77].mxu1  ;;  %v1778_v6 = vpack.c.bf16 %v5549_v41, %v5558_v5 }
 0x3d6   : > { %v1687_v9 = vadd.f32 %v5422_v28, %v1686_v20  ;;  %v4225_v61 = vpop.f32.mrb[78].mxu1  ;;  %v1777_v26 = vpack.c.bf16 %v5555_v16, %v5552_v51 }
 0x3d7   : > { %v1698_v21 = vadd.f32 %v4225_v61, %v5422_v28  ;;  %v1689_v63 = vpop.f32.mrb[79].mxu1  ;;  %v1731_v55 = vmax.f32 %v1695_v39, 0.0 }
 0x3d8   : > { %v1729_v7 = vmax.f32 %v1687_v9, 0.0  ;;  %v1690_v8 = vadd.f32 %v5422_v28, %v1689_v63  ;;  %4266 = vmatprep.mubr.bf16.mxu0 %v1777_v26 }
 0x3d9   : > { %v1732_v10 = vmax.f32 %v1698_v21, 0.0  ;;  %4267 = vmatmul.mubr.bf16.gmra.mrb[72].mxu0 %v1778_v6  ;;  %v5578_v18 = vadd.f32 %v1731_v55, %v5328_v53  ;;  %v4541_v53 = vld [vmem:[%s6026_s5 + $0x10] sm:$0xff]  }
 0x3da   : > { %v1730_v11 = vmax.f32 %v1690_v8, 0.0  ;;  %v5572_v40 = vadd.f32 %v1729_v7, %v5322_v47  ;;  %v4539_v47 = vld [vmem:[%s6026_s5] sm:$0xff]  }
 0x3db   : > { %v5569_v52 = vadd.f32 %v1732_v10, %v5319_v45  ;;  %v4538_v45 = vld [vmem:[%s6024_s3 + $0xb8] sm:$0xff]   ;;  %4322 = vmatprep.subr.bf16.mxu0 %v4539_v47 }
 0x3dc   : > { %v5575_v22 = vadd.f32 %v1730_v11, %v5325_v36  ;;  %4288 = vmatprep.subr.bf16.mxu1 %v4538_v45  ;;  %v4540_v36 = vld [vmem:[%s6026_s5 + $0x8] sm:$0xff]   ;;  %4323 = vmatpush3.bf16.msra.mxu0 %v4539_v47 }
 0x3dd   : > { %v1780_v27 = vpack.c.bf16 %v5569_v52, %v5578_v18  ;;  %4289 = vmatpush3.bf16.msra.mxu1 %v4538_v45  ;;  %4324 = vmatprep.subr.bf16.mxu0 %v4540_v36 }
 0x3de   : > { %v1779_v28 = vpack.c.bf16 %v5575_v22, %v5572_v40 }
 0x3e0   : > { %4270 = vmatprep.mubr.bf16.mxu0 %v1779_v28  ;;  %4325 = vmatpush3.bf16.msra.mxu0 %v4540_v36 }
 0x3e1   : > { %4271 = vmatmul.mubr.bf16.gmra.mrb[76].mxu0 %v1780_v27  ;;  %4326 = vmatprep.subr.bf16.mxu0 %v4541_v53 }
 0x3e4   : > { %4327 = vmatpush3.bf16.msra.mxu0 %v4541_v53 }
 0x3e5   : > { %4328 = vmatprep.subr.bf16.mxu0 %v4542_v3 }
 0x3e8   : > { %4329 = vmatpush3.bf16.msra.mxu0 %v4542_v3 }
 0x3e9   : > { %4330 = vmatprep.subr.bf16.mxu0 %v4543_v24 }
 0x3ec   : > { %4331 = vmatpush3.bf16.msra.mxu0 %v4543_v24 }
 0x3ed   : > { %4332 = vmatprep.subr.bf16.mxu0 %v4544_v43 }
 0x3f0   : > { %4333 = vmatpush3.bf16.msra.mxu0 %v4544_v43 }
 0x3f1   : > { %4334 = vmatprep.subr.bf16.mxu0 %v4545_v12 }
 0x3f4   : > { %4335 = vmatpush3.bf16.msra.mxu0 %v4545_v12 }
 0x477   : > { %v4244_v38 = vpop.f32.mrb[48].mxu0 }
 0x478   : > { %v1897_v33 = vadd.f32 %v4244_v38, %v5611_v50  ;;  %v1888_v30 = vpop.f32.mrb[49].mxu0 }
 0x479   : > { %v1889_v34 = vadd.f32 %v5611_v50, %v1888_v30  ;;  %v4245_v42 = vpop.f32.mrb[50].mxu0 }
 0x47a   : > { %v1900_v31 = vadd.f32 %v4245_v42, %v5611_v50  ;;  %v1891_v25 = vpop.f32.mrb[51].mxu0  ;;  %v2017_v39 = vmax.f32 %v1897_v33, 0.0 }
 0x47b   : > { %v1892_v46 = vadd.f32 %v5611_v50, %v1891_v25  ;;  %v2015_v9 = vmax.f32 %v1889_v34, 0.0 }
 0x47c   : > { %v2018_v20 = vmax.f32 %v1900_v31, 0.0 }
 0x47d   : > { %v2016_v61 = vmax.f32 %v1892_v46, 0.0 }
 0x47e   : > { %v2048_v26 = vpack.c.bf16 %v2018_v20, %v2017_v39 }
 0x47f   : > { %v2047_v21 = vpack.c.bf16 %v2016_v61, %v2015_v9 }
 0x481   : > { %4290 = vmatprep.mubr.bf16.mxu1 %v2047_v21 }
 0x482   : > { %4291 = vmatmul.mubr.bf16.vlgmr.msra.gmra.mrb[80].mxu1 %v2048_v26 }
 0x483   : > { %v4248_v63 = vpop.f32.mrb[52].mxu0 }
 0x484   : > { %v1913_v6 = vadd.f32 %v4248_v63, %v5611_v50  ;;  %v1904_v7 = vpop.f32.mrb[53].mxu0 }
 0x485   : > { %v1905_v8 = vadd.f32 %v5611_v50, %v1904_v7  ;;  %v4249_v55 = vpop.f32.mrb[54].mxu0 }
 0x486   : > { %v1916_v10 = vadd.f32 %v4249_v55, %v5611_v50  ;;  %v1907_v11 = vpop.f32.mrb[55].mxu0  ;;  %v2021_v27 = vmax.f32 %v1913_v6, 0.0 }
 0x487   : > { %v1908_v28 = vadd.f32 %v5611_v50, %v1907_v11  ;;  %v2019_v47 = vmax.f32 %v1905_v8, 0.0 }
 0x488   : > { %v2022_v45 = vmax.f32 %v1916_v10, 0.0 }
 0x489   : > { %v2020_v36 = vmax.f32 %v1908_v28, 0.0 }
 0x48a   : > { %v2050_v53 = vpack.c.bf16 %v2022_v45, %v2021_v27 }
 0x48b   : > { %v2049_v3 = vpack.c.bf16 %v2020_v36, %v2019_v47  ;;  %v4252_v24 = vpop.f32.mrb[56].mxu0 }
 0x48c   : > { %v1929_v43 = vadd.f32 %v4252_v24, %v5611_v50  ;;  %v1920_v12 = vpop.f32.mrb[57].mxu0 }
 0x48d   : > { %v1921_v38 = vadd.f32 %v5611_v50, %v1920_v12  ;;  %v4253_v33 = vpop.f32.mrb[58].mxu0  ;;  %4294 = vmatprep.mubr.bf16.mxu1 %v2049_v3 }
 0x48e   : > { %v1932_v30 = vadd.f32 %v4253_v33, %v5611_v50  ;;  %v1923_v34 = vpop.f32.mrb[59].mxu0  ;;  %4295 = vmatmul.mubr.bf16.gmra.mrb[84].mxu1 %v2050_v53  ;;  %v2025_v31 = vmax.f32 %v1929_v43, 0.0 }
 0x48f   : > { %v1924_v42 = vadd.f32 %v5611_v50, %v1923_v34  ;;  %v2023_v46 = vmax.f32 %v1921_v38, 0.0 }
 0x490   : > { %v2026_v25 = vmax.f32 %v1932_v30, 0.0 }
 0x491   : > { %v2024_v39 = vmax.f32 %v1924_v42, 0.0 }
 0x492   : > { %v2052_v20 = vpack.c.bf16 %v2026_v25, %v2025_v31 }
 0x493   : > { %v2051_v9 = vpack.c.bf16 %v2024_v39, %v2023_v46 }
 0x494   : > { %v4256_v61 = vpop.f32.mrb[60].mxu0 }
 0x495   : > { %v1945_v26 = vadd.f32 %v4256_v61, %v5611_v50  ;;  %v1936_v21 = vpop.f32.mrb[61].mxu0  ;;  %4298 = vmatprep.mubr.bf16.mxu1 %v2051_v9 }
 0x496   : > { %v1937_v63 = vadd.f32 %v5611_v50, %v1936_v21  ;;  %v4257_v6 = vpop.f32.mrb[62].mxu0  ;;  %4299 = vmatmul.mubr.bf16.gmra.mrb[88].mxu1 %v2052_v20 }
 0x497   : > { %v1948_v7 = vadd.f32 %v4257_v6, %v5611_v50  ;;  %v1939_v8 = vpop.f32.mrb[63].mxu0  ;;  %v2029_v10 = vmax.f32 %v1945_v26, 0.0 }
 0x498   : > { %v1940_v55 = vadd.f32 %v5611_v50, %v1939_v8  ;;  %v2027_v28 = vmax.f32 %v1937_v63, 0.0 }
 0x499   : > { %v2030_v11 = vmax.f32 %v1948_v7, 0.0 }
 0x49a   : > { %v2028_v27 = vmax.f32 %v1940_v55, 0.0 }
 0x49b   : > { %v2054_v45 = vpack.c.bf16 %v2030_v11, %v2029_v10 }
 0x49c   : > { %v2053_v47 = vpack.c.bf16 %v2028_v27, %v2027_v28  ;;  %v4260_v36 = vpop.f32.mrb[64].mxu0 }
 0x49d   : > { %v1961_v53 = vadd.f32 %v4260_v36, %v5611_v50  ;;  %v1952_v3 = vpop.f32.mrb[65].mxu0 }
 0x49e   : > { %v1953_v24 = vadd.f32 %v5611_v50, %v1952_v3  ;;  %v4261_v43 = vpop.f32.mrb[66].mxu0  ;;  %4302 = vmatprep.mubr.bf16.mxu1 %v2053_v47 }
 0x49f   : > { %v1964_v12 = vadd.f32 %v4261_v43, %v5611_v50  ;;  %v1955_v38 = vpop.f32.mrb[67].mxu0  ;;  %4303 = vmatmul.mubr.bf16.gmra.mrb[92].mxu1 %v2054_v45  ;;  %v2033_v30 = vmax.f32 %v1961_v53, 0.0 }
 0x4a0   : > { %v1956_v33 = vadd.f32 %v5611_v50, %v1955_v38  ;;  %v2031_v42 = vmax.f32 %v1953_v24, 0.0 }
 0x4a1   : > { %v2034_v34 = vmax.f32 %v1964_v12, 0.0 }
 0x4a2   : > { %v2032_v31 = vmax.f32 %v1956_v33, 0.0 }
 0x4a3   : > { %v2056_v25 = vpack.c.bf16 %v2034_v34, %v2033_v30 }
 0x4a4   : > { %v2055_v46 = vpack.c.bf16 %v2032_v31, %v2031_v42  ;;  %v4264_v39 = vpop.f32.mrb[68].mxu0 }
 0x4a5   : > { %v1977_v20 = vadd.f32 %v4264_v39, %v5611_v50  ;;  %v1968_v9 = vpop.f32.mrb[69].mxu0 }
 0x4a6   : > { %v1969_v61 = vadd.f32 %v5611_v50, %v1968_v9  ;;  %v4265_v26 = vpop.f32.mrb[70].mxu0  ;;  %4306 = vmatprep.mubr.bf16.mxu1 %v2055_v46 }
 0x4a7   : > { %v1980_v21 = vadd.f32 %v4265_v26, %v5611_v50  ;;  %v1971_v63 = vpop.f32.mrb[71].mxu0  ;;  %4307 = vmatmul.mubr.bf16.gmra.mrb[96].mxu1 %v2056_v25  ;;  %v2037_v7 = vmax.f32 %v1977_v20, 0.0 }
 0x4a8   : > { %v1972_v6 = vadd.f32 %v5611_v50, %v1971_v63  ;;  %v2035_v55 = vmax.f32 %v1969_v61, 0.0 }
 0x4a9   : > { %v2038_v8 = vmax.f32 %v1980_v21, 0.0 }
 0x4aa   : > { %v2036_v10 = vmax.f32 %v1972_v6, 0.0 }
 0x4ab   : > { %v2058_v11 = vpack.c.bf16 %v2038_v8, %v2037_v7 }
 0x4ac   : > { %v2057_v28 = vpack.c.bf16 %v2036_v10, %v2035_v55  ;;  %v4268_v27 = vpop.f32.mrb[72].mxu0  ;;  %v4546_v10 = vld [vmem:[%s6026_s5 + $0x38] sm:$0xff]  }
 0x4ad   : > { %v1993_v45 = vadd.f32 %v4268_v27, %v5611_v50  ;;  %v1984_v47 = vpop.f32.mrb[73].mxu0  ;;  %4336 = vmatprep.subr.bf16.mxu0 %v4546_v10  ;;  %v4550_v27 = vld [vmem:[%s6028_s7 + $0x18] sm:$0xff]  }
 0x4ae   : > { %v1985_v36 = vadd.f32 %v5611_v50, %v1984_v47  ;;  %v4269_v53 = vpop.f32.mrb[74].mxu0  ;;  %4310 = vmatprep.mubr.bf16.mxu1 %v2057_v28  ;;  %4337 = vmatpush3.bf16.msra.mxu0 %v4546_v10  ;;  %v4549_v28 = vld [vmem:[%s6028_s7 + $0x10] sm:$0xff]   ;;  %v4552_v47 = vld [vmem:[%s6028_s7 + $0x28] sm:$0xff]  }
 0x4af   : > { %v1996_v3 = vadd.f32 %v4269_v53, %v5611_v50  ;;  %v1987_v24 = vpop.f32.mrb[75].mxu0  ;;  %4311 = vmatmul.mubr.bf16.gmra.mrb[100].mxu1 %v2058_v11  ;;  %v2041_v12 = vmax.f32 %v1993_v45, 0.0  ;;  %v4547_v11 = vld [vmem:[%s6028_s7] sm:$0xff]  }
 0x4b0   : > { %v1988_v43 = vadd.f32 %v5611_v50, %v1987_v24  ;;  %v2039_v33 = vmax.f32 %v1985_v36, 0.0  ;;  %4370 = vmatprep.subr.bf16.mxu1 %v4547_v11  ;;  %v4551_v45 = vld [vmem:[%s6028_s7 + $0x20] sm:$0xff]   ;;  %v4553_v36 = vld [vmem:[%s6028_s7 + $0x30] sm:$0xff]  }
 0x4b1   : > { %v2042_v38 = vmax.f32 %v1996_v3, 0.0  ;;  %4371 = vmatpush3.bf16.msra.mxu1 %v4547_v11  ;;  %v5672_v53 = vld [vmem:[%s6025_s4 + $0x2] ss:$0 sm:$0xff] }
 0x4b2   : > { %v2040_v30 = vmax.f32 %v1988_v43, 0.0 }
 0x4b3   : > { %v2060_v34 = vpack.c.bf16 %v2042_v38, %v2041_v12 }
 0x4b4   : > { %v2059_v42 = vpack.c.bf16 %v2040_v30, %v2039_v33  ;;  %v4272_v31 = vpop.f32.mrb[76].mxu0 }
 0x4b5   : > { %v2009_v25 = vadd.f32 %v4272_v31, %v5611_v50  ;;  %v2000_v46 = vpop.f32.mrb[77].mxu0 }
 0x4b6   : > { %v2001_v39 = vadd.f32 %v5611_v50, %v2000_v46  ;;  %v4273_v20 = vpop.f32.mrb[78].mxu0  ;;  %4314 = vmatprep.mubr.bf16.mxu1 %v2059_v42 }
 0x4b7   : > { %v2012_v9 = vadd.f32 %v4273_v20, %v5611_v50  ;;  %v2003_v61 = vpop.f32.mrb[79].mxu0  ;;  %4315 = vmatmul.mubr.bf16.gmra.mrb[104].mxu1 %v2060_v34  ;;  %v2045_v21 = vmax.f32 %v2009_v25, 0.0 }
 0x4b8   : > { %v2004_v26 = vadd.f32 %v5611_v50, %v2003_v61  ;;  %v2043_v6 = vmax.f32 %v2001_v39, 0.0  ;;  %v4548_v50 = vld [vmem:[%s6028_s7 + $0x8] sm:$0xff]  }
 0x4b9   : > { %v2046_v63 = vmax.f32 %v2012_v9, 0.0  ;;  %4372 = vmatprep.subr.bf16.mxu1 %v4548_v50 }
 0x4ba   : > { %v2044_v7 = vmax.f32 %v2004_v26, 0.0  ;;  %4373 = vmatpush3.bf16.msra.mxu1 %v4548_v50 }
 0x4bb   : > { %v2062_v8 = vpack.c.bf16 %v2046_v63, %v2045_v21  ;;  %4374 = vmatprep.subr.bf16.mxu1 %v4549_v28 }
 0x4bc   : > { %v2061_v55 = vpack.c.bf16 %v2044_v7, %v2043_v6 }
 0x4be   : > { %4318 = vmatprep.mubr.bf16.mxu1 %v2061_v55  ;;  %4375 = vmatpush3.bf16.msra.mxu1 %v4549_v28 }
 0x4bf   : > { %4319 = vmatmul.mubr.bf16.gmra.mrb[108].mxu1 %v2062_v8  ;;  %4376 = vmatprep.subr.bf16.mxu1 %v4550_v27 }
 0x4c2   : > { %4377 = vmatpush3.bf16.msra.mxu1 %v4550_v27 }
 0x4c3   : > { %4378 = vmatprep.subr.bf16.mxu1 %v4551_v45 }
 0x4c6   : > { %4379 = vmatpush3.bf16.msra.mxu1 %v4551_v45 }
 0x4c7   : > { %4380 = vmatprep.subr.bf16.mxu1 %v4552_v47 }
 0x4ca   : > { %4381 = vmatpush3.bf16.msra.mxu1 %v4552_v47 }
 0x4cb   : > { %4382 = vmatprep.subr.bf16.mxu1 %v4553_v36 }
 0x4ce   : > { %4383 = vmatpush3.bf16.msra.mxu1 %v4553_v36 }
 0x555   : > { %v4292_v3 = vpop.f32.mrb[80].mxu1 }
 0x556   : > { %v2179_v24 = vadd.f32 %v4292_v3, %v5672_v53  ;;  %v2170_v43 = vpop.f32.mrb[81].mxu1 }
 0x557   : > { %v2171_v12 = vadd.f32 %v5672_v53, %v2170_v43  ;;  %v4293_v38 = vpop.f32.mrb[82].mxu1 }
 0x558   : > { %v2299_v33 = vmax.f32 %v2179_v24, 0.0  ;;  %v2182_v30 = vadd.f32 %v4293_v38, %v5672_v53  ;;  %v2173_v34 = vpop.f32.mrb[83].mxu1 }
 0x559   : > { %v2297_v42 = vmax.f32 %v2171_v12, 0.0  ;;  %v2174_v31 = vadd.f32 %v5672_v53, %v2173_v34 }
 0x55a   : > { %v2300_v25 = vmax.f32 %v2182_v30, 0.0  ;;  %v2331_v39 = vadd.f32 %v2299_v33, %v5438_v15 }
 0x55b   : > { %v2298_v46 = vmax.f32 %v2174_v31, 0.0  ;;  %v2329_v9 = vadd.f32 %v2297_v42, %v5432_v44 }
 0x55c   : > { %v2332_v20 = vadd.f32 %v2300_v25, %v5429_v54 }
 0x55d   : > { %v2330_v61 = vadd.f32 %v2298_v46, %v5435_v13 }
 0x55e   : > { %v2362_v21 = vpack.c.bf16 %v2332_v20, %v2331_v39 }
 0x55f   : > { %v2361_v55 = vpack.c.bf16 %v2330_v61, %v2329_v9 }
 0x561   : > { %v4296_v26 = vpop.f32.mrb[84].mxu1  ;;  %4338 = vmatprep.mubr.bf16.mxu0 %v2361_v55 }
 0x562   : > { %v2195_v63 = vadd.f32 %v4296_v26, %v5672_v53  ;;  %v2186_v6 = vpop.f32.mrb[85].mxu1  ;;  %4339 = vmatmul.mubr.bf16.vlgmr.msra.gmra.mrb[80].mxu0 %v2362_v21 }
 0x563   : > { %v2187_v7 = vadd.f32 %v5672_v53, %v2186_v6  ;;  %v4297_v8 = vpop.f32.mrb[86].mxu1 }
 0x564   : > { %v2303_v10 = vmax.f32 %v2195_v63, 0.0  ;;  %v2198_v11 = vadd.f32 %v4297_v8, %v5672_v53  ;;  %v2189_v50 = vpop.f32.mrb[87].mxu1 }
 0x565   : > { %v2301_v15 = vmax.f32 %v2187_v7, 0.0  ;;  %v2190_v54 = vadd.f32 %v5672_v53, %v2189_v50 }
 0x566   : > { %v2304_v44 = vmax.f32 %v2198_v11, 0.0  ;;  %v2335_v28 = vadd.f32 %v2303_v10, %v5458_v19 }
 0x567   : > { %v2302_v13 = vmax.f32 %v2190_v54, 0.0  ;;  %v2333_v45 = vadd.f32 %v2301_v15, %v5452_v58 }
 0x568   : > { %v2336_v27 = vadd.f32 %v2304_v44, %v5449_v57 }
 0x569   : > { %v2334_v47 = vadd.f32 %v2302_v13, %v5455_v29  ;;  %v4300_v36 = vpop.f32.mrb[88].mxu1 }
 0x56a   : > { %v2211_v3 = vadd.f32 %v4300_v36, %v5672_v53  ;;  %v2202_v24 = vpop.f32.mrb[89].mxu1  ;;  %v2364_v43 = vpack.c.bf16 %v2336_v27, %v2335_v28 }
 0x56b   : > { %v2203_v12 = vadd.f32 %v5672_v53, %v2202_v24  ;;  %v4301_v38 = vpop.f32.mrb[90].mxu1  ;;  %v2363_v33 = vpack.c.bf16 %v2334_v47, %v2333_v45 }
 0x56c   : > { %v2307_v30 = vmax.f32 %v2211_v3, 0.0  ;;  %v2214_v34 = vadd.f32 %v4301_v38, %v5672_v53  ;;  %v2205_v42 = vpop.f32.mrb[91].mxu1 }
 0x56d   : > { %v2305_v19 = vmax.f32 %v2203_v12, 0.0  ;;  %v2206_v57 = vadd.f32 %v5672_v53, %v2205_v42  ;;  %4342 = vmatprep.mubr.bf16.mxu0 %v2363_v33 }
 0x56e   : > { %v2308_v58 = vmax.f32 %v2214_v34, 0.0  ;;  %4343 = vmatmul.mubr.bf16.gmra.mrb[84].mxu0 %v2364_v43  ;;  %v2339_v31 = vadd.f32 %v2307_v30, %v5478_v35 }
 0x56f   : > { %v2306_v29 = vmax.f32 %v2206_v57, 0.0  ;;  %v2337_v46 = vadd.f32 %v2305_v19, %v5472_v49 }
 0x570   : > { %v2340_v25 = vadd.f32 %v2308_v58, %v5469_v48 }
 0x571   : > { %v2338_v39 = vadd.f32 %v2306_v29, %v5475_v23 }
 0x572   : > { %v4304_v20 = vpop.f32.mrb[92].mxu1  ;;  %v2366_v26 = vpack.c.bf16 %v2340_v25, %v2339_v31 }
 0x573   : > { %v2227_v9 = vadd.f32 %v4304_v20, %v5672_v53  ;;  %v2218_v61 = vpop.f32.mrb[93].mxu1  ;;  %v2365_v6 = vpack.c.bf16 %v2338_v39, %v2337_v46 }
 0x574   : > { %v2219_v21 = vadd.f32 %v5672_v53, %v2218_v61  ;;  %v4305_v63 = vpop.f32.mrb[94].mxu1 }
 0x575   : > { %v2311_v7 = vmax.f32 %v2227_v9, 0.0  ;;  %v2230_v8 = vadd.f32 %v4305_v63, %v5672_v53  ;;  %v2221_v55 = vpop.f32.mrb[95].mxu1  ;;  %4346 = vmatprep.mubr.bf16.mxu0 %v2365_v6 }
 0x576   : > { %v2309_v35 = vmax.f32 %v2219_v21, 0.0  ;;  %v2222_v48 = vadd.f32 %v5672_v53, %v2221_v55  ;;  %4347 = vmatmul.mubr.bf16.gmra.mrb[88].mxu0 %v2366_v26 }
 0x577   : > { %v2312_v49 = vmax.f32 %v2230_v8, 0.0  ;;  %v2343_v10 = vadd.f32 %v2311_v7, %v5498_v59 }
 0x578   : > { %v2310_v23 = vmax.f32 %v2222_v48, 0.0  ;;  %v2341_v50 = vadd.f32 %v2309_v35, %v5492_v1 }
 0x579   : > { %v2344_v11 = vadd.f32 %v2312_v49, %v5489_v32 }
 0x57a   : > { %v2342_v15 = vadd.f32 %v2310_v23, %v5495_v60  ;;  %v4308_v54 = vpop.f32.mrb[96].mxu1 }
 0x57b   : > { %v2243_v44 = vadd.f32 %v4308_v54, %v5672_v53  ;;  %v2234_v13 = vpop.f32.mrb[97].mxu1  ;;  %v2368_v28 = vpack.c.bf16 %v2344_v11, %v2343_v10 }
 0x57c   : > { %v2235_v27 = vadd.f32 %v5672_v53, %v2234_v13  ;;  %v4309_v45 = vpop.f32.mrb[98].mxu1  ;;  %v2367_v47 = vpack.c.bf16 %v2342_v15, %v2341_v50 }
 0x57d   : > { %v2315_v36 = vmax.f32 %v2243_v44, 0.0  ;;  %v2246_v3 = vadd.f32 %v4309_v45, %v5672_v53  ;;  %v2237_v24 = vpop.f32.mrb[99].mxu1 }
 0x57e   : > { %v2313_v59 = vmax.f32 %v2235_v27, 0.0  ;;  %v2238_v32 = vadd.f32 %v5672_v53, %v2237_v24  ;;  %4350 = vmatprep.mubr.bf16.mxu0 %v2367_v47 }
 0x57f   : > { %v2316_v1 = vmax.f32 %v2246_v3, 0.0  ;;  %4351 = vmatmul.mubr.bf16.gmra.mrb[92].mxu0 %v2368_v28  ;;  %v2347_v43 = vadd.f32 %v2315_v36, %v5518_v4 }
 0x580   : > { %v2314_v60 = vmax.f32 %v2238_v32, 0.0  ;;  %v2345_v38 = vadd.f32 %v2313_v59, %v5512_v17 }
 0x581   : > { %v2348_v12 = vadd.f32 %v2316_v1, %v5509_v56 }
 0x582   : > { %v2346_v33 = vadd.f32 %v2314_v60, %v5515_v2  ;;  %v4312_v30 = vpop.f32.mrb[100].mxu1 }
 0x583   : > { %v2259_v34 = vadd.f32 %v4312_v30, %v5672_v53  ;;  %v2250_v42 = vpop.f32.mrb[101].mxu1  ;;  %v2370_v19 = vpack.c.bf16 %v2348_v12, %v2347_v43  ;;  %v4559_v12 = vld [vmem:[%s6030_s9 + $0x20] sm:$0xff]  }
 0x584   : > { %v2251_v57 = vadd.f32 %v5672_v53, %v2250_v42  ;;  %v4313_v58 = vpop.f32.mrb[102].mxu1  ;;  %v2369_v29 = vpack.c.bf16 %v2346_v33, %v2345_v38  ;;  %v4560_v38 = vld [vmem:[%s6030_s9 + $0x28] sm:$0xff]   ;;  %v4561_v33 = vld [vmem:[%s6030_s9 + $0x30] sm:$0xff]   ;;  %v5765_v30 = vld [vmem:[%s6027_s6] ss:$0 sm:$0xff] }
 0x585   : > { %v2319_v31 = vmax.f32 %v2259_v34, 0.0  ;;  %v2262_v25 = vadd.f32 %v4313_v58, %v5672_v53  ;;  %v2253_v46 = vpop.f32.mrb[103].mxu1 }
 0x586   : > { %v2317_v4 = vmax.f32 %v2251_v57, 0.0  ;;  %v2254_v56 = vadd.f32 %v5672_v53, %v2253_v46  ;;  %4354 = vmatprep.mubr.bf16.mxu0 %v2369_v29 }
 0x587   : > { %v2320_v17 = vmax.f32 %v2262_v25, 0.0  ;;  %4355 = vmatmul.mubr.bf16.gmra.mrb[96].mxu0 %v2370_v19  ;;  %v2351_v39 = vadd.f32 %v2319_v31, %v5538_v62 }
 0x588   : > { %v2318_v2 = vmax.f32 %v2254_v56, 0.0  ;;  %v2349_v9 = vadd.f32 %v2317_v4, %v5532_v14 }
 0x589   : > { %v2352_v20 = vadd.f32 %v2320_v17, %v5529_v37 }
 0x58a   : > { %v2350_v61 = vadd.f32 %v2318_v2, %v5535_v0  ;;  %v4316_v26 = vpop.f32.mrb[104].mxu1 }
 0x58b   : > { %v2275_v21 = vadd.f32 %v4316_v26, %v5672_v53  ;;  %v2266_v63 = vpop.f32.mrb[105].mxu1  ;;  %v2372_v6 = vpack.c.bf16 %v2352_v20, %v2351_v39 }
 0x58c   : > { %v2267_v7 = vadd.f32 %v5672_v53, %v2266_v63  ;;  %v4317_v8 = vpop.f32.mrb[106].mxu1  ;;  %v2371_v55 = vpack.c.bf16 %v2350_v61, %v2349_v9 }
 0x58d   : > { %v2323_v35 = vmax.f32 %v2275_v21, 0.0  ;;  %v2278_v48 = vadd.f32 %v4317_v8, %v5672_v53  ;;  %v2269_v49 = vpop.f32.mrb[107].mxu1 }
 0x58e   : > { %v2321_v62 = vmax.f32 %v2267_v7, 0.0  ;;  %v2270_v37 = vadd.f32 %v5672_v53, %v2269_v49  ;;  %4358 = vmatprep.mubr.bf16.mxu0 %v2371_v55 }
 0x58f   : > { %v2324_v14 = vmax.f32 %v2278_v48, 0.0  ;;  %4359 = vmatmul.mubr.bf16.gmra.mrb[100].mxu0 %v2372_v6  ;;  %v2355_v23 = vadd.f32 %v2323_v35, %v5558_v5 }
 0x590   : > { %v2322_v0 = vmax.f32 %v2270_v37, 0.0  ;;  %v2353_v11 = vadd.f32 %v2321_v62, %v5552_v51 }
 0x591   : > { %v2356_v10 = vadd.f32 %v2324_v14, %v5549_v41 }
 0x592   : > { %v2354_v50 = vadd.f32 %v2322_v0, %v5555_v16  ;;  %v4320_v15 = vpop.f32.mrb[108].mxu1 }
 0x593   : > { %v2291_v54 = vadd.f32 %v4320_v15, %v5672_v53  ;;  %v2282_v44 = vpop.f32.mrb[109].mxu1  ;;  %v2374_v13 = vpack.c.bf16 %v2356_v10, %v2355_v23 }
 0x594   : > { %v2283_v28 = vadd.f32 %v5672_v53, %v2282_v44  ;;  %v4321_v27 = vpop.f32.mrb[110].mxu1  ;;  %v2373_v45 = vpack.c.bf16 %v2354_v50, %v2353_v11 }
 0x595   : > { %v2327_v47 = vmax.f32 %v2291_v54, 0.0  ;;  %v2294_v36 = vadd.f32 %v4321_v27, %v5672_v53  ;;  %v2285_v3 = vpop.f32.mrb[111].mxu1 }
 0x596   : > { %v2325_v5 = vmax.f32 %v2283_v28, 0.0  ;;  %v2286_v41 = vadd.f32 %v5672_v53, %v2285_v3  ;;  %4362 = vmatprep.mubr.bf16.mxu0 %v2373_v45  ;;  %v4554_v53 = vld [vmem:[%s6028_s7 + $0x38] sm:$0xff]  }
 0x597   : > { %v2328_v51 = vmax.f32 %v2294_v36, 0.0  ;;  %4363 = vmatmul.mubr.bf16.gmra.mrb[104].mxu0 %v2374_v13  ;;  %v2359_v24 = vadd.f32 %v2327_v47, %v5578_v18  ;;  %4384 = vmatprep.subr.bf16.mxu1 %v4554_v53  ;;  %v4555_v18 = vld [vmem:[%s6030_s9] sm:$0xff]  }
 0x598   : > { %v2326_v16 = vmax.f32 %v2286_v41, 0.0  ;;  %v2357_v32 = vadd.f32 %v2325_v5, %v5572_v40  ;;  %4385 = vmatpush3.bf16.msra.mxu1 %v4554_v53  ;;  %4418 = vmatprep.subr.bf16.mxu0 %v4555_v18  ;;  %v4557_v40 = vld [vmem:[%s6030_s9 + $0x10] sm:$0xff]  }
 0x599   : > { %v2360_v59 = vadd.f32 %v2328_v51, %v5569_v52  ;;  %v4556_v52 = vld [vmem:[%s6030_s9 + $0x8] sm:$0xff]   ;;  %4419 = vmatpush3.bf16.msra.mxu0 %v4555_v18 }
 0x59a   : > { %v2358_v1 = vadd.f32 %v2326_v16, %v5575_v22  ;;  %4420 = vmatprep.subr.bf16.mxu0 %v4556_v52  ;;  %v4558_v22 = vld [vmem:[%s6030_s9 + $0x18] sm:$0xff]  }
 0x59b   : > { %v2376_v60 = vpack.c.bf16 %v2360_v59, %v2359_v24 }
 0x59c   : > { %v2375_v43 = vpack.c.bf16 %v2358_v1, %v2357_v32 }
 0x59d   : > { %4421 = vmatpush3.bf16.msra.mxu0 %v4556_v52 }
 0x59e   : > { %4366 = vmatprep.mubr.bf16.mxu0 %v2375_v43  ;;  %4422 = vmatprep.subr.bf16.mxu0 %v4557_v40 }
 0x59f   : > { %4367 = vmatmul.mubr.bf16.gmra.mrb[108].mxu0 %v2376_v60 }
 0x5a1   : > { %4423 = vmatpush3.bf16.msra.mxu0 %v4557_v40 }
 0x5a2   : > { %4424 = vmatprep.subr.bf16.mxu0 %v4558_v22 }
 0x5a5   : > { %4425 = vmatpush3.bf16.msra.mxu0 %v4558_v22 }
 0x5a6   : > { %4426 = vmatprep.subr.bf16.mxu0 %v4559_v12 }
 0x5a9   : > { %4427 = vmatpush3.bf16.msra.mxu0 %v4559_v12 }
 0x5aa   : > { %4428 = vmatprep.subr.bf16.mxu0 %v4560_v38 }
 0x5ad   : > { %4429 = vmatpush3.bf16.msra.mxu0 %v4560_v38 }
 0x5ae   : > { %4430 = vmatprep.subr.bf16.mxu0 %v4561_v33 }
 0x5b1   : > { %4431 = vmatpush3.bf16.msra.mxu0 %v4561_v33 }
 0x635   : > { %v4340_v34 = vpop.f32.mrb[80].mxu0 }
 0x636   : > { %v2491_v42 = vadd.f32 %v4340_v34, %v5765_v30  ;;  %v2482_v19 = vpop.f32.mrb[81].mxu0 }
 0x637   : > { %v2483_v57 = vadd.f32 %v5765_v30, %v2482_v19  ;;  %v4341_v58 = vpop.f32.mrb[82].mxu0 }
 0x638   : > { %v2494_v29 = vadd.f32 %v4341_v58, %v5765_v30  ;;  %v2485_v31 = vpop.f32.mrb[83].mxu0  ;;  %v2611_v46 = vmax.f32 %v2491_v42, 0.0 }
 0x639   : > { %v2486_v25 = vadd.f32 %v5765_v30, %v2485_v31  ;;  %v2609_v56 = vmax.f32 %v2483_v57, 0.0 }
 0x63a   : > { %v2612_v4 = vmax.f32 %v2494_v29, 0.0 }
 0x63b   : > { %v2610_v17 = vmax.f32 %v2486_v25, 0.0 }
 0x63c   : > { %v2642_v2 = vpack.c.bf16 %v2612_v4, %v2611_v46 }
 0x63d   : > { %v2641_v39 = vpack.c.bf16 %v2610_v17, %v2609_v56 }
 0x63f   : > { %4386 = vmatprep.mubr.bf16.mxu1 %v2641_v39 }
 0x640   : > { %4387 = vmatmul.mubr.bf16.vlgmr.msra.gmra.mrb[112].mxu1 %v2642_v2 }
 0x641   : > { %v4344_v20 = vpop.f32.mrb[84].mxu0 }
 0x642   : > { %v2507_v9 = vadd.f32 %v4344_v20, %v5765_v30  ;;  %v2498_v61 = vpop.f32.mrb[85].mxu0 }
 0x643   : > { %v2499_v26 = vadd.f32 %v5765_v30, %v2498_v61  ;;  %v4345_v21 = vpop.f32.mrb[86].mxu0 }
 0x644   : > { %v2510_v63 = vadd.f32 %v4345_v21, %v5765_v30  ;;  %v2501_v6 = vpop.f32.mrb[87].mxu0  ;;  %v2615_v8 = vmax.f32 %v2507_v9, 0.0 }
 0x645   : > { %v2502_v7 = vadd.f32 %v5765_v30, %v2501_v6  ;;  %v2613_v35 = vmax.f32 %v2499_v26, 0.0 }
 0x646   : > { %v2616_v55 = vmax.f32 %v2510_v63, 0.0 }
 0x647   : > { %v2614_v48 = vmax.f32 %v2502_v7, 0.0 }
 0x648   : > { %v2644_v49 = vpack.c.bf16 %v2616_v55, %v2615_v8 }
 0x649   : > { %v2643_v62 = vpack.c.bf16 %v2614_v48, %v2613_v35  ;;  %v4348_v37 = vpop.f32.mrb[88].mxu0 }
 0x64a   : > { %v2523_v14 = vadd.f32 %v4348_v37, %v5765_v30  ;;  %v2514_v0 = vpop.f32.mrb[89].mxu0 }
 0x64b   : > { %v2515_v23 = vadd.f32 %v5765_v30, %v2514_v0  ;;  %v4349_v10 = vpop.f32.mrb[90].mxu0  ;;  %4390 = vmatprep.mubr.bf16.mxu1 %v2643_v62 }
 0x64c   : > { %v2526_v11 = vadd.f32 %v4349_v10, %v5765_v30  ;;  %v2517_v50 = vpop.f32.mrb[91].mxu0  ;;  %4391 = vmatmul.mubr.bf16.gmra.mrb[116].mxu1 %v2644_v49  ;;  %v2619_v54 = vmax.f32 %v2523_v14, 0.0 }
 0x64d   : > { %v2518_v15 = vadd.f32 %v5765_v30, %v2517_v50  ;;  %v2617_v13 = vmax.f32 %v2515_v23, 0.0 }
 0x64e   : > { %v2620_v44 = vmax.f32 %v2526_v11, 0.0 }
 0x64f   : > { %v2618_v28 = vmax.f32 %v2518_v15, 0.0 }
 0x650   : > { %v2646_v27 = vpack.c.bf16 %v2620_v44, %v2619_v54 }
 0x651   : > { %v2645_v45 = vpack.c.bf16 %v2618_v28, %v2617_v13 }
 0x652   : > { %v4352_v47 = vpop.f32.mrb[92].mxu0 }
 0x653   : > { %v2539_v36 = vadd.f32 %v4352_v47, %v5765_v30  ;;  %v2530_v3 = vpop.f32.mrb[93].mxu0  ;;  %4394 = vmatprep.mubr.bf16.mxu1 %v2645_v45 }
 0x654   : > { %v2531_v5 = vadd.f32 %v5765_v30, %v2530_v3  ;;  %v4353_v41 = vpop.f32.mrb[94].mxu0  ;;  %4395 = vmatmul.mubr.bf16.gmra.mrb[120].mxu1 %v2646_v27 }
 0x655   : > { %v2542_v51 = vadd.f32 %v4353_v41, %v5765_v30  ;;  %v2533_v16 = vpop.f32.mrb[95].mxu0  ;;  %v2623_v59 = vmax.f32 %v2539_v36, 0.0 }
 0x656   : > { %v2534_v24 = vadd.f32 %v5765_v30, %v2533_v16  ;;  %v2621_v1 = vmax.f32 %v2531_v5, 0.0 }
 0x657   : > { %v2624_v32 = vmax.f32 %v2542_v51, 0.0 }
 0x658   : > { %v2622_v60 = vmax.f32 %v2534_v24, 0.0  ;;  %v4562_v24 = vld [vmem:[%s6030_s9 + $0x38] sm:$0xff]  }
 0x659   : > { %v2648_v43 = vpack.c.bf16 %v2624_v32, %v2623_v59  ;;  %4432 = vmatprep.subr.bf16.mxu0 %v4562_v24  ;;  %v5805_v59 = vld [vmem:[%s6029_s8] ss:$0 sm:$0xff] }
 0x65a   : > { %v2647_v53 = vpack.c.bf16 %v2622_v60, %v2621_v1  ;;  %v4356_v18 = vpop.f32.mrb[96].mxu0  ;;  %4433 = vmatpush3.bf16.msra.mxu0 %v4562_v24 }
 0x65b   : > { %v2555_v52 = vadd.f32 %v4356_v18, %v5765_v30  ;;  %v2546_v40 = vpop.f32.mrb[97].mxu0 }
 0x65c   : > { %v2547_v22 = vadd.f32 %v5765_v30, %v2546_v40  ;;  %v4357_v12 = vpop.f32.mrb[98].mxu0  ;;  %4398 = vmatprep.mubr.bf16.mxu1 %v2647_v53 }
 0x65d   : > { %v2558_v38 = vadd.f32 %v4357_v12, %v5765_v30  ;;  %v2549_v33 = vpop.f32.mrb[99].mxu0  ;;  %4399 = vmatmul.mubr.bf16.gmra.mrb[124].mxu1 %v2648_v43  ;;  %v2627_v42 = vmax.f32 %v2555_v52, 0.0 }
 0x65e   : > { %v2550_v34 = vadd.f32 %v5765_v30, %v2549_v33  ;;  %v2625_v57 = vmax.f32 %v2547_v22, 0.0 }
 0x65f   : > { %v2628_v19 = vmax.f32 %v2558_v38, 0.0 }
 0x660   : > { %v2626_v58 = vmax.f32 %v2550_v34, 0.0 }
 0x661   : > { %v2650_v29 = vpack.c.bf16 %v2628_v19, %v2627_v42 }
 0x662   : > { %v2649_v31 = vpack.c.bf16 %v2626_v58, %v2625_v57  ;;  %v4360_v25 = vpop.f32.mrb[100].mxu0 }
 0x663   : > { %v2571_v46 = vadd.f32 %v4360_v25, %v5765_v30  ;;  %v2562_v4 = vpop.f32.mrb[101].mxu0 }
 0x664   : > { %v2563_v56 = vadd.f32 %v5765_v30, %v2562_v4  ;;  %v4361_v17 = vpop.f32.mrb[102].mxu0  ;;  %4402 = vmatprep.mubr.bf16.mxu1 %v2649_v31 }
 0x665   : > { %v2574_v2 = vadd.f32 %v4361_v17, %v5765_v30  ;;  %v2565_v39 = vpop.f32.mrb[103].mxu0  ;;  %4403 = vmatmul.mubr.bf16.gmra.mrb[128].mxu1 %v2650_v29  ;;  %v2631_v9 = vmax.f32 %v2571_v46, 0.0 }
 0x666   : > { %v2566_v20 = vadd.f32 %v5765_v30, %v2565_v39  ;;  %v2629_v26 = vmax.f32 %v2563_v56, 0.0 }
 0x667   : > { %v2632_v61 = vmax.f32 %v2574_v2, 0.0 }
 0x668   : > { %v2630_v21 = vmax.f32 %v2566_v20, 0.0 }
 0x669   : > { %v2652_v63 = vpack.c.bf16 %v2632_v61, %v2631_v9 }
 0x66a   : > { %v2651_v6 = vpack.c.bf16 %v2630_v21, %v2629_v26  ;;  %v4364_v7 = vpop.f32.mrb[104].mxu0 }
 0x66b   : > { %v2587_v8 = vadd.f32 %v4364_v7, %v5765_v30  ;;  %v2578_v55 = vpop.f32.mrb[105].mxu0 }
 0x66c   : > { %v2579_v35 = vadd.f32 %v5765_v30, %v2578_v55  ;;  %v4365_v48 = vpop.f32.mrb[106].mxu0  ;;  %4406 = vmatprep.mubr.bf16.mxu1 %v2651_v6 }
 0x66d   : > { %v2590_v49 = vadd.f32 %v4365_v48, %v5765_v30  ;;  %v2581_v62 = vpop.f32.mrb[107].mxu0  ;;  %4407 = vmatmul.mubr.bf16.gmra.mrb[132].mxu1 %v2652_v63  ;;  %v2635_v14 = vmax.f32 %v2587_v8, 0.0 }
 0x66e   : > { %v2582_v37 = vadd.f32 %v5765_v30, %v2581_v62  ;;  %v2633_v23 = vmax.f32 %v2579_v35, 0.0 }
 0x66f   : > { %v2636_v0 = vmax.f32 %v2590_v49, 0.0 }
 0x670   : > { %v2634_v10 = vmax.f32 %v2582_v37, 0.0 }
 0x671   : > { %v2654_v11 = vpack.c.bf16 %v2636_v0, %v2635_v14 }
 0x672   : > { %v2653_v50 = vpack.c.bf16 %v2634_v10, %v2633_v23  ;;  %v4368_v15 = vpop.f32.mrb[108].mxu0 }
 0x673   : > { %v2603_v54 = vadd.f32 %v4368_v15, %v5765_v30  ;;  %v2594_v44 = vpop.f32.mrb[109].mxu0 }
 0x674   : > { %v2595_v13 = vadd.f32 %v5765_v30, %v2594_v44  ;;  %v4369_v28 = vpop.f32.mrb[110].mxu0  ;;  %4410 = vmatprep.mubr.bf16.mxu1 %v2653_v50 }
 0x675   : > { %v2606_v27 = vadd.f32 %v4369_v28, %v5765_v30  ;;  %v2597_v45 = vpop.f32.mrb[111].mxu0  ;;  %4411 = vmatmul.mubr.bf16.gmra.mrb[136].mxu1 %v2654_v11  ;;  %v2639_v36 = vmax.f32 %v2603_v54, 0.0 }
 0x676   : > { %v2598_v47 = vadd.f32 %v5765_v30, %v2597_v45  ;;  %v2637_v5 = vmax.f32 %v2595_v13, 0.0 }
 0x677   : > { %v2640_v3 = vmax.f32 %v2606_v27, 0.0 }
 0x678   : > { %v2638_v41 = vmax.f32 %v2598_v47, 0.0 }
 0x679   : > { %v2656_v51 = vpack.c.bf16 %v2640_v3, %v2639_v36 }
 0x67a   : > { %v2655_v16 = vpack.c.bf16 %v2638_v41, %v2637_v5 }
 0x67c   : > { %4414 = vmatprep.mubr.bf16.mxu1 %v2655_v16 }
 0x67d   : > { %4415 = vmatmul.mubr.bf16.gmra.mrb[140].mxu1 %v2656_v51 }
 0x713   : > { %v4388_v30 = vpop.f32.mrb[112].mxu1 }
 0x714   : > { %v2771_v32 = vadd.f32 %v4388_v30, %v5805_v59  ;;  %v2762_v1 = vpop.f32.mrb[113].mxu1 }
 0x715   : > { %v2763_v60 = vadd.f32 %v5805_v59, %v2762_v1  ;;  %v4389_v43 = vpop.f32.mrb[114].mxu1 }
 0x716   : > { %v2774_v53 = vadd.f32 %v4389_v43, %v5805_v59  ;;  %v2765_v18 = vpop.f32.mrb[115].mxu1  ;;  %v2891_v40 = vmax.f32 %v2771_v32, 0.0 }
 0x717   : > { %v2766_v52 = vadd.f32 %v5805_v59, %v2765_v18  ;;  %v2889_v12 = vmax.f32 %v2763_v60, 0.0 }
 0x718   : > { %v2892_v22 = vmax.f32 %v2774_v53, 0.0 }
 0x719   : > { %v2890_v38 = vmax.f32 %v2766_v52, 0.0 }
 0x71a   : > { %v2922_v33 = vpack.c.bf16 %v2892_v22, %v2891_v40 }
 0x71b   : > { %v2921_v34 = vpack.c.bf16 %v2890_v38, %v2889_v12 }
 0x71d   : > { %4434 = vmatprep.mubr.bf16.mxu0 %v2921_v34 }
 0x71e   : > { %4435 = vmatmul.mubr.bf16.vlgmr.msra.gmra.mrb[112].mxu0 %v2922_v33 }
 0x71f   : > { %v4392_v42 = vpop.f32.mrb[116].mxu1 }
 0x720   : > { %v2787_v19 = vadd.f32 %v4392_v42, %v5805_v59  ;;  %v2778_v57 = vpop.f32.mrb[117].mxu1 }
 0x721   : > { %v2779_v58 = vadd.f32 %v5805_v59, %v2778_v57  ;;  %v4393_v29 = vpop.f32.mrb[118].mxu1 }
 0x722   : > { %v2790_v31 = vadd.f32 %v4393_v29, %v5805_v59  ;;  %v2781_v25 = vpop.f32.mrb[119].mxu1  ;;  %v2895_v4 = vmax.f32 %v2787_v19, 0.0 }
 0x723   : > { %v2782_v46 = vadd.f32 %v5805_v59, %v2781_v25  ;;  %v2893_v17 = vmax.f32 %v2779_v58, 0.0 }
 0x724   : > { %v2896_v56 = vmax.f32 %v2790_v31, 0.0 }
 0x725   : > { %v2894_v2 = vmax.f32 %v2782_v46, 0.0 }
 0x726   : > { %v2924_v39 = vpack.c.bf16 %v2896_v56, %v2895_v4 }
 0x727   : > { %v2923_v20 = vpack.c.bf16 %v2894_v2, %v2893_v17  ;;  %v4396_v9 = vpop.f32.mrb[120].mxu1 }
 0x728   : > { %v2803_v61 = vadd.f32 %v4396_v9, %v5805_v59  ;;  %v2794_v26 = vpop.f32.mrb[121].mxu1 }
 0x729   : > { %v2795_v21 = vadd.f32 %v5805_v59, %v2794_v26  ;;  %v4397_v63 = vpop.f32.mrb[122].mxu1  ;;  %4438 = vmatprep.mubr.bf16.mxu0 %v2923_v20 }
 0x72a   : > { %v2806_v6 = vadd.f32 %v4397_v63, %v5805_v59  ;;  %v2797_v7 = vpop.f32.mrb[123].mxu1  ;;  %4439 = vmatmul.mubr.bf16.gmra.mrb[116].mxu0 %v2924_v39  ;;  %v2899_v55 = vmax.f32 %v2803_v61, 0.0 }
 0x72b   : > { %v2798_v8 = vadd.f32 %v5805_v59, %v2797_v7  ;;  %v2897_v48 = vmax.f32 %v2795_v21, 0.0 }
 0x72c   : > { %v2900_v35 = vmax.f32 %v2806_v6, 0.0 }
 0x72d   : > { %v2898_v49 = vmax.f32 %v2798_v8, 0.0 }
 0x72e   : > { %v2926_v62 = vpack.c.bf16 %v2900_v35, %v2899_v55 }
 0x72f   : > { %v2925_v37 = vpack.c.bf16 %v2898_v49, %v2897_v48 }
 0x730   : > { %v4400_v14 = vpop.f32.mrb[124].mxu1 }
 0x731   : > { %v2819_v0 = vadd.f32 %v4400_v14, %v5805_v59  ;;  %v2810_v23 = vpop.f32.mrb[125].mxu1  ;;  %4442 = vmatprep.mubr.bf16.mxu0 %v2925_v37 }
 0x732   : > { %v2811_v10 = vadd.f32 %v5805_v59, %v2810_v23  ;;  %v4401_v11 = vpop.f32.mrb[126].mxu1  ;;  %4443 = vmatmul.mubr.bf16.gmra.mrb[120].mxu0 %v2926_v62 }
 0x733   : > { %v2822_v50 = vadd.f32 %v4401_v11, %v5805_v59  ;;  %v2813_v15 = vpop.f32.mrb[127].mxu1  ;;  %v2903_v44 = vmax.f32 %v2819_v0, 0.0 }
 0x734   : > { %v2814_v54 = vadd.f32 %v5805_v59, %v2813_v15  ;;  %v2901_v28 = vmax.f32 %v2811_v10, 0.0 }
 0x735   : > { %v2904_v13 = vmax.f32 %v2822_v50, 0.0 }
 0x736   : > { %v2902_v27 = vmax.f32 %v2814_v54, 0.0  ;;  %v5842_v54 = vld [vmem:[%s6031_s10] ss:$0 sm:$0xff] }
 0x737   : > { %v2928_v45 = vpack.c.bf16 %v2904_v13, %v2903_v44 }
 0x738   : > { %v2927_v47 = vpack.c.bf16 %v2902_v27, %v2901_v28  ;;  %v4404_v36 = vpop.f32.mrb[128].mxu1 }
 0x739   : > { %v2835_v3 = vadd.f32 %v4404_v36, %v5805_v59  ;;  %v2826_v5 = vpop.f32.mrb[129].mxu1 }
 0x73a   : > { %v2827_v41 = vadd.f32 %v5805_v59, %v2826_v5  ;;  %v4405_v51 = vpop.f32.mrb[130].mxu1  ;;  %4446 = vmatprep.mubr.bf16.mxu0 %v2927_v47 }
 0x73b   : > { %v2838_v16 = vadd.f32 %v4405_v51, %v5805_v59  ;;  %v2829_v24 = vpop.f32.mrb[131].mxu1  ;;  %4447 = vmatmul.mubr.bf16.gmra.mrb[124].mxu0 %v2928_v45  ;;  %v2907_v32 = vmax.f32 %v2835_v3, 0.0  ;;  %v5849_v45 = vld [vmem:[%s6032_s11] ss:$0 sm:$0xff] }
 0x73c   : > { %v2830_v30 = vadd.f32 %v5805_v59, %v2829_v24  ;;  %v2905_v60 = vmax.f32 %v2827_v41, 0.0 }
 0x73d   : > { %v2908_v1 = vmax.f32 %v2838_v16, 0.0 }
 0x73e   : > { %v2906_v43 = vmax.f32 %v2830_v30, 0.0 }
 0x73f   : > { %v2930_v53 = vpack.c.bf16 %v2908_v1, %v2907_v32 }
 0x740   : > { %v2929_v18 = vpack.c.bf16 %v2906_v43, %v2905_v60  ;;  %v4408_v52 = vpop.f32.mrb[132].mxu1 }
 0x741   : > { %v2851_v40 = vadd.f32 %v4408_v52, %v5805_v59  ;;  %v2842_v22 = vpop.f32.mrb[133].mxu1 }
 0x742   : > { %v2843_v12 = vadd.f32 %v5805_v59, %v2842_v22  ;;  %v4409_v38 = vpop.f32.mrb[134].mxu1  ;;  %4450 = vmatprep.mubr.bf16.mxu0 %v2929_v18 }
 0x743   : > { %v2854_v33 = vadd.f32 %v4409_v38, %v5805_v59  ;;  %v2845_v34 = vpop.f32.mrb[135].mxu1  ;;  %4451 = vmatmul.mubr.bf16.gmra.mrb[128].mxu0 %v2930_v53  ;;  %v2911_v19 = vmax.f32 %v2851_v40, 0.0 }
 0x744   : > { %v2846_v42 = vadd.f32 %v5805_v59, %v2845_v34  ;;  %v2909_v58 = vmax.f32 %v2843_v12, 0.0 }
 0x745   : > { %v2912_v57 = vmax.f32 %v2854_v33, 0.0 }
 0x746   : > { %v2910_v29 = vmax.f32 %v2846_v42, 0.0 }
 0x747   : > { %v2932_v31 = vpack.c.bf16 %v2912_v57, %v2911_v19 }
 0x748   : > { %v2931_v25 = vpack.c.bf16 %v2910_v29, %v2909_v58  ;;  %v4412_v46 = vpop.f32.mrb[136].mxu1 }
 0x749   : > { %v2867_v4 = vadd.f32 %v4412_v46, %v5805_v59  ;;  %v2858_v56 = vpop.f32.mrb[137].mxu1 }
 0x74a   : > { %v2859_v17 = vadd.f32 %v5805_v59, %v2858_v56  ;;  %v4413_v2 = vpop.f32.mrb[138].mxu1  ;;  %4454 = vmatprep.mubr.bf16.mxu0 %v2931_v25 }
 0x74b   : > { %v2870_v39 = vadd.f32 %v4413_v2, %v5805_v59  ;;  %v2861_v20 = vpop.f32.mrb[139].mxu1  ;;  %4455 = vmatmul.mubr.bf16.gmra.mrb[132].mxu0 %v2932_v31  ;;  %v2915_v61 = vmax.f32 %v2867_v4, 0.0 }
 0x74c   : > { %v2862_v9 = vadd.f32 %v5805_v59, %v2861_v20  ;;  %v2913_v21 = vmax.f32 %v2859_v17, 0.0 }
 0x74d   : > { %v2916_v26 = vmax.f32 %v2870_v39, 0.0 }
 0x74e   : > { %v2914_v63 = vmax.f32 %v2862_v9, 0.0 }
 0x74f   : > { %v2934_v6 = vpack.c.bf16 %v2916_v26, %v2915_v61 }
 0x750   : > { %v2933_v7 = vpack.c.bf16 %v2914_v63, %v2913_v21  ;;  %v4416_v8 = vpop.f32.mrb[140].mxu1 }
 0x751   : > { %v2883_v55 = vadd.f32 %v4416_v8, %v5805_v59  ;;  %v2874_v35 = vpop.f32.mrb[141].mxu1 }
 0x752   : > { %v2875_v48 = vadd.f32 %v5805_v59, %v2874_v35  ;;  %v4417_v49 = vpop.f32.mrb[142].mxu1  ;;  %4458 = vmatprep.mubr.bf16.mxu0 %v2933_v7 }
 0x753   : > { %v2886_v62 = vadd.f32 %v4417_v49, %v5805_v59  ;;  %v2877_v37 = vpop.f32.mrb[143].mxu1  ;;  %4459 = vmatmul.mubr.bf16.gmra.mrb[136].mxu0 %v2934_v6  ;;  %v2919_v0 = vmax.f32 %v2883_v55, 0.0 }
 0x754   : > { %v2878_v14 = vadd.f32 %v5805_v59, %v2877_v37  ;;  %v2917_v10 = vmax.f32 %v2875_v48, 0.0 }
 0x755   : > { %v2920_v23 = vmax.f32 %v2886_v62, 0.0 }
 0x756   : > { %v2918_v11 = vmax.f32 %v2878_v14, 0.0 }
 0x757   : > { %v2936_v50 = vpack.c.bf16 %v2920_v23, %v2919_v0 }
 0x758   : > { %v2935_v15 = vpack.c.bf16 %v2918_v11, %v2917_v10 }
 0x75a   : > { %4462 = vmatprep.mubr.bf16.mxu0 %v2935_v15 }
 0x75b   : > { %4463 = vmatmul.mubr.bf16.gmra.mrb[140].mxu0 %v2936_v50 }
 0x7f1   : > { %v4436_v44 = vpop.f32.mrb[112].mxu0 }
 0x7f2   : > { %v3051_v13 = vadd.f32 %v4436_v44, %v5842_v54  ;;  %v3042_v28 = vpop.f32.mrb[113].mxu0 }
 0x7f3   : > { %v3043_v27 = vadd.f32 %v5842_v54, %v3042_v28  ;;  %v4437_v59 = vpop.f32.mrb[114].mxu0 }
 0x7f4   : > { %v3171_v47 = vmax.f32 %v3051_v13, 0.0  ;;  %v3054_v36 = vadd.f32 %v4437_v59, %v5842_v54  ;;  %v3045_v3 = vpop.f32.mrb[115].mxu0 }
 0x7f5   : > { %v3169_v5 = vmax.f32 %v3043_v27, 0.0  ;;  %v3046_v41 = vadd.f32 %v5842_v54, %v3045_v3 }
 0x7f6   : > { %v3172_v51 = vmax.f32 %v3054_v36, 0.0  ;;  %v3210_v16 = vmul.f32 %v5849_v45, %v3171_v47 }
 0x7f7   : > { %v3170_v24 = vmax.f32 %v3046_v41, 0.0  ;;  %v3208_v30 = vmul.f32 %v5849_v45, %v3169_v5 }
 0x7f8   : > { %3244 = vadd.xlane.f32.xlu1 %v3210_v16  ;;  %v3211_v43 = vmul.f32 %v5849_v45, %v3172_v51 }
 0x7f9   : > { %3240 = vadd.xlane.f32.xlu0 %v3208_v30  ;;  %v3209_v52 = vmul.f32 %v5849_v45, %v3170_v24 }
 0x7fc   : > { %3246 = vadd.xlane.f32.xlu1 %v3211_v43 }
 0x7fd   : > { %v4440_v32 = vpop.f32.mrb[116].mxu0  ;;  %3242 = vadd.xlane.f32.xlu0 %v3209_v52 }
 0x7fe   : > { %v3067_v1 = vadd.f32 %v4440_v32, %v5842_v54  ;;  %v3058_v60 = vpop.f32.mrb[117].mxu0 }
 0x7ff   : > { %v3059_v53 = vadd.f32 %v5842_v54, %v3058_v60  ;;  %v4441_v18 = vpop.f32.mrb[118].mxu0 }
 0x800   : > { %v3175_v40 = vmax.f32 %v3067_v1, 0.0  ;;  %v3070_v22 = vadd.f32 %v4441_v18, %v5842_v54  ;;  %v3061_v12 = vpop.f32.mrb[119].mxu0 }
 0x801   : > { %v3062_v38 = vadd.f32 %v5842_v54, %v3061_v12  ;;  %v3173_v42 = vmax.f32 %v3059_v53, 0.0 }
 0x802   : > { %v3176_v33 = vmax.f32 %v3070_v22, 0.0  ;;  %v3214_v34 = vmul.f32 %v5849_v45, %v3175_v40 }
 0x803   : > { %v3174_v19 = vmax.f32 %v3062_v38, 0.0  ;;  %v3212_v4 = vmul.f32 %v5849_v45, %v3173_v42 }
 0x804   : > { %v3215_v57 = vmul.f32 %v5849_v45, %v3176_v33  ;;  %3252 = vadd.xlane.f32.xlu0 %v3214_v34 }
 0x805   : > { %v4444_v58 = vpop.f32.mrb[120].mxu0  ;;  %v3213_v39 = vmul.f32 %v5849_v45, %v3174_v19 }
 0x806   : > { %v3083_v29 = vadd.f32 %v4444_v58, %v5842_v54  ;;  %3254 = vadd.xlane.f32.xlu1 %v3215_v57  ;;  %v3074_v31 = vpop.f32.mrb[121].mxu0 }
 0x807   : > { %v3075_v25 = vadd.f32 %v5842_v54, %v3074_v31  ;;  %v4445_v46 = vpop.f32.mrb[122].mxu0 }
 0x808   : > { %v3179_v56 = vmax.f32 %v3083_v29, 0.0  ;;  %v3086_v17 = vadd.f32 %v4445_v46, %v5842_v54  ;;  %v3077_v2 = vpop.f32.mrb[123].mxu0  ;;  %3248 = vadd.xlane.f32.xlu0 %v3212_v4 }
 0x809   : > { %v3078_v20 = vadd.f32 %v5842_v54, %v3077_v2  ;;  %v3177_v26 = vmax.f32 %v3075_v25, 0.0 }
 0x80a   : > { %v3180_v9 = vmax.f32 %v3086_v17, 0.0  ;;  %3250 = vadd.xlane.f32.xlu1 %v3213_v39  ;;  %v3218_v61 = vmul.f32 %v5849_v45, %v3179_v56 }
 0x80b   : > { %v3178_v21 = vmax.f32 %v3078_v20, 0.0  ;;  %v3216_v48 = vmul.f32 %v5849_v45, %v3177_v26 }
 0x80c   : > { %v3219_v63 = vmul.f32 %v5849_v45, %v3180_v9  ;;  %3260 = vadd.xlane.f32.xlu0 %v3218_v61 }
 0x80d   : > { %v3217_v14 = vmul.f32 %v5849_v45, %v3178_v21 }
 0x80e   : > { %v4448_v6 = vpop.f32.mrb[124].mxu0  ;;  %3262 = vadd.xlane.f32.xlu1 %v3219_v63 }
 0x80f   : > { %v3099_v7 = vadd.f32 %v4448_v6, %v5842_v54  ;;  %v3090_v8 = vpop.f32.mrb[125].mxu0 }
 0x810   : > { %v3091_v55 = vadd.f32 %v5842_v54, %v3090_v8  ;;  %v4449_v35 = vpop.f32.mrb[126].mxu0  ;;  %3256 = vadd.xlane.f32.xlu0 %v3216_v48 }
 0x811   : > { %v3183_v49 = vmax.f32 %v3099_v7, 0.0  ;;  %v3102_v62 = vadd.f32 %v4449_v35, %v5842_v54  ;;  %v3093_v37 = vpop.f32.mrb[127].mxu0 }
 0x812   : > { %v3094_v0 = vadd.f32 %v5842_v54, %v3093_v37  ;;  %3258 = vadd.xlane.f32.xlu1 %v3217_v14  ;;  %v3181_v11 = vmax.f32 %v3091_v55, 0.0 }
 0x813   : > { %v3184_v23 = vmax.f32 %v3102_v62, 0.0  ;;  %v3222_v10 = vmul.f32 %v5849_v45, %v3183_v49 }
 0x814   : > { %v3182_v50 = vmax.f32 %v3094_v0, 0.0  ;;  %v3220_v47 = vmul.f32 %v5849_v45, %v3181_v11 }
 0x815   : > { %v3223_v15 = vmul.f32 %v5849_v45, %v3184_v23  ;;  %3268 = vadd.xlane.f32.xlu0 %v3222_v10 }
 0x816   : > { %v4452_v44 = vpop.f32.mrb[128].mxu0  ;;  %v3221_v41 = vmul.f32 %v5849_v45, %v3182_v50 }
 0x817   : > { %v3115_v13 = vadd.f32 %v4452_v44, %v5842_v54  ;;  %v3106_v28 = vpop.f32.mrb[129].mxu0  ;;  %3270 = vadd.xlane.f32.xlu1 %v3223_v15 }
 0x818   : > { %v3107_v27 = vadd.f32 %v5842_v54, %v3106_v28  ;;  %v4453_v59 = vpop.f32.mrb[130].mxu0 }
 0x819   : > { %v3187_v36 = vmax.f32 %v3115_v13, 0.0  ;;  %v3118_v3 = vadd.f32 %v4453_v59, %v5842_v54  ;;  %v3109_v5 = vpop.f32.mrb[131].mxu0  ;;  %3264 = vadd.xlane.f32.xlu0 %v3220_v47  ;;  %v5913_v59 = vld [vmem:[#allocation3] ss:$0 sm:$0xff] }
 0x81a   : > { %v3110_v51 = vadd.f32 %v5842_v54, %v3109_v5  ;;  %v3185_v30 = vmax.f32 %v3107_v27, 0.0 }
 0x81b   : > { %v3188_v16 = vmax.f32 %v3118_v3, 0.0  ;;  %3266 = vadd.xlane.f32.xlu1 %v3221_v41  ;;  %v3226_v24 = vmul.f32 %v5849_v45, %v3187_v36 }
 0x81c   : > { %v3186_v32 = vmax.f32 %v3110_v51, 0.0  ;;  %v3224_v40 = vmul.f32 %v5849_v45, %v3185_v30 }
 0x81d   : > { %v3227_v1 = vmul.f32 %v5849_v45, %v3188_v16  ;;  %3276 = vadd.xlane.f32.xlu0 %v3226_v24 }
 0x81e   : > { %v4456_v60 = vpop.f32.mrb[132].mxu0  ;;  %v3225_v33 = vmul.f32 %v5849_v45, %v3186_v32 }
 0x81f   : > { %v3131_v43 = vadd.f32 %v4456_v60, %v5842_v54  ;;  %v3122_v53 = vpop.f32.mrb[133].mxu0  ;;  %3278 = vadd.xlane.f32.xlu1 %v3227_v1 }
 0x820   : > { %v3123_v18 = vadd.f32 %v5842_v54, %v3122_v53  ;;  %v4457_v52 = vpop.f32.mrb[134].mxu0 }
 0x821   : > { %v3191_v22 = vmax.f32 %v3131_v43, 0.0  ;;  %v3134_v12 = vadd.f32 %v4457_v52, %v5842_v54  ;;  %v3125_v38 = vpop.f32.mrb[135].mxu0  ;;  %3272 = vadd.xlane.f32.xlu0 %v3224_v40 }
 0x822   : > { %v3126_v34 = vadd.f32 %v5842_v54, %v3125_v38  ;;  %v3189_v57 = vmax.f32 %v3123_v18, 0.0 }
 0x823   : > { %v3192_v42 = vmax.f32 %v3134_v12, 0.0  ;;  %3274 = vadd.xlane.f32.xlu1 %v3225_v33  ;;  %v3230_v19 = vmul.f32 %v5849_v45, %v3191_v22 }
 0x824   : > { %v3190_v58 = vmax.f32 %v3126_v34, 0.0  ;;  %v3228_v17 = vmul.f32 %v5849_v45, %v3189_v57 }
 0x825   : > { %v3231_v29 = vmul.f32 %v5849_v45, %v3192_v42  ;;  %3284 = vadd.xlane.f32.xlu0 %v3230_v19 }
 0x826   : > { %v4460_v31 = vpop.f32.mrb[136].mxu0  ;;  %v3229_v9 = vmul.f32 %v5849_v45, %v3190_v58 }
 0x827   : > { %v3147_v25 = vadd.f32 %v4460_v31, %v5842_v54  ;;  %v3138_v46 = vpop.f32.mrb[137].mxu0  ;;  %3286 = vadd.xlane.f32.xlu1 %v3231_v29 }
 0x828   : > { %v3139_v4 = vadd.f32 %v5842_v54, %v3138_v46  ;;  %v4461_v56 = vpop.f32.mrb[138].mxu0 }
 0x829   : > { %v3195_v2 = vmax.f32 %v3147_v25, 0.0  ;;  %v3150_v39 = vadd.f32 %v4461_v56, %v5842_v54  ;;  %v3141_v20 = vpop.f32.mrb[139].mxu0  ;;  %3280 = vadd.xlane.f32.xlu0 %v3228_v17 }
 0x82a   : > { %v3142_v61 = vadd.f32 %v5842_v54, %v3141_v20  ;;  %v3193_v63 = vmax.f32 %v3139_v4, 0.0 }
 0x82b   : > { %v3196_v26 = vmax.f32 %v3150_v39, 0.0  ;;  %3282 = vadd.xlane.f32.xlu1 %v3229_v9  ;;  %v3234_v21 = vmul.f32 %v5849_v45, %v3195_v2 }
 0x82c   : > { %v3194_v6 = vmax.f32 %v3142_v61, 0.0  ;;  %v3232_v62 = vmul.f32 %v5849_v45, %v3193_v63 }
 0x82d   : > { %v3235_v7 = vmul.f32 %v5849_v45, %v3196_v26  ;;  %3292 = vadd.xlane.f32.xlu0 %v3234_v21 }
 0x82e   : > { %v4464_v8 = vpop.f32.mrb[140].mxu0  ;;  %v3233_v14 = vmul.f32 %v5849_v45, %v3194_v6 }
 0x82f   : > { %v3154_v55 = vpop.f32.mrb[141].mxu0  ;;  %3294 = vadd.xlane.f32.xlu1 %v3235_v7  ;;  %v3163_v35 = vadd.f32 %v4464_v8, %v5842_v54 }
 0x830   : > { %v3155_v48 = vadd.f32 %v5842_v54, %v3154_v55  ;;  %v4465_v49 = vpop.f32.mrb[142].mxu0 }
 0x831   : > { %v3157_v37 = vpop.f32.mrb[143].mxu0  ;;  %v3166_v23 = vadd.f32 %v4465_v49, %v5842_v54  ;;  %3288 = vadd.xlane.f32.xlu0 %v3232_v62  ;;  %v3199_v11 = vmax.f32 %v3163_v35, 0.0 }
 0x832   : > { %v3197_v0 = vmax.f32 %v3155_v48, 0.0  ;;  %v3158_v10 = vadd.f32 %v5842_v54, %v3157_v37 }
 0x833   : > { %3290 = vadd.xlane.f32.xlu1 %v3233_v14  ;;  %v3200_v44 = vmax.f32 %v3166_v23, 0.0  ;;  %v3238_v28 = vmul.f32 %v5849_v45, %v3199_v11 }
 0x834   : > { %v3198_v50 = vmax.f32 %v3158_v10, 0.0  ;;  %v3236_v15 = vmul.f32 %v5849_v45, %v3197_v0 }
 0x835   : > { %v3239_v27 = vmul.f32 %v5849_v45, %v3200_v44 }
 0x836   : > { %3296 = vadd.xlane.f32.xlu0 %v3236_v15  ;;  %v3237_v13 = vmul.f32 %v5849_v45, %v3198_v50 }
 0x838   : > { %3298 = vadd.xlane.f32.xlu1 %v3237_v13 }
 0x83a   : > { %3300 = vadd.xlane.f32.xlu0 %v3238_v28 }
 0x83c   : > { %3302 = vadd.xlane.f32.xlu1 %v3239_v27 }
 0x885   : > { %v3245_v54 = vpop.xlane.xlu1 %3244 }
 0x886   : > { %v3313_v47 = vadd.f32 %v5913_v59, %v3245_v54  ;;  %v3241_v36 = vpop.xlane.xlu0 %3240 }
 0x887   : > { %v3311_v3 = vadd.f32 %v5913_v59, %v3241_v36 }
 0x888   : > { %v3786_v5 = vmul.f32 -1.442695, %v3313_v47 }
 0x889   : > { %v3784_v41 = vmul.f32 -1.442695, %v3311_v3  ;;  %v3247_v51 = vpop.xlane.xlu1 %3246 }
 0x88a   : > { %4563 = vpow2.f32 %v3786_v5  ;;  %v3314_v16 = vadd.f32 %v5913_v59, %v3247_v51  ;;  %v3243_v24 = vpop.xlane.xlu0 %3242 }
 0x88b   : > { %4565 = vpow2.f32 %v3784_v41  ;;  %v3312_v30 = vadd.f32 %v5913_v59, %v3243_v24 }
 0x88c   : > { %v3787_v45 = vmul.f32 -1.442695, %v3314_v16 }
 0x88d   : > { %v3785_v32 = vmul.f32 -1.442695, %v3312_v30 }
 0x88e   : > { %4567 = vpow2.f32 %v3787_v45 }
 0x88f   : > { %4569 = vpow2.f32 %v3785_v32 }
 0x891   : > { %v3253_v1 = vpop.xlane.xlu0 %3252 }
 0x892   : > { %v3317_v60 = vadd.f32 %v5913_v59, %v3253_v1 }
 0x893   : > { %v3255_v43 = vpop.xlane.xlu1 %3254 }
 0x894   : > { %v3318_v53 = vadd.f32 %v5913_v59, %v3255_v43  ;;  %v3790_v18 = vmul.f32 -1.442695, %v3317_v60  ;;  %v4564_v38 = vpop.eup %4563 }
 0x895   : > { %v3249_v40 = vpop.xlane.xlu0 %3248  ;;  %v4566_v34 = vpop.eup %4565  ;;  %v3441_v42 = vadd.f32 1.0, %v4564_v38 }
 0x896   : > { %v3791_v52 = vmul.f32 -1.442695, %v3318_v53  ;;  %4571 = vpow2.f32 %v3790_v18  ;;  %v3315_v22 = vadd.f32 %v5913_v59, %v3249_v40  ;;  %v3439_v57 = vadd.f32 1.0, %v4566_v34 }
 0x897   : > { %v3251_v12 = vpop.xlane.xlu1 %3250 }
 0x898   : > { %4573 = vpow2.f32 %v3791_v52  ;;  %v3316_v33 = vadd.f32 %v5913_v59, %v3251_v12  ;;  %v3788_v19 = vmul.f32 -1.442695, %v3315_v22  ;;  %v4568_v46 = vpop.eup %4567 }
 0x899   : > { %v3261_v29 = vpop.xlane.xlu0 %3260  ;;  %4575 = vrcp.f32 %v3441_v42  ;;  %v4570_v56 = vpop.eup %4569  ;;  %v3442_v17 = vadd.f32 1.0, %v4568_v46 }
 0x89a   : > { %v3789_v58 = vmul.f32 -1.442695, %v3316_v33  ;;  %v3321_v31 = vadd.f32 %v5913_v59, %v3261_v29  ;;  %4577 = vrcp.f32 %v3439_v57  ;;  %v3440_v39 = vadd.f32 1.0, %v4570_v56 }
 0x89b   : > { %v3263_v25 = vpop.xlane.xlu1 %3262  ;;  %4579 = vpow2.f32 %v3788_v19 }
 0x89c   : > { %v3322_v4 = vadd.f32 %v5913_v59, %v3263_v25  ;;  %v3794_v2 = vmul.f32 -1.442695, %v3321_v31  ;;  %4581 = vpow2.f32 %v3789_v58 }
 0x89d   : > { %v3257_v9 = vpop.xlane.xlu0 %3256  ;;  %4583 = vrcp.f32 %v3442_v17 }
 0x89e   : > { %v3795_v20 = vmul.f32 -1.442695, %v3322_v4  ;;  %v3319_v61 = vadd.f32 %v5913_v59, %v3257_v9  ;;  %4585 = vrcp.f32 %v3440_v39 }
 0x89f   : > { %v3259_v26 = vpop.xlane.xlu1 %3258  ;;  %4587 = vpow2.f32 %v3794_v2 }
 0x8a0   : > { %v3320_v21 = vadd.f32 %v5913_v59, %v3259_v26  ;;  %v4572_v63 = vpop.eup %4571  ;;  %v3792_v6 = vmul.f32 -1.442695, %v3319_v61  ;;  %4589 = vpow2.f32 %v3795_v20 }
 0x8a1   : > { %v3445_v8 = vadd.f32 1.0, %v4572_v63 }
 0x8a2   : > { %v4574_v7 = vpop.eup %4573  ;;  %v3793_v55 = vmul.f32 -1.442695, %v3320_v21  ;;  %v3269_v35 = vpop.xlane.xlu0 %3268  ;;  %4591 = vpow2.f32 %v3792_v6 }
 0x8a3   : > { %v3446_v48 = vadd.f32 1.0, %v4574_v7  ;;  %v3325_v49 = vadd.f32 %v5913_v59, %v3269_v35  ;;  %4593 = vrcp.f32 %v3445_v8  ;;  %v4576_v14 = vpop.eup %4575 }
 0x8a4   : > { %v3271_v62 = vpop.xlane.xlu1 %3270  ;;  %v4578_v23 = vpop.eup %4577  ;;  %3538 = vst.msk [vmem:[%s5932_s16 + $0x10] sm:$0xff] %vm3535_vm2, %v4576_v14 }
 0x8a5   : > { %v3326_v37 = vadd.f32 %v5913_v59, %v3271_v62  ;;  %4595 = vrcp.f32 %v3446_v48  ;;  %v3798_v0 = vmul.f32 -1.442695, %v3325_v49  ;;  %v4580_v50 = vpop.eup %4579  ;;  %3536 = vst.msk [vmem:[%s5932_s16] sm:$0xff] %vm3535_vm2, %v4578_v23 }
 0x8a6   : > { %4597 = vpow2.f32 %v3793_v55  ;;  %v3265_v11 = vpop.xlane.xlu0 %3264  ;;  %v4582_v13 = vpop.eup %4581  ;;  %v3443_v28 = vadd.f32 1.0, %v4580_v50 }
 0x8a7   : > { %v3799_v10 = vmul.f32 -1.442695, %v3326_v37  ;;  %4599 = vpow2.f32 %v3798_v0  ;;  %v3323_v15 = vadd.f32 %v5913_v59, %v3265_v11  ;;  %v4584_v54 = vpop.eup %4583  ;;  %v3444_v47 = vadd.f32 1.0, %v4582_v13 }
 0x8a8   : > { %v3267_v44 = vpop.xlane.xlu1 %3266  ;;  %v4586_v3 = vpop.eup %4585  ;;  %3539 = vst.msk [vmem:[%s5932_s16 + $0x18] sm:$0xff] %vm3535_vm2, %v4584_v54 }
 0x8a9   : > { %4601 = vpow2.f32 %v3799_v10  ;;  %v3324_v27 = vadd.f32 %v5913_v59, %v3267_v44  ;;  %v3796_v36 = vmul.f32 -1.442695, %v3323_v15  ;;  %v4588_v51 = vpop.eup %4587  ;;  %3537 = vst.msk [vmem:[%s5932_s16 + $0x8] sm:$0xff] %vm3535_vm2, %v4586_v3 }
 0x8aa   : > { %4603 = vrcp.f32 %v3443_v28  ;;  %v3277_v41 = vpop.xlane.xlu0 %3276  ;;  %v4590_v30 = vpop.eup %4589  ;;  %v3449_v45 = vadd.f32 1.0, %v4588_v51 }
 0x8ab   : > { %v3797_v5 = vmul.f32 -1.442695, %v3324_v27  ;;  %4605 = vrcp.f32 %v3444_v47  ;;  %v3329_v16 = vadd.f32 %v5913_v59, %v3277_v41  ;;  %v3450_v60 = vadd.f32 1.0, %v4590_v30 }
 0x8ac   : > { %v3279_v24 = vpop.xlane.xlu1 %3278  ;;  %4607 = vpow2.f32 %v3796_v36  ;;  %v4592_v1 = vpop.eup %4591 }
 0x8ad   : > { %v3330_v32 = vadd.f32 %v5913_v59, %v3279_v24  ;;  %4609 = vpow2.f32 %v3797_v5  ;;  %v3802_v43 = vmul.f32 -1.442695, %v3329_v16  ;;  %v4594_v53 = vpop.eup %4593  ;;  %v3447_v18 = vadd.f32 1.0, %v4592_v1 }
 0x8ae   : > { %4611 = vrcp.f32 %v3449_v45  ;;  %v3273_v40 = vpop.xlane.xlu0 %3272  ;;  %3542 = vst.msk [vmem:[%s5932_s16 + $0x30] sm:$0xff] %vm3535_vm2, %v4594_v53 }
 0x8af   : > { %v3803_v52 = vmul.f32 -1.442695, %v3330_v32  ;;  %v4596_v22 = vpop.eup %4595  ;;  %4613 = vrcp.f32 %v3450_v60  ;;  %v3327_v12 = vadd.f32 %v5913_v59, %v3273_v40 }
 0x8b0   : > { %v3275_v38 = vpop.xlane.xlu1 %3274  ;;  %v4598_v33 = vpop.eup %4597  ;;  %3543 = vst.msk [vmem:[%s5932_s16 + $0x38] sm:$0xff] %vm3535_vm2, %v4596_v22  ;;  %4615 = vrcp.f32 %v3447_v18 }
 0x8b1   : > { %v3328_v34 = vadd.f32 %v5913_v59, %v3275_v38  ;;  %v4600_v42 = vpop.eup %4599  ;;  %v3448_v19 = vadd.f32 1.0, %v4598_v33  ;;  %4617 = vpow2.f32 %v3802_v43  ;;  %v3800_v29 = vmul.f32 -1.442695, %v3327_v12 }
 0x8b2   : > { %v3453_v58 = vadd.f32 1.0, %v4600_v42  ;;  %4619 = vpow2.f32 %v3803_v52  ;;  %v3285_v31 = vpop.xlane.xlu0 %3284 }
 0x8b3   : > { %v4602_v57 = vpop.eup %4601  ;;  %4621 = vrcp.f32 %v3448_v19  ;;  %v3801_v46 = vmul.f32 -1.442695, %v3328_v34  ;;  %v3333_v4 = vadd.f32 %v5913_v59, %v3285_v31 }
 0x8b4   : > { %v3454_v25 = vadd.f32 1.0, %v4602_v57  ;;  %v3287_v56 = vpop.xlane.xlu1 %3286  ;;  %v4604_v17 = vpop.eup %4603  ;;  %4623 = vrcp.f32 %v3453_v58 }
 0x8b5   : > { %v3334_v2 = vadd.f32 %v5913_v59, %v3287_v56  ;;  %v4606_v39 = vpop.eup %4605  ;;  %3540 = vst.msk [vmem:[%s5932_s16 + $0x20] sm:$0xff] %vm3535_vm2, %v4604_v17  ;;  %v3806_v20 = vmul.f32 -1.442695, %v3333_v4 }
 0x8b6   : > { %4625 = vrcp.f32 %v3454_v25  ;;  %v4608_v9 = vpop.eup %4607  ;;  %3541 = vst.msk [vmem:[%s5932_s16 + $0x28] sm:$0xff] %vm3535_vm2, %v4606_v39  ;;  %v3281_v61 = vpop.xlane.xlu0 %3280 }
 0x8b7   : > { %4627 = vpow2.f32 %v3800_v29  ;;  %v4610_v26 = vpop.eup %4609  ;;  %v3451_v21 = vadd.f32 1.0, %v4608_v9  ;;  %v3807_v63 = vmul.f32 -1.442695, %v3334_v2  ;;  %v3331_v6 = vadd.f32 %v5913_v59, %v3281_v61 }
 0x8b8   : > { %4629 = vpow2.f32 %v3801_v46  ;;  %v3283_v7 = vpop.xlane.xlu1 %3282  ;;  %v4612_v8 = vpop.eup %4611  ;;  %v3452_v55 = vadd.f32 1.0, %v4610_v26 }
 0x8b9   : > { %4631 = vpow2.f32 %v3806_v20  ;;  %v3332_v35 = vadd.f32 %v5913_v59, %v3283_v7  ;;  %v4614_v48 = vpop.eup %4613  ;;  %3546 = vst.msk [vmem:[%s5932_s16 + $0x50] sm:$0xff] %vm3535_vm2, %v4612_v8  ;;  %v3804_v49 = vmul.f32 -1.442695, %v3331_v6 }
 0x8ba   : > { %4633 = vrcp.f32 %v3451_v21  ;;  %v4616_v62 = vpop.eup %4615  ;;  %3547 = vst.msk [vmem:[%s5932_s16 + $0x58] sm:$0xff] %vm3535_vm2, %v4614_v48  ;;  %v3293_v14 = vpop.xlane.xlu0 %3292 }
 0x8bb   : > { %4635 = vrcp.f32 %v3452_v55  ;;  %v3805_v37 = vmul.f32 -1.442695, %v3332_v35  ;;  %v4618_v0 = vpop.eup %4617  ;;  %3544 = vst.msk [vmem:[%s5932_s16 + $0x40] sm:$0xff] %vm3535_vm2, %v4616_v62  ;;  %v3337_v23 = vadd.f32 %v5913_v59, %v3293_v14 }
 0x8bc   : > { %4637 = vpow2.f32 %v3807_v63  ;;  %v3295_v10 = vpop.xlane.xlu1 %3294  ;;  %v4620_v11 = vpop.eup %4619  ;;  %v3457_v50 = vadd.f32 1.0, %v4618_v0 }
 0x8bd   : > { %4639 = vpow2.f32 %v3804_v49  ;;  %v3338_v15 = vadd.f32 %v5913_v59, %v3295_v10  ;;  %v4622_v44 = vpop.eup %4621  ;;  %v3458_v13 = vadd.f32 1.0, %v4620_v11  ;;  %v3810_v28 = vmul.f32 -1.442695, %v3337_v23 }
 0x8be   : > { %4641 = vpow2.f32 %v3805_v37  ;;  %v4624_v27 = vpop.eup %4623  ;;  %3545 = vst.msk [vmem:[%s5932_s16 + $0x48] sm:$0xff] %vm3535_vm2, %v4622_v44  ;;  %v3289_v47 = vpop.xlane.xlu0 %3288 }
 0x8bf   : > { %4643 = vrcp.f32 %v3457_v50  ;;  %v3811_v54 = vmul.f32 -1.442695, %v3338_v15  ;;  %3550 = vst.msk [vmem:[%s5932_s16 + $0x70] sm:$0xff] %vm3535_vm2, %v4624_v27  ;;  %v3335_v3 = vadd.f32 %v5913_v59, %v3289_v47 }
 0x8c0   : > { %v4626_v36 = vpop.eup %4625  ;;  %4645 = vrcp.f32 %v3458_v13  ;;  %v3291_v5 = vpop.xlane.xlu1 %3290 }
 0x8c1   : > { %v4628_v41 = vpop.eup %4627  ;;  %3551 = vst.msk [vmem:[%s5932_s16 + $0x78] sm:$0xff] %vm3535_vm2, %v4626_v36  ;;  %4647 = vpow2.f32 %v3810_v28  ;;  %v3336_v51 = vadd.f32 %v5913_v59, %v3291_v5  ;;  %v3808_v32 = vmul.f32 -1.442695, %v3335_v3 }
 0x8c2   : > { %v4630_v16 = vpop.eup %4629  ;;  %v3455_v24 = vadd.f32 1.0, %v4628_v41  ;;  %4649 = vpow2.f32 %v3811_v54 }
 0x8c3   : > { %v4632_v30 = vpop.eup %4631  ;;  %v3456_v45 = vadd.f32 1.0, %v4630_v16  ;;  %v3297_v1 = vpop.xlane.xlu0 %3296  ;;  %v3809_v53 = vmul.f32 -1.442695, %v3336_v51 }
 0x8c4   : > { %v4634_v60 = vpop.eup %4633  ;;  %4651 = vrcp.f32 %v3455_v24  ;;  %v3461_v43 = vadd.f32 1.0, %v4632_v30  ;;  %v3339_v18 = vadd.f32 %v5913_v59, %v3297_v1 }
 0x8c5   : > { %v4636_v52 = vpop.eup %4635  ;;  %3548 = vst.msk [vmem:[%s5932_s16 + $0x60] sm:$0xff] %vm3535_vm2, %v4634_v60  ;;  %4653 = vrcp.f32 %v3456_v45  ;;  %v3299_v40 = vpop.xlane.xlu1 %3298 }
 0x8c6   : > { %v4638_v22 = vpop.eup %4637  ;;  %3549 = vst.msk [vmem:[%s5932_s16 + $0x68] sm:$0xff] %vm3535_vm2, %v4636_v52  ;;  %4655 = vrcp.f32 %v3461_v43  ;;  %v3340_v12 = vadd.f32 %v5913_v59, %v3299_v40  ;;  %v3812_v57 = vmul.f32 -1.442695, %v3339_v18 }
 0x8c7   : > { %v4640_v38 = vpop.eup %4639  ;;  %v3462_v33 = vadd.f32 1.0, %v4638_v22  ;;  %4657 = vpow2.f32 %v3808_v32  ;;  %v3301_v34 = vpop.xlane.xlu0 %3300 }
 0x8c8   : > { %v4642_v42 = vpop.eup %4641  ;;  %v3459_v19 = vadd.f32 1.0, %v4640_v38  ;;  %4659 = vpow2.f32 %v3809_v53  ;;  %v3341_v58 = vadd.f32 %v5913_v59, %v3301_v34  ;;  %v3813_v25 = vmul.f32 -1.442695, %v3340_v12 }
 0x8c9   : > { %v4644_v29 = vpop.eup %4643  ;;  %4661 = vrcp.f32 %v3462_v33  ;;  %v3460_v31 = vadd.f32 1.0, %v4642_v42  ;;  %v3303_v46 = vpop.xlane.xlu1 %3302 }
 0x8ca   : > { %v4646_v4 = vpop.eup %4645  ;;  %3554 = vst.msk [vmem:[%s5932_s16 + $0x90] sm:$0xff] %vm3535_vm2, %v4644_v29  ;;  %4663 = vrcp.f32 %v3459_v19  ;;  %v3342_v56 = vadd.f32 %v5913_v59, %v3303_v46  ;;  %v3814_v20 = vmul.f32 -1.442695, %v3341_v58 }
 0x8cb   : > { %v4648_v17 = vpop.eup %4647  ;;  %3555 = vst.msk [vmem:[%s5932_s16 + $0x98] sm:$0xff] %vm3535_vm2, %v4646_v4  ;;  %4665 = vrcp.f32 %v3460_v31 }
 0x8cc   : > { %v4650_v2 = vpop.eup %4649  ;;  %v3465_v39 = vadd.f32 1.0, %v4648_v17  ;;  %4667 = vpow2.f32 %v3812_v57  ;;  %v3815_v61 = vmul.f32 -1.442695, %v3342_v56 }
 0x8cd   : > { %v3466_v9 = vadd.f32 1.0, %v4650_v2  ;;  %4669 = vpow2.f32 %v3813_v25 }
 0x8ce   : > { %v4652_v26 = vpop.eup %4651  ;;  %4671 = vrcp.f32 %v3465_v39 }
 0x8cf   : > { %v4654_v21 = vpop.eup %4653  ;;  %3552 = vst.msk [vmem:[%s5932_s16 + $0x80] sm:$0xff] %vm3535_vm2, %v4652_v26  ;;  %4673 = vrcp.f32 %v3466_v9 }
 0x8d0   : > { %v4656_v59 = vpop.eup %4655  ;;  %3553 = vst.msk [vmem:[%s5932_s16 + $0x88] sm:$0xff] %vm3535_vm2, %v4654_v21  ;;  %4675 = vpow2.f32 %v3814_v20 }
 0x8d1   : > { %v4658_v63 = vpop.eup %4657  ;;  %3558 = vst.msk [vmem:[%s5932_s16 + $0xb0] sm:$0xff] %vm3535_vm2, %v4656_v59  ;;  %4677 = vpow2.f32 %v3815_v61 }
 0x8d2   : > { %v4660_v6 = vpop.eup %4659  ;;  %v3463_v7 = vadd.f32 1.0, %v4658_v63 }
 0x8d3   : > { %v4662_v8 = vpop.eup %4661  ;;  %v3464_v55 = vadd.f32 1.0, %v4660_v6 }
 0x8d4   : > { %v4664_v35 = vpop.eup %4663  ;;  %3559 = vst.msk [vmem:[%s5932_s16 + $0xb8] sm:$0xff] %vm3535_vm2, %v4662_v8  ;;  %4679 = vrcp.f32 %v3463_v7 }
 0x8d5   : > { %v4666_v48 = vpop.eup %4665  ;;  %3556 = vst.msk [vmem:[%s5932_s16 + $0xa0] sm:$0xff] %vm3535_vm2, %v4664_v35  ;;  %4681 = vrcp.f32 %v3464_v55 }
 0x8d6   : > { %v4668_v49 = vpop.eup %4667  ;;  %3557 = vst.msk [vmem:[%s5932_s16 + $0xa8] sm:$0xff] %vm3535_vm2, %v4666_v48 }
 0x8d7   : > { %v4670_v62 = vpop.eup %4669  ;;  %v3467_v37 = vadd.f32 1.0, %v4668_v49 }
 0x8d8   : > { %v4672_v14 = vpop.eup %4671  ;;  %v3468_v0 = vadd.f32 1.0, %v4670_v62 }
 0x8d9   : > { %v4674_v23 = vpop.eup %4673  ;;  %3562 = vst.msk [vmem:[%s5932_s16 + $0xd0] sm:$0xff] %vm3535_vm2, %v4672_v14  ;;  %4683 = vrcp.f32 %v3467_v37 }
 0x8da   : > { %v4676_v10 = vpop.eup %4675  ;;  %3563 = vst.msk [vmem:[%s5932_s16 + $0xd8] sm:$0xff] %vm3535_vm2, %v4674_v23  ;;  %4685 = vrcp.f32 %v3468_v0 }
 0x8db   : > { %v4678_v11 = vpop.eup %4677  ;;  %v3469_v50 = vadd.f32 1.0, %v4676_v10 }
 0x8dc   : > { %v3470_v15 = vadd.f32 1.0, %v4678_v11 }
 0x8dd   : > { %4687 = vrcp.f32 %v3469_v50 }
 0x8de   : > { %v4680_v44 = vpop.eup %4679  ;;  %4689 = vrcp.f32 %v3470_v15 }
 0x8df   : > { %v4682_v13 = vpop.eup %4681  ;;  %3560 = vst.msk [vmem:[%s5932_s16 + $0xc0] sm:$0xff] %vm3535_vm2, %v4680_v44 }
 0x8e0   : > { %3561 = vst.msk [vmem:[%s5932_s16 + $0xc8] sm:$0xff] %vm3535_vm2, %v4682_v13 }
 0x8e3   : > { %v4684_v28 = vpop.eup %4683 }
 0x8e4   : > { %v4686_v27 = vpop.eup %4685  ;;  %3564 = vst.msk [vmem:[%s5932_s16 + $0xe0] sm:$0xff] %vm3535_vm2, %v4684_v28 }
 0x8e5   : > { %3565 = vst.msk [vmem:[%s5932_s16 + $0xe8] sm:$0xff] %vm3535_vm2, %v4686_v27 }
 0x8e7   : > { %v4688_v54 = vpop.eup %4687 }
 0x8e8   : > { %v4690_v47 = vpop.eup %4689  ;;  %3566 = vst.msk [vmem:[%s5932_s16 + $0xf0] sm:$0xff] %vm3535_vm2, %v4688_v54 }
 0x8e9   : > { %3567 = vst.msk [vmem:[%s5932_s16 + $0xf8] sm:$0xff] %vm3535_vm2, %v4690_v47 }
 0x8ea PF: > { %s25_s27 = sadd.s32 1, %s4697_s27  }
 0x8eb   : > { %p22_p4 = scmp.ge.s32.totalorder %s25_s27, 6  }
 0x8ed   :  { %24 = sbr.rel (!%p22_p4) target bundleno = 3 (0x3), region = 110 }

</bundles_post_ra>
